<compile_context>
chip_gen: v7x
topology: tpu7x:2x2x1
jax: 0.10.0
libtpu: 0.0.40
codegen_flags: <defaults>
</compile_context>

<pallas_src>
import jax
import jax.numpy as jnp
from jax import lax
from jax.experimental import pallas as pl
from jax.experimental.pallas import tpu as pltpu

# ---- problem sizes (consistent with the module's params) -------------------
B = 2        # batch size
T = 8        # params.max_seq_len
E = 16       # params.embedding_dim
H = 32       # params.lstm_hidden_dim
HOUT = 32    # params.outputHiddenDim


# ------------------------------ Pallas kernel --------------------------------
def _net_kernel(x_ref, len_ref, attn_ref,
                wih0_ref, whhf0_ref, whhr0_ref, b0_ref,
                wih1_ref, whhf1_ref, whhr1_ref, b1_ref,
                fcw1_ref, fcb1_ref, fcw2_ref, fcb2_ref,
                out_ref, out0_ref):
    """Whole Net.forward in one kernel.

    x_ref    : (T*B, E)   time-major flattened embeddings
    len_ref  : (B, 1)     int32 sequence lengths
    attn_ref : (1, T)     attention parameter
    wih{0,1} : (Din, 8H)  [W_ih_fwd | W_ih_rev]^T     b{0,1}: (1, 8H) (b_ih+b_hh)
    whh{f,r}{0,1}: (H, 4H)
    fcw1: (2H, HOUT)  fcb1: (1, HOUT)  fcw2: (HOUT, T)  fcb2: (1, T)
    out_ref  : (B, T)
    out0_ref : (T*B, 2H)  VMEM scratch holding layer-0 output [fwd | rev]
    """
    f32 = jnp.float32
    H4 = 4 * H

    # validity mask (B, T): 1.0 where t < length
    t_idx = lax.broadcasted_iota(jnp.int32, (B, T), 1)
    valid = (t_idx < len_ref[...]).astype(f32)
    mcol = [valid[:, s:s + 1] for s in range(T)]            # (B,1) per time step

    def cell(gx, h, c, whh, m):
        """One LSTM cell step. gx = x@W_ih + b (precomputed), m = validity gate.

        Gating the carry with m reproduces packed-sequence semantics: the
        reverse direction effectively starts at t = len-1, and padded steps
        leave the state untouched (so its outputs at padded steps stay 0).
        """
        g = gx + jnp.dot(h, whh, preferred_element_type=f32)     # (B, 4H)
        # two full-width EUP passes on the (B, 4H) tile, then 32-lane slices
        sg = jax.nn.sigmoid(g)
        tg = jnp.tanh(g)
        i, f = sg[:, 0:H], sg[:, H:2 * H]                        # PyTorch order
        gg, o = tg[:, 2 * H:3 * H], sg[:, 3 * H:H4]              # i, f, g, o
        c_new = f * c + i * gg
        h_new = o * jnp.tanh(c_new)
        mb = jnp.broadcast_to(m, h.shape)                        # single bcast
        c = c + mb * (c_new - c)
        h = h + mb * (h_new - h)
        return h, c

    # ------------------------------ layer 0 ---------------------------------
    # Hoisted input projection for both directions: (T*B, E) @ (E, 8H).
    gx0 = (jnp.dot(x_ref[...], wih0_ref[...], preferred_element_type=f32)
           + b0_ref[...])
    whhf0 = whhf0_ref[...]
    whhr0 = whhr0_ref[...]

    hf = jnp.zeros((B, H), f32); cf = jnp.zeros((B, H), f32)
    hr = jnp.zeros((B, H), f32); cr = jnp.zeros((B, H), f32)
    for s in range(T):                       # static, fully unrolled (T = 8)
        tr = T - 1 - s
        # forward direction @ time s
        hf, cf = cell(gx0[s * B:(s + 1) * B, 0:H4], hf, cf, whhf0, mcol[s])
        out0_ref[s * B:(s + 1) * B, 0:H] = hf
        # reverse direction @ time tr (independent chain, interleaved for ILP)
        hr, cr = cell(gx0[tr * B:(tr + 1) * B, H4:2 * H4], hr, cr, whhr0,
                      mcol[tr])
        out0_ref[tr * B:(tr + 1) * B, H:2 * H] = hr

    # --------------- layer 1 (+ online attention pooling) -------------------
    gx1 = (jnp.dot(out0_ref[...], wih1_ref[...], preferred_element_type=f32)
           + b1_ref[...])
    whhf1 = whhf1_ref[...]
    whhr1 = whhr1_ref[...]

    # softmax over the full attention vector, then length mask (no renorm):
    # this is exactly what the PyTorch Attention module computes.
    scores = jax.nn.softmax(attn_ref[...], axis=-1)              # (1, T)
    wtime = scores * valid                                       # (B, T)
    wcol = [wtime[:, s:s + 1] for s in range(T)]

    hf1 = jnp.zeros((B, H), f32); cf1 = jnp.zeros((B, H), f32)
    hr1 = jnp.zeros((B, H), f32); cr1 = jnp.zeros((B, H), f32)
    acc_f = jnp.zeros((B, H), f32)
    acc_r = jnp.zeros((B, H), f32)
    for s in range(T):
        tr = T - 1 - s
        hf1, cf1 = cell(gx1[s * B:(s + 1) * B, 0:H4], hf1, cf1, whhf1, mcol[s])
        acc_f = acc_f + wcol[s] * hf1
        hr1, cr1 = cell(gx1[tr * B:(tr + 1) * B, H4:2 * H4], hr1, cr1, whhr1,
                        mcol[tr])
        acc_r = acc_r + wcol[tr] * hr1

    # ------------------------ FC head + length mask -------------------------
    # summed = [acc_f | acc_r] @ W1  (split by rows of W1 to avoid a concat)
    hid = jnp.maximum(
        jnp.dot(acc_f, fcw1_ref[0:H, :], preferred_element_type=f32)
        + jnp.dot(acc_r, fcw1_ref[H:2 * H, :], preferred_element_type=f32)
        + fcb1_ref[...], 0.0)                                    # (B, HOUT)
    logits = (jnp.dot(hid, fcw2_ref[...], preferred_element_type=f32)
              + fcb2_ref[...])                                   # (B, T)
    out_ref[...] = valid * logits + (1.0 - valid) * (-1e30)


# --------------------------------- wrapper -----------------------------------
def net_forward(x, lengths, p):
    """x: (B, T, E) padded embeddings (== unpacked PackedSequence), lengths: (B,)."""
    x_flat = jnp.transpose(x, (1, 0, 2)).reshape(T * B, E)   # time-major rows
    lens = lengths.astype(jnp.int32).reshape(B, 1)
    vmem = pl.BlockSpec(memory_space=pltpu.MemorySpace.VMEM)
    return pl.pallas_call(
        _net_kernel,
        out_shape=jax.ShapeDtypeStruct((B, T), jnp.float32),
        in_specs=[vmem] * 15,
        out_specs=vmem,
        scratch_shapes=[pltpu.VMEM((T * B, 2 * H), jnp.float32)],
    )(x_flat, lens, p['attn_w'],
      p['wih0'], p['whh_f0'], p['whh_r0'], p['b0'],
      p['wih1'], p['whh_f1'], p['whh_r1'], p['b1'],
      p['fc_w1'], p['fc_b1'], p['fc_w2'], p['fc_b2'])


# ------------------------------- parameters ----------------------------------
def init_params(key):
    keys = jax.random.split(key, 32)
    ki = iter(keys)

    def xavier(k, out_dim, in_dim):
        limit = (6.0 / (in_dim + out_dim)) ** 0.5
        return jax.random.uniform(k, (out_dim, in_dim), jnp.float32, -limit, limit)

    def uni(k, shape):
        return jax.random.uniform(k, shape, jnp.float32, 0.0, 1.0)

    p = {}
    # nn.LSTM(E, H, num_layers=2, bidirectional=True): xavier 2-D, uniform 1-D
    for layer, din in ((0, E), (1, 2 * H)):
        wihs, whhs, bs = [], [], []
        for _d in ('fwd', 'rev'):
            wih = xavier(next(ki), 4 * H, din)      # PyTorch weight_ih: (4H, Din)
            whh = xavier(next(ki), 4 * H, H)        # PyTorch weight_hh: (4H, H)
            bih = uni(next(ki), (4 * H,))
            bhh = uni(next(ki), (4 * H,))
            wihs.append(wih.T)                      # (Din, 4H)
            whhs.append(whh.T)                      # (H, 4H)
            bs.append(bih + bhh)
        p[f'wih{layer}'] = jnp.concatenate(wihs, axis=1)            # (Din, 8H)
        p[f'b{layer}'] = jnp.concatenate(bs).reshape(1, 8 * H)      # (1, 8H)
        p[f'whh_f{layer}'] = whhs[0]
        p[f'whh_r{layer}'] = whhs[1]
    # Attention: nn.Parameter(max_seq_len), uniform init
    p['attn_w'] = uni(next(ki), (T,)).reshape(1, T)
    # fc = Linear(2H, HOUT) -> ReLU -> Linear(HOUT, T)
    w1 = xavier(next(ki), HOUT, 2 * H)
    b1 = uni(next(ki), (HOUT,))
    w2 = xavier(next(ki), T, HOUT)
    b2 = uni(next(ki), (T,))
    p['fc_w1'] = w1.T
    p['fc_b1'] = b1.reshape(1, HOUT)
    p['fc_w2'] = w2.T
    p['fc_b2'] = b2.reshape(1, T)
    return p


# --------------------------- pure-JAX reference -------------------------------
def net_reference(x, lengths, p):
    """Straightforward JAX implementation of the same forward pass."""
    hp = lax.Precision.HIGHEST
    lengths = lengths.astype(jnp.int32)
    valid = (jnp.arange(T)[None, :] < lengths[:, None]).astype(jnp.float32)

    def cell(x_t, h, c, wih, whh, b):
        g = (jnp.dot(x_t, wih, precision=hp)
             + jnp.dot(h, whh, precision=hp) + b)
        i = jax.nn.sigmoid(g[:, 0:H])
        f = jax.nn.sigmoid(g[:, H:2 * H])
        gg = jnp.tanh(g[:, 2 * H:3 * H])
        o = jax.nn.sigmoid(g[:, 3 * H:4 * H])
        c_new = f * c + i * gg
        return o * jnp.tanh(c_new), c_new

    def bilstm(inp, wih, whh_f, whh_r, b):
        wih_f, wih_r = wih[:, :4 * H], wih[:, 4 * H:]
        b_f, b_r = b[:, :4 * H], b[:, 4 * H:]
        hf = cf = hr = cr = jnp.zeros((B, H), jnp.float32)
        outs_f, outs_r = [None] * T, [None] * T
        for t in range(T):
            m = valid[:, t:t + 1]
            hn, cn = cell(inp[:, t], hf, cf, wih_f, whh_f, b_f)
            hf = m * hn + (1 - m) * hf
            cf = m * cn + (1 - m) * cf
            outs_f[t] = hf
        for t in range(T - 1, -1, -1):
            m = valid[:, t:t + 1]
            hn, cn = cell(inp[:, t], hr, cr, wih_r, whh_r, b_r)
            hr = m * hn + (1 - m) * hr
            cr = m * cn + (1 - m) * cr
            outs_r[t] = hr
        return jnp.stack([jnp.concatenate([outs_f[t], outs_r[t]], axis=-1)
                          for t in range(T)], axis=1)            # (B, T, 2H)

    out0 = bilstm(x, p['wih0'], p['whh_f0'], p['whh_r0'], p['b0'])
    out1 = bilstm(out0, p['wih1'], p['whh_f1'], p['whh_r1'], p['b1'])
    scores = jax.nn.softmax(p['attn_w'], axis=-1)                # (1, T)
    summed = jnp.einsum('bt,btd->bd', scores * valid, out1, precision=hp)
    hid = jnp.maximum(jnp.dot(summed, p['fc_w1'], precision=hp) + p['fc_b1'], 0.0)
    logits = jnp.dot(hid, p['fc_w2'], precision=hp) + p['fc_b2']
    return valid * logits + (1.0 - valid) * (-1e30)


if __name__ == "__main__":
    key = jax.random.PRNGKey(0)
    kx, kp = jax.random.split(key)
    params = init_params(kp)
    x = jax.random.normal(kx, (B, T, E), jnp.float32)
    lengths = jnp.array([T, 5], dtype=jnp.int32)   # packed-seq lengths (descending)

    out = jax.jit(net_forward)(x, lengths, params)
    jax.block_until_ready(out)
    assert out.shape == (B, T)
    assert bool(jnp.all(out[1, 5:] <= -1e29))      # padded logits masked to -1e30

    ref = jax.jit(net_reference)(x, lengths, params)
    jax.block_until_ready(ref)
    assert bool(jnp.allclose(out, ref, rtol=1e-2, atol=1e-2)), (
        float(jnp.max(jnp.abs(out - ref))))
    print("KERNEL_OK")
</pallas_src>

<mosaic_0001>
module attributes {stable_mosaic.version = 11 : i64} {
  func.func @_net_kernel(%arg0: memref<16x16xf32, #tpu.memory_space<vmem>>, %arg1: memref<2x1xi32, #tpu.memory_space<vmem>>, %arg2: memref<1x8xf32, #tpu.memory_space<vmem>>, %arg3: memref<16x256xf32, #tpu.memory_space<vmem>>, %arg4: memref<32x128xf32, #tpu.memory_space<vmem>>, %arg5: memref<32x128xf32, #tpu.memory_space<vmem>>, %arg6: memref<1x256xf32, #tpu.memory_space<vmem>>, %arg7: memref<64x256xf32, #tpu.memory_space<vmem>>, %arg8: memref<32x128xf32, #tpu.memory_space<vmem>>, %arg9: memref<32x128xf32, #tpu.memory_space<vmem>>, %arg10: memref<1x256xf32, #tpu.memory_space<vmem>>, %arg11: memref<64x32xf32, #tpu.memory_space<vmem>>, %arg12: memref<1x32xf32, #tpu.memory_space<vmem>>, %arg13: memref<32x8xf32, #tpu.memory_space<vmem>>, %arg14: memref<1x8xf32, #tpu.memory_space<vmem>>, %arg15: memref<2x8xf32, #tpu.memory_space<vmem>>, %arg16: memref<16x64xf32, #tpu.memory_space<vmem>>) attributes {dimension_semantics = [], scalar_prefetch = 0 : i64, scratch_operands = 1 : i64, tpu.core_type = #tpu.core_type<tc>} {
    %0 = tpu.iota {dimensions = array<i32: 1>} : vector<2x8xi32>
    %c0 = arith.constant 0 : index
    %c0_0 = arith.constant 0 : index
    %1 = vector.load %arg1[%c0, %c0_0] : memref<2x1xi32, #tpu.memory_space<vmem>>, vector<2x1xi32>
    %2 = vector.broadcast %1 : vector<2x1xi32> to vector<2x8xi32>
    %3 = arith.cmpi slt, %0, %2 : vector<2x8xi32>
    %4 = arith.extui %3 : vector<2x8xi1> to vector<2x8xi32>
    %5 = arith.sitofp %4 : vector<2x8xi32> to vector<2x8xf32>
    %6 = vector.extract_strided_slice %5 {offsets = [0, 0], sizes = [2, 1], strides = [1, 1]} : vector<2x8xf32> to vector<2x1xf32>
    %7 = vector.extract_strided_slice %5 {offsets = [0, 1], sizes = [2, 1], strides = [1, 1]} : vector<2x8xf32> to vector<2x1xf32>
    %8 = vector.extract_strided_slice %5 {offsets = [0, 2], sizes = [2, 1], strides = [1, 1]} : vector<2x8xf32> to vector<2x1xf32>
    %9 = vector.extract_strided_slice %5 {offsets = [0, 3], sizes = [2, 1], strides = [1, 1]} : vector<2x8xf32> to vector<2x1xf32>
    %10 = vector.extract_strided_slice %5 {offsets = [0, 4], sizes = [2, 1], strides = [1, 1]} : vector<2x8xf32> to vector<2x1xf32>
    %11 = vector.extract_strided_slice %5 {offsets = [0, 5], sizes = [2, 1], strides = [1, 1]} : vector<2x8xf32> to vector<2x1xf32>
    %12 = vector.extract_strided_slice %5 {offsets = [0, 6], sizes = [2, 1], strides = [1, 1]} : vector<2x8xf32> to vector<2x1xf32>
    %13 = vector.extract_strided_slice %5 {offsets = [0, 7], sizes = [2, 1], strides = [1, 1]} : vector<2x8xf32> to vector<2x1xf32>
    %c0_1 = arith.constant 0 : index
    %c0_2 = arith.constant 0 : index
    %14 = vector.load %arg0[%c0_1, %c0_2] : memref<16x16xf32, #tpu.memory_space<vmem>>, vector<16x16xf32>
    %c0_3 = arith.constant 0 : index
    %c0_4 = arith.constant 0 : index
    %15 = vector.load %arg3[%c0_3, %c0_4] : memref<16x256xf32, #tpu.memory_space<vmem>>, vector<16x256xf32>
    %cst = arith.constant dense<0.000000e+00> : vector<16x256xf32>
    %16 = tpu.matmul %14, %15, %cst {dimension_numbers = #tpu.dot_dimension_numbers<[1], [0], [0], [1], [0, 0, 1, 1], [], []>} : vector<16x16xf32>, vector<16x256xf32>, vector<16x256xf32> -> vector<16x256xf32>
    %c0_5 = arith.constant 0 : index
    %c0_6 = arith.constant 0 : index
    %17 = vector.load %arg6[%c0_5, %c0_6] : memref<1x256xf32, #tpu.memory_space<vmem>>, vector<1x256xf32>
    %18 = vector.broadcast %17 : vector<1x256xf32> to vector<16x256xf32>
    %19 = arith.addf %16, %18 : vector<16x256xf32>
    %c0_7 = arith.constant 0 : index
    %c0_8 = arith.constant 0 : index
    %20 = vector.load %arg4[%c0_7, %c0_8] : memref<32x128xf32, #tpu.memory_space<vmem>>, vector<32x128xf32>
    %c0_9 = arith.constant 0 : index
    %c0_10 = arith.constant 0 : index
    %21 = vector.load %arg5[%c0_9, %c0_10] : memref<32x128xf32, #tpu.memory_space<vmem>>, vector<32x128xf32>
    %cst_11 = arith.constant 0.000000e+00 : f32
    %22 = vector.broadcast %cst_11 : f32 to vector<2x32xf32>
    %cst_12 = arith.constant 0.000000e+00 : f32
    %23 = vector.broadcast %cst_12 : f32 to vector<2x32xf32>
    %cst_13 = arith.constant 0.000000e+00 : f32
    %24 = vector.broadcast %cst_13 : f32 to vector<2x32xf32>
    %cst_14 = arith.constant 0.000000e+00 : f32
    %25 = vector.broadcast %cst_14 : f32 to vector<2x32xf32>
    %26 = vector.extract_strided_slice %19 {offsets = [0, 0], sizes = [2, 128], strides = [1, 1]} : vector<16x256xf32> to vector<2x128xf32>
    %cst_15 = arith.constant dense<0.000000e+00> : vector<2x128xf32>
    %27 = tpu.matmul %22, %20, %cst_15 {dimension_numbers = #tpu.dot_dimension_numbers<[1], [0], [0], [1], [0, 0, 1, 1], [], []>} : vector<2x32xf32>, vector<32x128xf32>, vector<2x128xf32> -> vector<2x128xf32>
    %28 = arith.addf %26, %27 : vector<2x128xf32>
    %29 = arith.negf %28 : vector<2x128xf32>
    %30 = math.exp %29 : vector<2x128xf32>
    %cst_16 = arith.constant 1.000000e+00 : f32
    %31 = vector.broadcast %cst_16 : f32 to vector<2x128xf32>
    %32 = arith.addf %31, %30 : vector<2x128xf32>
    %33 = arith.divf %31, %32 : vector<2x128xf32>
    %34 = math.tanh %28 : vector<2x128xf32>
    %35 = vector.extract_strided_slice %33 {offsets = [0, 0], sizes = [2, 32], strides = [1, 1]} : vector<2x128xf32> to vector<2x32xf32>
    %36 = vector.extract_strided_slice %33 {offsets = [0, 32], sizes = [2, 32], strides = [1, 1]} : vector<2x128xf32> to vector<2x32xf32>
    %37 = vector.extract_strided_slice %34 {offsets = [0, 64], sizes = [2, 32], strides = [1, 1]} : vector<2x128xf32> to vector<2x32xf32>
    %38 = vector.extract_strided_slice %33 {offsets = [0, 96], sizes = [2, 32], strides = [1, 1]} : vector<2x128xf32> to vector<2x32xf32>
    %39 = arith.mulf %36, %23 : vector<2x32xf32>
    %40 = arith.mulf %35, %37 : vector<2x32xf32>
    %41 = arith.addf %39, %40 : vector<2x32xf32>
    %42 = math.tanh %41 : vector<2x32xf32>
    %43 = arith.mulf %38, %42 : vector<2x32xf32>
    %44 = vector.shape_cast %6 : vector<2x1xf32> to vector<2x1xf32>
    %45 = vector.broadcast %44 : vector<2x1xf32> to vector<2x32xf32>
    %46 = arith.subf %41, %23 : vector<2x32xf32>
    %47 = arith.mulf %45, %46 : vector<2x32xf32>
    %48 = arith.addf %23, %47 : vector<2x32xf32>
    %49 = arith.subf %43, %22 : vector<2x32xf32>
    %50 = arith.mulf %45, %49 : vector<2x32xf32>
    %51 = arith.addf %22, %50 : vector<2x32xf32>
    %c0_17 = arith.constant 0 : index
    %c0_18 = arith.constant 0 : index
    %52 = vector.load %arg16[%c0_17, %c0_18] : memref<16x64xf32, #tpu.memory_space<vmem>>, vector<2x32xf32>
    tpu.vector_store %arg16[%c0_17, %c0_18], %51 {strides = array<i32>} : memref<16x64xf32, #tpu.memory_space<vmem>>, vector<2x32xf32>,
    %53 = vector.extract_strided_slice %19 {offsets = [14, 128], sizes = [2, 128], strides = [1, 1]} : vector<16x256xf32> to vector<2x128xf32>
    %cst_19 = arith.constant dense<0.000000e+00> : vector<2x128xf32>
    %54 = tpu.matmul %24, %21, %cst_19 {dimension_numbers = #tpu.dot_dimension_numbers<[1], [0], [0], [1], [0, 0, 1, 1], [], []>} : vector<2x32xf32>, vector<32x128xf32>, vector<2x128xf32> -> vector<2x128xf32>
    %55 = arith.addf %53, %54 : vector<2x128xf32>
    %56 = arith.negf %55 : vector<2x128xf32>
    %57 = math.exp %56 : vector<2x128xf32>
    %cst_20 = arith.constant 1.000000e+00 : f32
    %58 = vector.broadcast %cst_20 : f32 to vector<2x128xf32>
    %59 = arith.addf %58, %57 : vector<2x128xf32>
    %60 = arith.divf %58, %59 : vector<2x128xf32>
    %61 = math.tanh %55 : vector<2x128xf32>
    %62 = vector.extract_strided_slice %60 {offsets = [0, 0], sizes = [2, 32], strides = [1, 1]} : vector<2x128xf32> to vector<2x32xf32>
    %63 = vector.extract_strided_slice %60 {offsets = [0, 32], sizes = [2, 32], strides = [1, 1]} : vector<2x128xf32> to vector<2x32xf32>
    %64 = vector.extract_strided_slice %61 {offsets = [0, 64], sizes = [2, 32], strides = [1, 1]} : vector<2x128xf32> to vector<2x32xf32>
    %65 = vector.extract_strided_slice %60 {offsets = [0, 96], sizes = [2, 32], strides = [1, 1]} : vector<2x128xf32> to vector<2x32xf32>
    %66 = arith.mulf %63, %25 : vector<2x32xf32>
    %67 = arith.mulf %62, %64 : vector<2x32xf32>
    %68 = arith.addf %66, %67 : vector<2x32xf32>
    %69 = math.tanh %68 : vector<2x32xf32>
    %70 = arith.mulf %65, %69 : vector<2x32xf32>
    %71 = vector.shape_cast %13 : vector<2x1xf32> to vector<2x1xf32>
    %72 = vector.broadcast %71 : vector<2x1xf32> to vector<2x32xf32>
    %73 = arith.subf %68, %25 : vector<2x32xf32>
    %74 = arith.mulf %72, %73 : vector<2x32xf32>
    %75 = arith.addf %25, %74 : vector<2x32xf32>
    %76 = arith.subf %70, %24 : vector<2x32xf32>
    %77 = arith.mulf %72, %76 : vector<2x32xf32>
    %78 = arith.addf %24, %77 : vector<2x32xf32>
    %c14 = arith.constant 14 : index
    %c32 = arith.constant 32 : index
    %79 = vector.load %arg16[%c14, %c32] : memref<16x64xf32, #tpu.memory_space<vmem>>, vector<2x32xf32>
    tpu.vector_store %arg16[%c14, %c32], %78 {strides = array<i32>} : memref<16x64xf32, #tpu.memory_space<vmem>>, vector<2x32xf32>,
    %80 = vector.extract_strided_slice %19 {offsets = [2, 0], sizes = [2, 128], strides = [1, 1]} : vector<16x256xf32> to vector<2x128xf32>
    %cst_21 = arith.constant dense<0.000000e+00> : vector<2x128xf32>
    %81 = tpu.matmul %51, %20, %cst_21 {dimension_numbers = #tpu.dot_dimension_numbers<[1], [0], [0], [1], [0, 0, 1, 1], [], []>} : vector<2x32xf32>, vector<32x128xf32>, vector<2x128xf32> -> vector<2x128xf32>
    %82 = arith.addf %80, %81 : vector<2x128xf32>
    %83 = arith.negf %82 : vector<2x128xf32>
    %84 = math.exp %83 : vector<2x128xf32>
    %cst_22 = arith.constant 1.000000e+00 : f32
    %85 = vector.broadcast %cst_22 : f32 to vector<2x128xf32>
    %86 = arith.addf %85, %84 : vector<2x128xf32>
    %87 = arith.divf %85, %86 : vector<2x128xf32>
    %88 = math.tanh %82 : vector<2x128xf32>
    %89 = vector.extract_strided_slice %87 {offsets = [0, 0], sizes = [2, 32], strides = [1, 1]} : vector<2x128xf32> to vector<2x32xf32>
    %90 = vector.extract_strided_slice %87 {offsets = [0, 32], sizes = [2, 32], strides = [1, 1]} : vector<2x128xf32> to vector<2x32xf32>
    %91 = vector.extract_strided_slice %88 {offsets = [0, 64], sizes = [2, 32], strides = [1, 1]} : vector<2x128xf32> to vector<2x32xf32>
    %92 = vector.extract_strided_slice %87 {offsets = [0, 96], sizes = [2, 32], strides = [1, 1]} : vector<2x128xf32> to vector<2x32xf32>
    %93 = arith.mulf %90, %48 : vector<2x32xf32>
    %94 = arith.mulf %89, %91 : vector<2x32xf32>
    %95 = arith.addf %93, %94 : vector<2x32xf32>
    %96 = math.tanh %95 : vector<2x32xf32>
    %97 = arith.mulf %92, %96 : vector<2x32xf32>
    %98 = vector.shape_cast %7 : vector<2x1xf32> to vector<2x1xf32>
    %99 = vector.broadcast %98 : vector<2x1xf32> to vector<2x32xf32>
    %100 = arith.subf %95, %48 : vector<2x32xf32>
    %101 = arith.mulf %99, %100 : vector<2x32xf32>
    %102 = arith.addf %48, %101 : vector<2x32xf32>
    %103 = arith.subf %97, %51 : vector<2x32xf32>
    %104 = arith.mulf %99, %103 : vector<2x32xf32>
    %105 = arith.addf %51, %104 : vector<2x32xf32>
    %c2 = arith.constant 2 : index
    %c0_23 = arith.constant 0 : index
    %106 = vector.load %arg16[%c2, %c0_23] : memref<16x64xf32, #tpu.memory_space<vmem>>, vector<2x32xf32>
    tpu.vector_store %arg16[%c2, %c0_23], %105 {strides = array<i32>} : memref<16x64xf32, #tpu.memory_space<vmem>>, vector<2x32xf32>,
    %107 = vector.extract_strided_slice %19 {offsets = [12, 128], sizes = [2, 128], strides = [1, 1]} : vector<16x256xf32> to vector<2x128xf32>
    %cst_24 = arith.constant dense<0.000000e+00> : vector<2x128xf32>
    %108 = tpu.matmul %78, %21, %cst_24 {dimension_numbers = #tpu.dot_dimension_numbers<[1], [0], [0], [1], [0, 0, 1, 1], [], []>} : vector<2x32xf32>, vector<32x128xf32>, vector<2x128xf32> -> vector<2x128xf32>
    %109 = arith.addf %107, %108 : vector<2x128xf32>
    %110 = arith.negf %109 : vector<2x128xf32>
    %111 = math.exp %110 : vector<2x128xf32>
    %cst_25 = arith.constant 1.000000e+00 : f32
    %112 = vector.broadcast %cst_25 : f32 to vector<2x128xf32>
    %113 = arith.addf %112, %111 : vector<2x128xf32>
    %114 = arith.divf %112, %113 : vector<2x128xf32>
    %115 = math.tanh %109 : vector<2x128xf32>
    %116 = vector.extract_strided_slice %114 {offsets = [0, 0], sizes = [2, 32], strides = [1, 1]} : vector<2x128xf32> to vector<2x32xf32>
    %117 = vector.extract_strided_slice %114 {offsets = [0, 32], sizes = [2, 32], strides = [1, 1]} : vector<2x128xf32> to vector<2x32xf32>
    %118 = vector.extract_strided_slice %115 {offsets = [0, 64], sizes = [2, 32], strides = [1, 1]} : vector<2x128xf32> to vector<2x32xf32>
    %119 = vector.extract_strided_slice %114 {offsets = [0, 96], sizes = [2, 32], strides = [1, 1]} : vector<2x128xf32> to vector<2x32xf32>
    %120 = arith.mulf %117, %75 : vector<2x32xf32>
    %121 = arith.mulf %116, %118 : vector<2x32xf32>
    %122 = arith.addf %120, %121 : vector<2x32xf32>
    %123 = math.tanh %122 : vector<2x32xf32>
    %124 = arith.mulf %119, %123 : vector<2x32xf32>
    %125 = vector.shape_cast %12 : vector<2x1xf32> to vector<2x1xf32>
    %126 = vector.broadcast %125 : vector<2x1xf32> to vector<2x32xf32>
    %127 = arith.subf %122, %75 : vector<2x32xf32>
    %128 = arith.mulf %126, %127 : vector<2x32xf32>
    %129 = arith.addf %75, %128 : vector<2x32xf32>
    %130 = arith.subf %124, %78 : vector<2x32xf32>
    %131 = arith.mulf %126, %130 : vector<2x32xf32>
    %132 = arith.addf %78, %131 : vector<2x32xf32>
    %c12 = arith.constant 12 : index
    %c32_26 = arith.constant 32 : index
    %133 = vector.load %arg16[%c12, %c32_26] : memref<16x64xf32, #tpu.memory_space<vmem>>, vector<2x32xf32>
    tpu.vector_store %arg16[%c12, %c32_26], %132 {strides = array<i32>} : memref<16x64xf32, #tpu.memory_space<vmem>>, vector<2x32xf32>,
    %134 = vector.extract_strided_slice %19 {offsets = [4, 0], sizes = [2, 128], strides = [1, 1]} : vector<16x256xf32> to vector<2x128xf32>
    %cst_27 = arith.constant dense<0.000000e+00> : vector<2x128xf32>
    %135 = tpu.matmul %105, %20, %cst_27 {dimension_numbers = #tpu.dot_dimension_numbers<[1], [0], [0], [1], [0, 0, 1, 1], [], []>} : vector<2x32xf32>, vector<32x128xf32>, vector<2x128xf32> -> vector<2x128xf32>
    %136 = arith.addf %134, %135 : vector<2x128xf32>
    %137 = arith.negf %136 : vector<2x128xf32>
    %138 = math.exp %137 : vector<2x128xf32>
    %cst_28 = arith.constant 1.000000e+00 : f32
    %139 = vector.broadcast %cst_28 : f32 to vector<2x128xf32>
    %140 = arith.addf %139, %138 : vector<2x128xf32>
    %141 = arith.divf %139, %140 : vector<2x128xf32>
    %142 = math.tanh %136 : vector<2x128xf32>
    %143 = vector.extract_strided_slice %141 {offsets = [0, 0], sizes = [2, 32], strides = [1, 1]} : vector<2x128xf32> to vector<2x32xf32>
    %144 = vector.extract_strided_slice %141 {offsets = [0, 32], sizes = [2, 32], strides = [1, 1]} : vector<2x128xf32> to vector<2x32xf32>
    %145 = vector.extract_strided_slice %142 {offsets = [0, 64], sizes = [2, 32], strides = [1, 1]} : vector<2x128xf32> to vector<2x32xf32>
    %146 = vector.extract_strided_slice %141 {offsets = [0, 96], sizes = [2, 32], strides = [1, 1]} : vector<2x128xf32> to vector<2x32xf32>
    %147 = arith.mulf %144, %102 : vector<2x32xf32>
    %148 = arith.mulf %143, %145 : vector<2x32xf32>
    %149 = arith.addf %147, %148 : vector<2x32xf32>
    %150 = math.tanh %149 : vector<2x32xf32>
    %151 = arith.mulf %146, %150 : vector<2x32xf32>
    %152 = vector.shape_cast %8 : vector<2x1xf32> to vector<2x1xf32>
    %153 = vector.broadcast %152 : vector<2x1xf32> to vector<2x32xf32>
    %154 = arith.subf %149, %102 : vector<2x32xf32>
    %155 = arith.mulf %153, %154 : vector<2x32xf32>
    %156 = arith.addf %102, %155 : vector<2x32xf32>
    %157 = arith.subf %151, %105 : vector<2x32xf32>
    %158 = arith.mulf %153, %157 : vector<2x32xf32>
    %159 = arith.addf %105, %158 : vector<2x32xf32>
    %c4 = arith.constant 4 : index
    %c0_29 = arith.constant 0 : index
    %160 = vector.load %arg16[%c4, %c0_29] : memref<16x64xf32, #tpu.memory_space<vmem>>, vector<2x32xf32>
    tpu.vector_store %arg16[%c4, %c0_29], %159 {strides = array<i32>} : memref<16x64xf32, #tpu.memory_space<vmem>>, vector<2x32xf32>,
    %161 = vector.extract_strided_slice %19 {offsets = [10, 128], sizes = [2, 128], strides = [1, 1]} : vector<16x256xf32> to vector<2x128xf32>
    %cst_30 = arith.constant dense<0.000000e+00> : vector<2x128xf32>
    %162 = tpu.matmul %132, %21, %cst_30 {dimension_numbers = #tpu.dot_dimension_numbers<[1], [0], [0], [1], [0, 0, 1, 1], [], []>} : vector<2x32xf32>, vector<32x128xf32>, vector<2x128xf32> -> vector<2x128xf32>
    %163 = arith.addf %161, %162 : vector<2x128xf32>
    %164 = arith.negf %163 : vector<2x128xf32>
    %165 = math.exp %164 : vector<2x128xf32>
    %cst_31 = arith.constant 1.000000e+00 : f32
    %166 = vector.broadcast %cst_31 : f32 to vector<2x128xf32>
    %167 = arith.addf %166, %165 : vector<2x128xf32>
    %168 = arith.divf %166, %167 : vector<2x128xf32>
    %169 = math.tanh %163 : vector<2x128xf32>
    %170 = vector.extract_strided_slice %168 {offsets = [0, 0], sizes = [2, 32], strides = [1, 1]} : vector<2x128xf32> to vector<2x32xf32>
    %171 = vector.extract_strided_slice %168 {offsets = [0, 32], sizes = [2, 32], strides = [1, 1]} : vector<2x128xf32> to vector<2x32xf32>
    %172 = vector.extract_strided_slice %169 {offsets = [0, 64], sizes = [2, 32], strides = [1, 1]} : vector<2x128xf32> to vector<2x32xf32>
    %173 = vector.extract_strided_slice %168 {offsets = [0, 96], sizes = [2, 32], strides = [1, 1]} : vector<2x128xf32> to vector<2x32xf32>
    %174 = arith.mulf %171, %129 : vector<2x32xf32>
    %175 = arith.mulf %170, %172 : vector<2x32xf32>
    %176 = arith.addf %174, %175 : vector<2x32xf32>
    %177 = math.tanh %176 : vector<2x32xf32>
    %178 = arith.mulf %173, %177 : vector<2x32xf32>
    %179 = vector.shape_cast %11 : vector<2x1xf32> to vector<2x1xf32>
    %180 = vector.broadcast %179 : vector<2x1xf32> to vector<2x32xf32>
    %181 = arith.subf %176, %129 : vector<2x32xf32>
    %182 = arith.mulf %180, %181 : vector<2x32xf32>
    %183 = arith.addf %129, %182 : vector<2x32xf32>
    %184 = arith.subf %178, %132 : vector<2x32xf32>
    %185 = arith.mulf %180, %184 : vector<2x32xf32>
    %186 = arith.addf %132, %185 : vector<2x32xf32>
    %c10 = arith.constant 10 : index
    %c32_32 = arith.constant 32 : index
    %187 = vector.load %arg16[%c10, %c32_32] : memref<16x64xf32, #tpu.memory_space<vmem>>, vector<2x32xf32>
    tpu.vector_store %arg16[%c10, %c32_32], %186 {strides = array<i32>} : memref<16x64xf32, #tpu.memory_space<vmem>>, vector<2x32xf32>,
    %188 = vector.extract_strided_slice %19 {offsets = [6, 0], sizes = [2, 128], strides = [1, 1]} : vector<16x256xf32> to vector<2x128xf32>
    %cst_33 = arith.constant dense<0.000000e+00> : vector<2x128xf32>
    %189 = tpu.matmul %159, %20, %cst_33 {dimension_numbers = #tpu.dot_dimension_numbers<[1], [0], [0], [1], [0, 0, 1, 1], [], []>} : vector<2x32xf32>, vector<32x128xf32>, vector<2x128xf32> -> vector<2x128xf32>
    %190 = arith.addf %188, %189 : vector<2x128xf32>
    %191 = arith.negf %190 : vector<2x128xf32>
    %192 = math.exp %191 : vector<2x128xf32>
    %cst_34 = arith.constant 1.000000e+00 : f32
    %193 = vector.broadcast %cst_34 : f32 to vector<2x128xf32>
    %194 = arith.addf %193, %192 : vector<2x128xf32>
    %195 = arith.divf %193, %194 : vector<2x128xf32>
    %196 = math.tanh %190 : vector<2x128xf32>
    %197 = vector.extract_strided_slice %195 {offsets = [0, 0], sizes = [2, 32], strides = [1, 1]} : vector<2x128xf32> to vector<2x32xf32>
    %198 = vector.extract_strided_slice %195 {offsets = [0, 32], sizes = [2, 32], strides = [1, 1]} : vector<2x128xf32> to vector<2x32xf32>
    %199 = vector.extract_strided_slice %196 {offsets = [0, 64], sizes = [2, 32], strides = [1, 1]} : vector<2x128xf32> to vector<2x32xf32>
    %200 = vector.extract_strided_slice %195 {offsets = [0, 96], sizes = [2, 32], strides = [1, 1]} : vector<2x128xf32> to vector<2x32xf32>
    %201 = arith.mulf %198, %156 : vector<2x32xf32>
    %202 = arith.mulf %197, %199 : vector<2x32xf32>
    %203 = arith.addf %201, %202 : vector<2x32xf32>
    %204 = math.tanh %203 : vector<2x32xf32>
    %205 = arith.mulf %200, %204 : vector<2x32xf32>
    %206 = vector.shape_cast %9 : vector<2x1xf32> to vector<2x1xf32>
    %207 = vector.broadcast %206 : vector<2x1xf32> to vector<2x32xf32>
    %208 = arith.subf %203, %156 : vector<2x32xf32>
    %209 = arith.mulf %207, %208 : vector<2x32xf32>
    %210 = arith.addf %156, %209 : vector<2x32xf32>
    %211 = arith.subf %205, %159 : vector<2x32xf32>
    %212 = arith.mulf %207, %211 : vector<2x32xf32>
    %213 = arith.addf %159, %212 : vector<2x32xf32>
    %c6 = arith.constant 6 : index
    %c0_35 = arith.constant 0 : index
    %214 = vector.load %arg16[%c6, %c0_35] : memref<16x64xf32, #tpu.memory_space<vmem>>, vector<2x32xf32>
    tpu.vector_store %arg16[%c6, %c0_35], %213 {strides = array<i32>} : memref<16x64xf32, #tpu.memory_space<vmem>>, vector<2x32xf32>,
    %215 = vector.extract_strided_slice %19 {offsets = [8, 128], sizes = [2, 128], strides = [1, 1]} : vector<16x256xf32> to vector<2x128xf32>
    %cst_36 = arith.constant dense<0.000000e+00> : vector<2x128xf32>
    %216 = tpu.matmul %186, %21, %cst_36 {dimension_numbers = #tpu.dot_dimension_numbers<[1], [0], [0], [1], [0, 0, 1, 1], [], []>} : vector<2x32xf32>, vector<32x128xf32>, vector<2x128xf32> -> vector<2x128xf32>
    %217 = arith.addf %215, %216 : vector<2x128xf32>
    %218 = arith.negf %217 : vector<2x128xf32>
    %219 = math.exp %218 : vector<2x128xf32>
    %cst_37 = arith.constant 1.000000e+00 : f32
    %220 = vector.broadcast %cst_37 : f32 to vector<2x128xf32>
    %221 = arith.addf %220, %219 : vector<2x128xf32>
    %222 = arith.divf %220, %221 : vector<2x128xf32>
    %223 = math.tanh %217 : vector<2x128xf32>
    %224 = vector.extract_strided_slice %222 {offsets = [0, 0], sizes = [2, 32], strides = [1, 1]} : vector<2x128xf32> to vector<2x32xf32>
    %225 = vector.extract_strided_slice %222 {offsets = [0, 32], sizes = [2, 32], strides = [1, 1]} : vector<2x128xf32> to vector<2x32xf32>
    %226 = vector.extract_strided_slice %223 {offsets = [0, 64], sizes = [2, 32], strides = [1, 1]} : vector<2x128xf32> to vector<2x32xf32>
    %227 = vector.extract_strided_slice %222 {offsets = [0, 96], sizes = [2, 32], strides = [1, 1]} : vector<2x128xf32> to vector<2x32xf32>
    %228 = arith.mulf %225, %183 : vector<2x32xf32>
    %229 = arith.mulf %224, %226 : vector<2x32xf32>
    %230 = arith.addf %228, %229 : vector<2x32xf32>
    %231 = math.tanh %230 : vector<2x32xf32>
    %232 = arith.mulf %227, %231 : vector<2x32xf32>
    %233 = vector.shape_cast %10 : vector<2x1xf32> to vector<2x1xf32>
    %234 = vector.broadcast %233 : vector<2x1xf32> to vector<2x32xf32>
    %235 = arith.subf %230, %183 : vector<2x32xf32>
    %236 = arith.mulf %234, %235 : vector<2x32xf32>
    %237 = arith.addf %183, %236 : vector<2x32xf32>
    %238 = arith.subf %232, %186 : vector<2x32xf32>
    %239 = arith.mulf %234, %238 : vector<2x32xf32>
    %240 = arith.addf %186, %239 : vector<2x32xf32>
    %c8 = arith.constant 8 : index
    %c32_38 = arith.constant 32 : index
    %241 = vector.load %arg16[%c8, %c32_38] : memref<16x64xf32, #tpu.memory_space<vmem>>, vector<2x32xf32>
    tpu.vector_store %arg16[%c8, %c32_38], %240 {strides = array<i32>} : memref<16x64xf32, #tpu.memory_space<vmem>>, vector<2x32xf32>,
    %242 = vector.extract_strided_slice %19 {offsets = [8, 0], sizes = [2, 128], strides = [1, 1]} : vector<16x256xf32> to vector<2x128xf32>
    %cst_39 = arith.constant dense<0.000000e+00> : vector<2x128xf32>
    %243 = tpu.matmul %213, %20, %cst_39 {dimension_numbers = #tpu.dot_dimension_numbers<[1], [0], [0], [1], [0, 0, 1, 1], [], []>} : vector<2x32xf32>, vector<32x128xf32>, vector<2x128xf32> -> vector<2x128xf32>
    %244 = arith.addf %242, %243 : vector<2x128xf32>
    %245 = arith.negf %244 : vector<2x128xf32>
    %246 = math.exp %245 : vector<2x128xf32>
    %cst_40 = arith.constant 1.000000e+00 : f32
    %247 = vector.broadcast %cst_40 : f32 to vector<2x128xf32>
    %248 = arith.addf %247, %246 : vector<2x128xf32>
    %249 = arith.divf %247, %248 : vector<2x128xf32>
    %250 = math.tanh %244 : vector<2x128xf32>
    %251 = vector.extract_strided_slice %249 {offsets = [0, 0], sizes = [2, 32], strides = [1, 1]} : vector<2x128xf32> to vector<2x32xf32>
    %252 = vector.extract_strided_slice %249 {offsets = [0, 32], sizes = [2, 32], strides = [1, 1]} : vector<2x128xf32> to vector<2x32xf32>
    %253 = vector.extract_strided_slice %250 {offsets = [0, 64], sizes = [2, 32], strides = [1, 1]} : vector<2x128xf32> to vector<2x32xf32>
    %254 = vector.extract_strided_slice %249 {offsets = [0, 96], sizes = [2, 32], strides = [1, 1]} : vector<2x128xf32> to vector<2x32xf32>
    %255 = arith.mulf %252, %210 : vector<2x32xf32>
    %256 = arith.mulf %251, %253 : vector<2x32xf32>
    %257 = arith.addf %255, %256 : vector<2x32xf32>
    %258 = math.tanh %257 : vector<2x32xf32>
    %259 = arith.mulf %254, %258 : vector<2x32xf32>
    %260 = vector.shape_cast %10 : vector<2x1xf32> to vector<2x1xf32>
    %261 = vector.broadcast %260 : vector<2x1xf32> to vector<2x32xf32>
    %262 = arith.subf %257, %210 : vector<2x32xf32>
    %263 = arith.mulf %261, %262 : vector<2x32xf32>
    %264 = arith.addf %210, %263 : vector<2x32xf32>
    %265 = arith.subf %259, %213 : vector<2x32xf32>
    %266 = arith.mulf %261, %265 : vector<2x32xf32>
    %267 = arith.addf %213, %266 : vector<2x32xf32>
    %c8_41 = arith.constant 8 : index
    %c0_42 = arith.constant 0 : index
    %268 = vector.load %arg16[%c8_41, %c0_42] : memref<16x64xf32, #tpu.memory_space<vmem>>, vector<2x32xf32>
    tpu.vector_store %arg16[%c8_41, %c0_42], %267 {strides = array<i32>} : memref<16x64xf32, #tpu.memory_space<vmem>>, vector<2x32xf32>,
    %269 = vector.extract_strided_slice %19 {offsets = [6, 128], sizes = [2, 128], strides = [1, 1]} : vector<16x256xf32> to vector<2x128xf32>
    %cst_43 = arith.constant dense<0.000000e+00> : vector<2x128xf32>
    %270 = tpu.matmul %240, %21, %cst_43 {dimension_numbers = #tpu.dot_dimension_numbers<[1], [0], [0], [1], [0, 0, 1, 1], [], []>} : vector<2x32xf32>, vector<32x128xf32>, vector<2x128xf32> -> vector<2x128xf32>
    %271 = arith.addf %269, %270 : vector<2x128xf32>
    %272 = arith.negf %271 : vector<2x128xf32>
    %273 = math.exp %272 : vector<2x128xf32>
    %cst_44 = arith.constant 1.000000e+00 : f32
    %274 = vector.broadcast %cst_44 : f32 to vector<2x128xf32>
    %275 = arith.addf %274, %273 : vector<2x128xf32>
    %276 = arith.divf %274, %275 : vector<2x128xf32>
    %277 = math.tanh %271 : vector<2x128xf32>
    %278 = vector.extract_strided_slice %276 {offsets = [0, 0], sizes = [2, 32], strides = [1, 1]} : vector<2x128xf32> to vector<2x32xf32>
    %279 = vector.extract_strided_slice %276 {offsets = [0, 32], sizes = [2, 32], strides = [1, 1]} : vector<2x128xf32> to vector<2x32xf32>
    %280 = vector.extract_strided_slice %277 {offsets = [0, 64], sizes = [2, 32], strides = [1, 1]} : vector<2x128xf32> to vector<2x32xf32>
    %281 = vector.extract_strided_slice %276 {offsets = [0, 96], sizes = [2, 32], strides = [1, 1]} : vector<2x128xf32> to vector<2x32xf32>
    %282 = arith.mulf %279, %237 : vector<2x32xf32>
    %283 = arith.mulf %278, %280 : vector<2x32xf32>
    %284 = arith.addf %282, %283 : vector<2x32xf32>
    %285 = math.tanh %284 : vector<2x32xf32>
    %286 = arith.mulf %281, %285 : vector<2x32xf32>
    %287 = vector.shape_cast %9 : vector<2x1xf32> to vector<2x1xf32>
    %288 = vector.broadcast %287 : vector<2x1xf32> to vector<2x32xf32>
    %289 = arith.subf %284, %237 : vector<2x32xf32>
    %290 = arith.mulf %288, %289 : vector<2x32xf32>
    %291 = arith.addf %237, %290 : vector<2x32xf32>
    %292 = arith.subf %286, %240 : vector<2x32xf32>
    %293 = arith.mulf %288, %292 : vector<2x32xf32>
    %294 = arith.addf %240, %293 : vector<2x32xf32>
    %c6_45 = arith.constant 6 : index
    %c32_46 = arith.constant 32 : index
    %295 = vector.load %arg16[%c6_45, %c32_46] : memref<16x64xf32, #tpu.memory_space<vmem>>, vector<2x32xf32>
    tpu.vector_store %arg16[%c6_45, %c32_46], %294 {strides = array<i32>} : memref<16x64xf32, #tpu.memory_space<vmem>>, vector<2x32xf32>,
    %296 = vector.extract_strided_slice %19 {offsets = [10, 0], sizes = [2, 128], strides = [1, 1]} : vector<16x256xf32> to vector<2x128xf32>
    %cst_47 = arith.constant dense<0.000000e+00> : vector<2x128xf32>
    %297 = tpu.matmul %267, %20, %cst_47 {dimension_numbers = #tpu.dot_dimension_numbers<[1], [0], [0], [1], [0, 0, 1, 1], [], []>} : vector<2x32xf32>, vector<32x128xf32>, vector<2x128xf32> -> vector<2x128xf32>
    %298 = arith.addf %296, %297 : vector<2x128xf32>
    %299 = arith.negf %298 : vector<2x128xf32>
    %300 = math.exp %299 : vector<2x128xf32>
    %cst_48 = arith.constant 1.000000e+00 : f32
    %301 = vector.broadcast %cst_48 : f32 to vector<2x128xf32>
    %302 = arith.addf %301, %300 : vector<2x128xf32>
    %303 = arith.divf %301, %302 : vector<2x128xf32>
    %304 = math.tanh %298 : vector<2x128xf32>
    %305 = vector.extract_strided_slice %303 {offsets = [0, 0], sizes = [2, 32], strides = [1, 1]} : vector<2x128xf32> to vector<2x32xf32>
    %306 = vector.extract_strided_slice %303 {offsets = [0, 32], sizes = [2, 32], strides = [1, 1]} : vector<2x128xf32> to vector<2x32xf32>
    %307 = vector.extract_strided_slice %304 {offsets = [0, 64], sizes = [2, 32], strides = [1, 1]} : vector<2x128xf32> to vector<2x32xf32>
    %308 = vector.extract_strided_slice %303 {offsets = [0, 96], sizes = [2, 32], strides = [1, 1]} : vector<2x128xf32> to vector<2x32xf32>
    %309 = arith.mulf %306, %264 : vector<2x32xf32>
    %310 = arith.mulf %305, %307 : vector<2x32xf32>
    %311 = arith.addf %309, %310 : vector<2x32xf32>
    %312 = math.tanh %311 : vector<2x32xf32>
    %313 = arith.mulf %308, %312 : vector<2x32xf32>
    %314 = vector.shape_cast %11 : vector<2x1xf32> to vector<2x1xf32>
    %315 = vector.broadcast %314 : vector<2x1xf32> to vector<2x32xf32>
    %316 = arith.subf %311, %264 : vector<2x32xf32>
    %317 = arith.mulf %315, %316 : vector<2x32xf32>
    %318 = arith.addf %264, %317 : vector<2x32xf32>
    %319 = arith.subf %313, %267 : vector<2x32xf32>
    %320 = arith.mulf %315, %319 : vector<2x32xf32>
    %321 = arith.addf %267, %320 : vector<2x32xf32>
    %c10_49 = arith.constant 10 : index
    %c0_50 = arith.constant 0 : index
    %322 = vector.load %arg16[%c10_49, %c0_50] : memref<16x64xf32, #tpu.memory_space<vmem>>, vector<2x32xf32>
    tpu.vector_store %arg16[%c10_49, %c0_50], %321 {strides = array<i32>} : memref<16x64xf32, #tpu.memory_space<vmem>>, vector<2x32xf32>,
    %323 = vector.extract_strided_slice %19 {offsets = [4, 128], sizes = [2, 128], strides = [1, 1]} : vector<16x256xf32> to vector<2x128xf32>
    %cst_51 = arith.constant dense<0.000000e+00> : vector<2x128xf32>
    %324 = tpu.matmul %294, %21, %cst_51 {dimension_numbers = #tpu.dot_dimension_numbers<[1], [0], [0], [1], [0, 0, 1, 1], [], []>} : vector<2x32xf32>, vector<32x128xf32>, vector<2x128xf32> -> vector<2x128xf32>
    %325 = arith.addf %323, %324 : vector<2x128xf32>
    %326 = arith.negf %325 : vector<2x128xf32>
    %327 = math.exp %326 : vector<2x128xf32>
    %cst_52 = arith.constant 1.000000e+00 : f32
    %328 = vector.broadcast %cst_52 : f32 to vector<2x128xf32>
    %329 = arith.addf %328, %327 : vector<2x128xf32>
    %330 = arith.divf %328, %329 : vector<2x128xf32>
    %331 = math.tanh %325 : vector<2x128xf32>
    %332 = vector.extract_strided_slice %330 {offsets = [0, 0], sizes = [2, 32], strides = [1, 1]} : vector<2x128xf32> to vector<2x32xf32>
    %333 = vector.extract_strided_slice %330 {offsets = [0, 32], sizes = [2, 32], strides = [1, 1]} : vector<2x128xf32> to vector<2x32xf32>
    %334 = vector.extract_strided_slice %331 {offsets = [0, 64], sizes = [2, 32], strides = [1, 1]} : vector<2x128xf32> to vector<2x32xf32>
    %335 = vector.extract_strided_slice %330 {offsets = [0, 96], sizes = [2, 32], strides = [1, 1]} : vector<2x128xf32> to vector<2x32xf32>
    %336 = arith.mulf %333, %291 : vector<2x32xf32>
    %337 = arith.mulf %332, %334 : vector<2x32xf32>
    %338 = arith.addf %336, %337 : vector<2x32xf32>
    %339 = math.tanh %338 : vector<2x32xf32>
    %340 = arith.mulf %335, %339 : vector<2x32xf32>
    %341 = vector.shape_cast %8 : vector<2x1xf32> to vector<2x1xf32>
    %342 = vector.broadcast %341 : vector<2x1xf32> to vector<2x32xf32>
    %343 = arith.subf %338, %291 : vector<2x32xf32>
    %344 = arith.mulf %342, %343 : vector<2x32xf32>
    %345 = arith.addf %291, %344 : vector<2x32xf32>
    %346 = arith.subf %340, %294 : vector<2x32xf32>
    %347 = arith.mulf %342, %346 : vector<2x32xf32>
    %348 = arith.addf %294, %347 : vector<2x32xf32>
    %c4_53 = arith.constant 4 : index
    %c32_54 = arith.constant 32 : index
    %349 = vector.load %arg16[%c4_53, %c32_54] : memref<16x64xf32, #tpu.memory_space<vmem>>, vector<2x32xf32>
    tpu.vector_store %arg16[%c4_53, %c32_54], %348 {strides = array<i32>} : memref<16x64xf32, #tpu.memory_space<vmem>>, vector<2x32xf32>,
    %350 = vector.extract_strided_slice %19 {offsets = [12, 0], sizes = [2, 128], strides = [1, 1]} : vector<16x256xf32> to vector<2x128xf32>
    %cst_55 = arith.constant dense<0.000000e+00> : vector<2x128xf32>
    %351 = tpu.matmul %321, %20, %cst_55 {dimension_numbers = #tpu.dot_dimension_numbers<[1], [0], [0], [1], [0, 0, 1, 1], [], []>} : vector<2x32xf32>, vector<32x128xf32>, vector<2x128xf32> -> vector<2x128xf32>
    %352 = arith.addf %350, %351 : vector<2x128xf32>
    %353 = arith.negf %352 : vector<2x128xf32>
    %354 = math.exp %353 : vector<2x128xf32>
    %cst_56 = arith.constant 1.000000e+00 : f32
    %355 = vector.broadcast %cst_56 : f32 to vector<2x128xf32>
    %356 = arith.addf %355, %354 : vector<2x128xf32>
    %357 = arith.divf %355, %356 : vector<2x128xf32>
    %358 = math.tanh %352 : vector<2x128xf32>
    %359 = vector.extract_strided_slice %357 {offsets = [0, 0], sizes = [2, 32], strides = [1, 1]} : vector<2x128xf32> to vector<2x32xf32>
    %360 = vector.extract_strided_slice %357 {offsets = [0, 32], sizes = [2, 32], strides = [1, 1]} : vector<2x128xf32> to vector<2x32xf32>
    %361 = vector.extract_strided_slice %358 {offsets = [0, 64], sizes = [2, 32], strides = [1, 1]} : vector<2x128xf32> to vector<2x32xf32>
    %362 = vector.extract_strided_slice %357 {offsets = [0, 96], sizes = [2, 32], strides = [1, 1]} : vector<2x128xf32> to vector<2x32xf32>
    %363 = arith.mulf %360, %318 : vector<2x32xf32>
    %364 = arith.mulf %359, %361 : vector<2x32xf32>
    %365 = arith.addf %363, %364 : vector<2x32xf32>
    %366 = math.tanh %365 : vector<2x32xf32>
    %367 = arith.mulf %362, %366 : vector<2x32xf32>
    %368 = vector.shape_cast %12 : vector<2x1xf32> to vector<2x1xf32>
    %369 = vector.broadcast %368 : vector<2x1xf32> to vector<2x32xf32>
    %370 = arith.subf %365, %318 : vector<2x32xf32>
    %371 = arith.mulf %369, %370 : vector<2x32xf32>
    %372 = arith.addf %318, %371 : vector<2x32xf32>
    %373 = arith.subf %367, %321 : vector<2x32xf32>
    %374 = arith.mulf %369, %373 : vector<2x32xf32>
    %375 = arith.addf %321, %374 : vector<2x32xf32>
    %c12_57 = arith.constant 12 : index
    %c0_58 = arith.constant 0 : index
    %376 = vector.load %arg16[%c12_57, %c0_58] : memref<16x64xf32, #tpu.memory_space<vmem>>, vector<2x32xf32>
    tpu.vector_store %arg16[%c12_57, %c0_58], %375 {strides = array<i32>} : memref<16x64xf32, #tpu.memory_space<vmem>>, vector<2x32xf32>,
    %377 = vector.extract_strided_slice %19 {offsets = [2, 128], sizes = [2, 128], strides = [1, 1]} : vector<16x256xf32> to vector<2x128xf32>
    %cst_59 = arith.constant dense<0.000000e+00> : vector<2x128xf32>
    %378 = tpu.matmul %348, %21, %cst_59 {dimension_numbers = #tpu.dot_dimension_numbers<[1], [0], [0], [1], [0, 0, 1, 1], [], []>} : vector<2x32xf32>, vector<32x128xf32>, vector<2x128xf32> -> vector<2x128xf32>
    %379 = arith.addf %377, %378 : vector<2x128xf32>
    %380 = arith.negf %379 : vector<2x128xf32>
    %381 = math.exp %380 : vector<2x128xf32>
    %cst_60 = arith.constant 1.000000e+00 : f32
    %382 = vector.broadcast %cst_60 : f32 to vector<2x128xf32>
    %383 = arith.addf %382, %381 : vector<2x128xf32>
    %384 = arith.divf %382, %383 : vector<2x128xf32>
    %385 = math.tanh %379 : vector<2x128xf32>
    %386 = vector.extract_strided_slice %384 {offsets = [0, 0], sizes = [2, 32], strides = [1, 1]} : vector<2x128xf32> to vector<2x32xf32>
    %387 = vector.extract_strided_slice %384 {offsets = [0, 32], sizes = [2, 32], strides = [1, 1]} : vector<2x128xf32> to vector<2x32xf32>
    %388 = vector.extract_strided_slice %385 {offsets = [0, 64], sizes = [2, 32], strides = [1, 1]} : vector<2x128xf32> to vector<2x32xf32>
    %389 = vector.extract_strided_slice %384 {offsets = [0, 96], sizes = [2, 32], strides = [1, 1]} : vector<2x128xf32> to vector<2x32xf32>
    %390 = arith.mulf %387, %345 : vector<2x32xf32>
    %391 = arith.mulf %386, %388 : vector<2x32xf32>
    %392 = arith.addf %390, %391 : vector<2x32xf32>
    %393 = math.tanh %392 : vector<2x32xf32>
    %394 = arith.mulf %389, %393 : vector<2x32xf32>
    %395 = vector.shape_cast %7 : vector<2x1xf32> to vector<2x1xf32>
    %396 = vector.broadcast %395 : vector<2x1xf32> to vector<2x32xf32>
    %397 = arith.subf %392, %345 : vector<2x32xf32>
    %398 = arith.mulf %396, %397 : vector<2x32xf32>
    %399 = arith.addf %345, %398 : vector<2x32xf32>
    %400 = arith.subf %394, %348 : vector<2x32xf32>
    %401 = arith.mulf %396, %400 : vector<2x32xf32>
    %402 = arith.addf %348, %401 : vector<2x32xf32>
    %c2_61 = arith.constant 2 : index
    %c32_62 = arith.constant 32 : index
    %403 = vector.load %arg16[%c2_61, %c32_62] : memref<16x64xf32, #tpu.memory_space<vmem>>, vector<2x32xf32>
    tpu.vector_store %arg16[%c2_61, %c32_62], %402 {strides = array<i32>} : memref<16x64xf32, #tpu.memory_space<vmem>>, vector<2x32xf32>,
    %404 = vector.extract_strided_slice %19 {offsets = [14, 0], sizes = [2, 128], strides = [1, 1]} : vector<16x256xf32> to vector<2x128xf32>
    %cst_63 = arith.constant dense<0.000000e+00> : vector<2x128xf32>
    %405 = tpu.matmul %375, %20, %cst_63 {dimension_numbers = #tpu.dot_dimension_numbers<[1], [0], [0], [1], [0, 0, 1, 1], [], []>} : vector<2x32xf32>, vector<32x128xf32>, vector<2x128xf32> -> vector<2x128xf32>
    %406 = arith.addf %404, %405 : vector<2x128xf32>
    %407 = arith.negf %406 : vector<2x128xf32>
    %408 = math.exp %407 : vector<2x128xf32>
    %cst_64 = arith.constant 1.000000e+00 : f32
    %409 = vector.broadcast %cst_64 : f32 to vector<2x128xf32>
    %410 = arith.addf %409, %408 : vector<2x128xf32>
    %411 = arith.divf %409, %410 : vector<2x128xf32>
    %412 = math.tanh %406 : vector<2x128xf32>
    %413 = vector.extract_strided_slice %411 {offsets = [0, 0], sizes = [2, 32], strides = [1, 1]} : vector<2x128xf32> to vector<2x32xf32>
    %414 = vector.extract_strided_slice %411 {offsets = [0, 32], sizes = [2, 32], strides = [1, 1]} : vector<2x128xf32> to vector<2x32xf32>
    %415 = vector.extract_strided_slice %412 {offsets = [0, 64], sizes = [2, 32], strides = [1, 1]} : vector<2x128xf32> to vector<2x32xf32>
    %416 = vector.extract_strided_slice %411 {offsets = [0, 96], sizes = [2, 32], strides = [1, 1]} : vector<2x128xf32> to vector<2x32xf32>
    %417 = arith.mulf %414, %372 : vector<2x32xf32>
    %418 = arith.mulf %413, %415 : vector<2x32xf32>
    %419 = arith.addf %417, %418 : vector<2x32xf32>
    %420 = math.tanh %419 : vector<2x32xf32>
    %421 = arith.mulf %416, %420 : vector<2x32xf32>
    %422 = vector.shape_cast %13 : vector<2x1xf32> to vector<2x1xf32>
    %423 = vector.broadcast %422 : vector<2x1xf32> to vector<2x32xf32>
    %424 = arith.subf %421, %375 : vector<2x32xf32>
    %425 = arith.mulf %423, %424 : vector<2x32xf32>
    %426 = arith.addf %375, %425 : vector<2x32xf32>
    %c14_65 = arith.constant 14 : index
    %c0_66 = arith.constant 0 : index
    %427 = vector.load %arg16[%c14_65, %c0_66] : memref<16x64xf32, #tpu.memory_space<vmem>>, vector<2x32xf32>
    tpu.vector_store %arg16[%c14_65, %c0_66], %426 {strides = array<i32>} : memref<16x64xf32, #tpu.memory_space<vmem>>, vector<2x32xf32>,
    %428 = vector.extract_strided_slice %19 {offsets = [0, 128], sizes = [2, 128], strides = [1, 1]} : vector<16x256xf32> to vector<2x128xf32>
    %cst_67 = arith.constant dense<0.000000e+00> : vector<2x128xf32>
    %429 = tpu.matmul %402, %21, %cst_67 {dimension_numbers = #tpu.dot_dimension_numbers<[1], [0], [0], [1], [0, 0, 1, 1], [], []>} : vector<2x32xf32>, vector<32x128xf32>, vector<2x128xf32> -> vector<2x128xf32>
    %430 = arith.addf %428, %429 : vector<2x128xf32>
    %431 = arith.negf %430 : vector<2x128xf32>
    %432 = math.exp %431 : vector<2x128xf32>
    %cst_68 = arith.constant 1.000000e+00 : f32
    %433 = vector.broadcast %cst_68 : f32 to vector<2x128xf32>
    %434 = arith.addf %433, %432 : vector<2x128xf32>
    %435 = arith.divf %433, %434 : vector<2x128xf32>
    %436 = math.tanh %430 : vector<2x128xf32>
    %437 = vector.extract_strided_slice %435 {offsets = [0, 0], sizes = [2, 32], strides = [1, 1]} : vector<2x128xf32> to vector<2x32xf32>
    %438 = vector.extract_strided_slice %435 {offsets = [0, 32], sizes = [2, 32], strides = [1, 1]} : vector<2x128xf32> to vector<2x32xf32>
    %439 = vector.extract_strided_slice %436 {offsets = [0, 64], sizes = [2, 32], strides = [1, 1]} : vector<2x128xf32> to vector<2x32xf32>
    %440 = vector.extract_strided_slice %435 {offsets = [0, 96], sizes = [2, 32], strides = [1, 1]} : vector<2x128xf32> to vector<2x32xf32>
    %441 = arith.mulf %438, %399 : vector<2x32xf32>
    %442 = arith.mulf %437, %439 : vector<2x32xf32>
    %443 = arith.addf %441, %442 : vector<2x32xf32>
    %444 = math.tanh %443 : vector<2x32xf32>
    %445 = arith.mulf %440, %444 : vector<2x32xf32>
    %446 = vector.shape_cast %6 : vector<2x1xf32> to vector<2x1xf32>
    %447 = vector.broadcast %446 : vector<2x1xf32> to vector<2x32xf32>
    %448 = arith.subf %445, %402 : vector<2x32xf32>
    %449 = arith.mulf %447, %448 : vector<2x32xf32>
    %450 = arith.addf %402, %449 : vector<2x32xf32>
    %c0_69 = arith.constant 0 : index
    %c32_70 = arith.constant 32 : index
    %451 = vector.load %arg16[%c0_69, %c32_70] : memref<16x64xf32, #tpu.memory_space<vmem>>, vector<2x32xf32>
    tpu.vector_store %arg16[%c0_69, %c32_70], %450 {strides = array<i32>} : memref<16x64xf32, #tpu.memory_space<vmem>>, vector<2x32xf32>,
    %c0_71 = arith.constant 0 : index
    %c0_72 = arith.constant 0 : index
    %452 = vector.load %arg16[%c0_71, %c0_72] : memref<16x64xf32, #tpu.memory_space<vmem>>, vector<16x64xf32>
    %c0_73 = arith.constant 0 : index
    %c0_74 = arith.constant 0 : index
    %453 = vector.load %arg7[%c0_73, %c0_74] : memref<64x256xf32, #tpu.memory_space<vmem>>, vector<64x256xf32>
    %cst_75 = arith.constant dense<0.000000e+00> : vector<16x256xf32>
    %454 = tpu.matmul %452, %453, %cst_75 {dimension_numbers = #tpu.dot_dimension_numbers<[1], [0], [0], [1], [0, 0, 1, 1], [], []>} : vector<16x64xf32>, vector<64x256xf32>, vector<16x256xf32> -> vector<16x256xf32>
    %c0_76 = arith.constant 0 : index
    %c0_77 = arith.constant 0 : index
    %455 = vector.load %arg10[%c0_76, %c0_77] : memref<1x256xf32, #tpu.memory_space<vmem>>, vector<1x256xf32>
    %456 = vector.broadcast %455 : vector<1x256xf32> to vector<16x256xf32>
    %457 = arith.addf %454, %456 : vector<16x256xf32>
    %c0_78 = arith.constant 0 : index
    %c0_79 = arith.constant 0 : index
    %458 = vector.load %arg8[%c0_78, %c0_79] : memref<32x128xf32, #tpu.memory_space<vmem>>, vector<32x128xf32>
    %c0_80 = arith.constant 0 : index
    %c0_81 = arith.constant 0 : index
    %459 = vector.load %arg9[%c0_80, %c0_81] : memref<32x128xf32, #tpu.memory_space<vmem>>, vector<32x128xf32>
    %c0_82 = arith.constant 0 : index
    %c0_83 = arith.constant 0 : index
    %460 = vector.load %arg2[%c0_82, %c0_83] : memref<1x8xf32, #tpu.memory_space<vmem>>, vector<1x8xf32>
    %cst_84 = arith.constant dense<0xFF800000> : vector<1xf32>
    %461 = vector.multi_reduction <maximumf>, %460, %cst_84 [1] : vector<1x8xf32> to vector<1xf32>
    %cst_85 = arith.constant 0xFF800000 : f32
    %462 = vector.broadcast %cst_85 : f32 to vector<1xf32>
    %463 = arith.maximumf %462, %461 : vector<1xf32>
    %464 = vector.shape_cast %463 : vector<1xf32> to vector<1x1xf32>
    %465 = vector.broadcast %464 : vector<1x1xf32> to vector<1x8xf32>
    %466 = arith.subf %460, %465 : vector<1x8xf32>
    %467 = math.exp %466 : vector<1x8xf32>
    %cst_86 = arith.constant dense<0.000000e+00> : vector<1xf32>
    %468 = vector.multi_reduction <add>, %467, %cst_86 [1] : vector<1x8xf32> to vector<1xf32>
    %469 = vector.shape_cast %468 : vector<1xf32> to vector<1x1xf32>
    %470 = vector.broadcast %469 : vector<1x1xf32> to vector<1x8xf32>
    %471 = arith.divf %467, %470 : vector<1x8xf32>
    %472 = vector.broadcast %471 : vector<1x8xf32> to vector<2x8xf32>
    %473 = arith.mulf %472, %5 : vector<2x8xf32>
    %474 = vector.extract_strided_slice %473 {offsets = [0, 0], sizes = [2, 1], strides = [1, 1]} : vector<2x8xf32> to vector<2x1xf32>
    %475 = vector.extract_strided_slice %473 {offsets = [0, 1], sizes = [2, 1], strides = [1, 1]} : vector<2x8xf32> to vector<2x1xf32>
    %476 = vector.extract_strided_slice %473 {offsets = [0, 2], sizes = [2, 1], strides = [1, 1]} : vector<2x8xf32> to vector<2x1xf32>
    %477 = vector.extract_strided_slice %473 {offsets = [0, 3], sizes = [2, 1], strides = [1, 1]} : vector<2x8xf32> to vector<2x1xf32>
    %478 = vector.extract_strided_slice %473 {offsets = [0, 4], sizes = [2, 1], strides = [1, 1]} : vector<2x8xf32> to vector<2x1xf32>
    %479 = vector.extract_strided_slice %473 {offsets = [0, 5], sizes = [2, 1], strides = [1, 1]} : vector<2x8xf32> to vector<2x1xf32>
    %480 = vector.extract_strided_slice %473 {offsets = [0, 6], sizes = [2, 1], strides = [1, 1]} : vector<2x8xf32> to vector<2x1xf32>
    %481 = vector.extract_strided_slice %473 {offsets = [0, 7], sizes = [2, 1], strides = [1, 1]} : vector<2x8xf32> to vector<2x1xf32>
    %cst_87 = arith.constant 0.000000e+00 : f32
    %482 = vector.broadcast %cst_87 : f32 to vector<2x32xf32>
    %cst_88 = arith.constant 0.000000e+00 : f32
    %483 = vector.broadcast %cst_88 : f32 to vector<2x32xf32>
    %cst_89 = arith.constant 0.000000e+00 : f32
    %484 = vector.broadcast %cst_89 : f32 to vector<2x32xf32>
    %cst_90 = arith.constant 0.000000e+00 : f32
    %485 = vector.broadcast %cst_90 : f32 to vector<2x32xf32>
    %cst_91 = arith.constant 0.000000e+00 : f32
    %486 = vector.broadcast %cst_91 : f32 to vector<2x32xf32>
    %cst_92 = arith.constant 0.000000e+00 : f32
    %487 = vector.broadcast %cst_92 : f32 to vector<2x32xf32>
    %488 = vector.extract_strided_slice %457 {offsets = [0, 0], sizes = [2, 128], strides = [1, 1]} : vector<16x256xf32> to vector<2x128xf32>
    %cst_93 = arith.constant dense<0.000000e+00> : vector<2x128xf32>
    %489 = tpu.matmul %482, %458, %cst_93 {dimension_numbers = #tpu.dot_dimension_numbers<[1], [0], [0], [1], [0, 0, 1, 1], [], []>} : vector<2x32xf32>, vector<32x128xf32>, vector<2x128xf32> -> vector<2x128xf32>
    %490 = arith.addf %488, %489 : vector<2x128xf32>
    %491 = arith.negf %490 : vector<2x128xf32>
    %492 = math.exp %491 : vector<2x128xf32>
    %cst_94 = arith.constant 1.000000e+00 : f32
    %493 = vector.broadcast %cst_94 : f32 to vector<2x128xf32>
    %494 = arith.addf %493, %492 : vector<2x128xf32>
    %495 = arith.divf %493, %494 : vector<2x128xf32>
    %496 = math.tanh %490 : vector<2x128xf32>
    %497 = vector.extract_strided_slice %495 {offsets = [0, 0], sizes = [2, 32], strides = [1, 1]} : vector<2x128xf32> to vector<2x32xf32>
    %498 = vector.extract_strided_slice %495 {offsets = [0, 32], sizes = [2, 32], strides = [1, 1]} : vector<2x128xf32> to vector<2x32xf32>
    %499 = vector.extract_strided_slice %496 {offsets = [0, 64], sizes = [2, 32], strides = [1, 1]} : vector<2x128xf32> to vector<2x32xf32>
    %500 = vector.extract_strided_slice %495 {offsets = [0, 96], sizes = [2, 32], strides = [1, 1]} : vector<2x128xf32> to vector<2x32xf32>
    %501 = arith.mulf %498, %483 : vector<2x32xf32>
    %502 = arith.mulf %497, %499 : vector<2x32xf32>
    %503 = arith.addf %501, %502 : vector<2x32xf32>
    %504 = math.tanh %503 : vector<2x32xf32>
    %505 = arith.mulf %500, %504 : vector<2x32xf32>
    %506 = vector.shape_cast %6 : vector<2x1xf32> to vector<2x1xf32>
    %507 = vector.broadcast %506 : vector<2x1xf32> to vector<2x32xf32>
    %508 = arith.subf %503, %483 : vector<2x32xf32>
    %509 = arith.mulf %507, %508 : vector<2x32xf32>
    %510 = arith.addf %483, %509 : vector<2x32xf32>
    %511 = arith.subf %505, %482 : vector<2x32xf32>
    %512 = arith.mulf %507, %511 : vector<2x32xf32>
    %513 = arith.addf %482, %512 : vector<2x32xf32>
    %514 = vector.broadcast %474 : vector<2x1xf32> to vector<2x32xf32>
    %515 = arith.mulf %514, %513 : vector<2x32xf32>
    %516 = arith.addf %486, %515 : vector<2x32xf32>
    %517 = vector.extract_strided_slice %457 {offsets = [14, 128], sizes = [2, 128], strides = [1, 1]} : vector<16x256xf32> to vector<2x128xf32>
    %cst_95 = arith.constant dense<0.000000e+00> : vector<2x128xf32>
    %518 = tpu.matmul %484, %459, %cst_95 {dimension_numbers = #tpu.dot_dimension_numbers<[1], [0], [0], [1], [0, 0, 1, 1], [], []>} : vector<2x32xf32>, vector<32x128xf32>, vector<2x128xf32> -> vector<2x128xf32>
    %519 = arith.addf %517, %518 : vector<2x128xf32>
    %520 = arith.negf %519 : vector<2x128xf32>
    %521 = math.exp %520 : vector<2x128xf32>
    %cst_96 = arith.constant 1.000000e+00 : f32
    %522 = vector.broadcast %cst_96 : f32 to vector<2x128xf32>
    %523 = arith.addf %522, %521 : vector<2x128xf32>
    %524 = arith.divf %522, %523 : vector<2x128xf32>
    %525 = math.tanh %519 : vector<2x128xf32>
    %526 = vector.extract_strided_slice %524 {offsets = [0, 0], sizes = [2, 32], strides = [1, 1]} : vector<2x128xf32> to vector<2x32xf32>
    %527 = vector.extract_strided_slice %524 {offsets = [0, 32], sizes = [2, 32], strides = [1, 1]} : vector<2x128xf32> to vector<2x32xf32>
    %528 = vector.extract_strided_slice %525 {offsets = [0, 64], sizes = [2, 32], strides = [1, 1]} : vector<2x128xf32> to vector<2x32xf32>
    %529 = vector.extract_strided_slice %524 {offsets = [0, 96], sizes = [2, 32], strides = [1, 1]} : vector<2x128xf32> to vector<2x32xf32>
    %530 = arith.mulf %527, %485 : vector<2x32xf32>
    %531 = arith.mulf %526, %528 : vector<2x32xf32>
    %532 = arith.addf %530, %531 : vector<2x32xf32>
    %533 = math.tanh %532 : vector<2x32xf32>
    %534 = arith.mulf %529, %533 : vector<2x32xf32>
    %535 = vector.shape_cast %13 : vector<2x1xf32> to vector<2x1xf32>
    %536 = vector.broadcast %535 : vector<2x1xf32> to vector<2x32xf32>
    %537 = arith.subf %532, %485 : vector<2x32xf32>
    %538 = arith.mulf %536, %537 : vector<2x32xf32>
    %539 = arith.addf %485, %538 : vector<2x32xf32>
    %540 = arith.subf %534, %484 : vector<2x32xf32>
    %541 = arith.mulf %536, %540 : vector<2x32xf32>
    %542 = arith.addf %484, %541 : vector<2x32xf32>
    %543 = vector.broadcast %481 : vector<2x1xf32> to vector<2x32xf32>
    %544 = arith.mulf %543, %542 : vector<2x32xf32>
    %545 = arith.addf %487, %544 : vector<2x32xf32>
    %546 = vector.extract_strided_slice %457 {offsets = [2, 0], sizes = [2, 128], strides = [1, 1]} : vector<16x256xf32> to vector<2x128xf32>
    %cst_97 = arith.constant dense<0.000000e+00> : vector<2x128xf32>
    %547 = tpu.matmul %513, %458, %cst_97 {dimension_numbers = #tpu.dot_dimension_numbers<[1], [0], [0], [1], [0, 0, 1, 1], [], []>} : vector<2x32xf32>, vector<32x128xf32>, vector<2x128xf32> -> vector<2x128xf32>
    %548 = arith.addf %546, %547 : vector<2x128xf32>
    %549 = arith.negf %548 : vector<2x128xf32>
    %550 = math.exp %549 : vector<2x128xf32>
    %cst_98 = arith.constant 1.000000e+00 : f32
    %551 = vector.broadcast %cst_98 : f32 to vector<2x128xf32>
    %552 = arith.addf %551, %550 : vector<2x128xf32>
    %553 = arith.divf %551, %552 : vector<2x128xf32>
    %554 = math.tanh %548 : vector<2x128xf32>
    %555 = vector.extract_strided_slice %553 {offsets = [0, 0], sizes = [2, 32], strides = [1, 1]} : vector<2x128xf32> to vector<2x32xf32>
    %556 = vector.extract_strided_slice %553 {offsets = [0, 32], sizes = [2, 32], strides = [1, 1]} : vector<2x128xf32> to vector<2x32xf32>
    %557 = vector.extract_strided_slice %554 {offsets = [0, 64], sizes = [2, 32], strides = [1, 1]} : vector<2x128xf32> to vector<2x32xf32>
    %558 = vector.extract_strided_slice %553 {offsets = [0, 96], sizes = [2, 32], strides = [1, 1]} : vector<2x128xf32> to vector<2x32xf32>
    %559 = arith.mulf %556, %510 : vector<2x32xf32>
    %560 = arith.mulf %555, %557 : vector<2x32xf32>
    %561 = arith.addf %559, %560 : vector<2x32xf32>
    %562 = math.tanh %561 : vector<2x32xf32>
    %563 = arith.mulf %558, %562 : vector<2x32xf32>
    %564 = vector.shape_cast %7 : vector<2x1xf32> to vector<2x1xf32>
    %565 = vector.broadcast %564 : vector<2x1xf32> to vector<2x32xf32>
    %566 = arith.subf %561, %510 : vector<2x32xf32>
    %567 = arith.mulf %565, %566 : vector<2x32xf32>
    %568 = arith.addf %510, %567 : vector<2x32xf32>
    %569 = arith.subf %563, %513 : vector<2x32xf32>
    %570 = arith.mulf %565, %569 : vector<2x32xf32>
    %571 = arith.addf %513, %570 : vector<2x32xf32>
    %572 = vector.broadcast %475 : vector<2x1xf32> to vector<2x32xf32>
    %573 = arith.mulf %572, %571 : vector<2x32xf32>
    %574 = arith.addf %516, %573 : vector<2x32xf32>
    %575 = vector.extract_strided_slice %457 {offsets = [12, 128], sizes = [2, 128], strides = [1, 1]} : vector<16x256xf32> to vector<2x128xf32>
    %cst_99 = arith.constant dense<0.000000e+00> : vector<2x128xf32>
    %576 = tpu.matmul %542, %459, %cst_99 {dimension_numbers = #tpu.dot_dimension_numbers<[1], [0], [0], [1], [0, 0, 1, 1], [], []>} : vector<2x32xf32>, vector<32x128xf32>, vector<2x128xf32> -> vector<2x128xf32>
    %577 = arith.addf %575, %576 : vector<2x128xf32>
    %578 = arith.negf %577 : vector<2x128xf32>
    %579 = math.exp %578 : vector<2x128xf32>
    %cst_100 = arith.constant 1.000000e+00 : f32
    %580 = vector.broadcast %cst_100 : f32 to vector<2x128xf32>
    %581 = arith.addf %580, %579 : vector<2x128xf32>
    %582 = arith.divf %580, %581 : vector<2x128xf32>
    %583 = math.tanh %577 : vector<2x128xf32>
    %584 = vector.extract_strided_slice %582 {offsets = [0, 0], sizes = [2, 32], strides = [1, 1]} : vector<2x128xf32> to vector<2x32xf32>
    %585 = vector.extract_strided_slice %582 {offsets = [0, 32], sizes = [2, 32], strides = [1, 1]} : vector<2x128xf32> to vector<2x32xf32>
    %586 = vector.extract_strided_slice %583 {offsets = [0, 64], sizes = [2, 32], strides = [1, 1]} : vector<2x128xf32> to vector<2x32xf32>
    %587 = vector.extract_strided_slice %582 {offsets = [0, 96], sizes = [2, 32], strides = [1, 1]} : vector<2x128xf32> to vector<2x32xf32>
    %588 = arith.mulf %585, %539 : vector<2x32xf32>
    %589 = arith.mulf %584, %586 : vector<2x32xf32>
    %590 = arith.addf %588, %589 : vector<2x32xf32>
    %591 = math.tanh %590 : vector<2x32xf32>
    %592 = arith.mulf %587, %591 : vector<2x32xf32>
    %593 = vector.shape_cast %12 : vector<2x1xf32> to vector<2x1xf32>
    %594 = vector.broadcast %593 : vector<2x1xf32> to vector<2x32xf32>
    %595 = arith.subf %590, %539 : vector<2x32xf32>
    %596 = arith.mulf %594, %595 : vector<2x32xf32>
    %597 = arith.addf %539, %596 : vector<2x32xf32>
    %598 = arith.subf %592, %542 : vector<2x32xf32>
    %599 = arith.mulf %594, %598 : vector<2x32xf32>
    %600 = arith.addf %542, %599 : vector<2x32xf32>
    %601 = vector.broadcast %480 : vector<2x1xf32> to vector<2x32xf32>
    %602 = arith.mulf %601, %600 : vector<2x32xf32>
    %603 = arith.addf %545, %602 : vector<2x32xf32>
    %604 = vector.extract_strided_slice %457 {offsets = [4, 0], sizes = [2, 128], strides = [1, 1]} : vector<16x256xf32> to vector<2x128xf32>
    %cst_101 = arith.constant dense<0.000000e+00> : vector<2x128xf32>
    %605 = tpu.matmul %571, %458, %cst_101 {dimension_numbers = #tpu.dot_dimension_numbers<[1], [0], [0], [1], [0, 0, 1, 1], [], []>} : vector<2x32xf32>, vector<32x128xf32>, vector<2x128xf32> -> vector<2x128xf32>
    %606 = arith.addf %604, %605 : vector<2x128xf32>
    %607 = arith.negf %606 : vector<2x128xf32>
    %608 = math.exp %607 : vector<2x128xf32>
    %cst_102 = arith.constant 1.000000e+00 : f32
    %609 = vector.broadcast %cst_102 : f32 to vector<2x128xf32>
    %610 = arith.addf %609, %608 : vector<2x128xf32>
    %611 = arith.divf %609, %610 : vector<2x128xf32>
    %612 = math.tanh %606 : vector<2x128xf32>
    %613 = vector.extract_strided_slice %611 {offsets = [0, 0], sizes = [2, 32], strides = [1, 1]} : vector<2x128xf32> to vector<2x32xf32>
    %614 = vector.extract_strided_slice %611 {offsets = [0, 32], sizes = [2, 32], strides = [1, 1]} : vector<2x128xf32> to vector<2x32xf32>
    %615 = vector.extract_strided_slice %612 {offsets = [0, 64], sizes = [2, 32], strides = [1, 1]} : vector<2x128xf32> to vector<2x32xf32>
    %616 = vector.extract_strided_slice %611 {offsets = [0, 96], sizes = [2, 32], strides = [1, 1]} : vector<2x128xf32> to vector<2x32xf32>
    %617 = arith.mulf %614, %568 : vector<2x32xf32>
    %618 = arith.mulf %613, %615 : vector<2x32xf32>
    %619 = arith.addf %617, %618 : vector<2x32xf32>
    %620 = math.tanh %619 : vector<2x32xf32>
    %621 = arith.mulf %616, %620 : vector<2x32xf32>
    %622 = vector.shape_cast %8 : vector<2x1xf32> to vector<2x1xf32>
    %623 = vector.broadcast %622 : vector<2x1xf32> to vector<2x32xf32>
    %624 = arith.subf %619, %568 : vector<2x32xf32>
    %625 = arith.mulf %623, %624 : vector<2x32xf32>
    %626 = arith.addf %568, %625 : vector<2x32xf32>
    %627 = arith.subf %621, %571 : vector<2x32xf32>
    %628 = arith.mulf %623, %627 : vector<2x32xf32>
    %629 = arith.addf %571, %628 : vector<2x32xf32>
    %630 = vector.broadcast %476 : vector<2x1xf32> to vector<2x32xf32>
    %631 = arith.mulf %630, %629 : vector<2x32xf32>
    %632 = arith.addf %574, %631 : vector<2x32xf32>
    %633 = vector.extract_strided_slice %457 {offsets = [10, 128], sizes = [2, 128], strides = [1, 1]} : vector<16x256xf32> to vector<2x128xf32>
    %cst_103 = arith.constant dense<0.000000e+00> : vector<2x128xf32>
    %634 = tpu.matmul %600, %459, %cst_103 {dimension_numbers = #tpu.dot_dimension_numbers<[1], [0], [0], [1], [0, 0, 1, 1], [], []>} : vector<2x32xf32>, vector<32x128xf32>, vector<2x128xf32> -> vector<2x128xf32>
    %635 = arith.addf %633, %634 : vector<2x128xf32>
    %636 = arith.negf %635 : vector<2x128xf32>
    %637 = math.exp %636 : vector<2x128xf32>
    %cst_104 = arith.constant 1.000000e+00 : f32
    %638 = vector.broadcast %cst_104 : f32 to vector<2x128xf32>
    %639 = arith.addf %638, %637 : vector<2x128xf32>
    %640 = arith.divf %638, %639 : vector<2x128xf32>
    %641 = math.tanh %635 : vector<2x128xf32>
    %642 = vector.extract_strided_slice %640 {offsets = [0, 0], sizes = [2, 32], strides = [1, 1]} : vector<2x128xf32> to vector<2x32xf32>
    %643 = vector.extract_strided_slice %640 {offsets = [0, 32], sizes = [2, 32], strides = [1, 1]} : vector<2x128xf32> to vector<2x32xf32>
    %644 = vector.extract_strided_slice %641 {offsets = [0, 64], sizes = [2, 32], strides = [1, 1]} : vector<2x128xf32> to vector<2x32xf32>
    %645 = vector.extract_strided_slice %640 {offsets = [0, 96], sizes = [2, 32], strides = [1, 1]} : vector<2x128xf32> to vector<2x32xf32>
    %646 = arith.mulf %643, %597 : vector<2x32xf32>
    %647 = arith.mulf %642, %644 : vector<2x32xf32>
    %648 = arith.addf %646, %647 : vector<2x32xf32>
    %649 = math.tanh %648 : vector<2x32xf32>
    %650 = arith.mulf %645, %649 : vector<2x32xf32>
    %651 = vector.shape_cast %11 : vector<2x1xf32> to vector<2x1xf32>
    %652 = vector.broadcast %651 : vector<2x1xf32> to vector<2x32xf32>
    %653 = arith.subf %648, %597 : vector<2x32xf32>
    %654 = arith.mulf %652, %653 : vector<2x32xf32>
    %655 = arith.addf %597, %654 : vector<2x32xf32>
    %656 = arith.subf %650, %600 : vector<2x32xf32>
    %657 = arith.mulf %652, %656 : vector<2x32xf32>
    %658 = arith.addf %600, %657 : vector<2x32xf32>
    %659 = vector.broadcast %479 : vector<2x1xf32> to vector<2x32xf32>
    %660 = arith.mulf %659, %658 : vector<2x32xf32>
    %661 = arith.addf %603, %660 : vector<2x32xf32>
    %662 = vector.extract_strided_slice %457 {offsets = [6, 0], sizes = [2, 128], strides = [1, 1]} : vector<16x256xf32> to vector<2x128xf32>
    %cst_105 = arith.constant dense<0.000000e+00> : vector<2x128xf32>
    %663 = tpu.matmul %629, %458, %cst_105 {dimension_numbers = #tpu.dot_dimension_numbers<[1], [0], [0], [1], [0, 0, 1, 1], [], []>} : vector<2x32xf32>, vector<32x128xf32>, vector<2x128xf32> -> vector<2x128xf32>
    %664 = arith.addf %662, %663 : vector<2x128xf32>
    %665 = arith.negf %664 : vector<2x128xf32>
    %666 = math.exp %665 : vector<2x128xf32>
    %cst_106 = arith.constant 1.000000e+00 : f32
    %667 = vector.broadcast %cst_106 : f32 to vector<2x128xf32>
    %668 = arith.addf %667, %666 : vector<2x128xf32>
    %669 = arith.divf %667, %668 : vector<2x128xf32>
    %670 = math.tanh %664 : vector<2x128xf32>
    %671 = vector.extract_strided_slice %669 {offsets = [0, 0], sizes = [2, 32], strides = [1, 1]} : vector<2x128xf32> to vector<2x32xf32>
    %672 = vector.extract_strided_slice %669 {offsets = [0, 32], sizes = [2, 32], strides = [1, 1]} : vector<2x128xf32> to vector<2x32xf32>
    %673 = vector.extract_strided_slice %670 {offsets = [0, 64], sizes = [2, 32], strides = [1, 1]} : vector<2x128xf32> to vector<2x32xf32>
    %674 = vector.extract_strided_slice %669 {offsets = [0, 96], sizes = [2, 32], strides = [1, 1]} : vector<2x128xf32> to vector<2x32xf32>
    %675 = arith.mulf %672, %626 : vector<2x32xf32>
    %676 = arith.mulf %671, %673 : vector<2x32xf32>
    %677 = arith.addf %675, %676 : vector<2x32xf32>
    %678 = math.tanh %677 : vector<2x32xf32>
    %679 = arith.mulf %674, %678 : vector<2x32xf32>
    %680 = vector.shape_cast %9 : vector<2x1xf32> to vector<2x1xf32>
    %681 = vector.broadcast %680 : vector<2x1xf32> to vector<2x32xf32>
    %682 = arith.subf %677, %626 : vector<2x32xf32>
    %683 = arith.mulf %681, %682 : vector<2x32xf32>
    %684 = arith.addf %626, %683 : vector<2x32xf32>
    %685 = arith.subf %679, %629 : vector<2x32xf32>
    %686 = arith.mulf %681, %685 : vector<2x32xf32>
    %687 = arith.addf %629, %686 : vector<2x32xf32>
    %688 = vector.broadcast %477 : vector<2x1xf32> to vector<2x32xf32>
    %689 = arith.mulf %688, %687 : vector<2x32xf32>
    %690 = arith.addf %632, %689 : vector<2x32xf32>
    %691 = vector.extract_strided_slice %457 {offsets = [8, 128], sizes = [2, 128], strides = [1, 1]} : vector<16x256xf32> to vector<2x128xf32>
    %cst_107 = arith.constant dense<0.000000e+00> : vector<2x128xf32>
    %692 = tpu.matmul %658, %459, %cst_107 {dimension_numbers = #tpu.dot_dimension_numbers<[1], [0], [0], [1], [0, 0, 1, 1], [], []>} : vector<2x32xf32>, vector<32x128xf32>, vector<2x128xf32> -> vector<2x128xf32>
    %693 = arith.addf %691, %692 : vector<2x128xf32>
    %694 = arith.negf %693 : vector<2x128xf32>
    %695 = math.exp %694 : vector<2x128xf32>
    %cst_108 = arith.constant 1.000000e+00 : f32
    %696 = vector.broadcast %cst_108 : f32 to vector<2x128xf32>
    %697 = arith.addf %696, %695 : vector<2x128xf32>
    %698 = arith.divf %696, %697 : vector<2x128xf32>
    %699 = math.tanh %693 : vector<2x128xf32>
    %700 = vector.extract_strided_slice %698 {offsets = [0, 0], sizes = [2, 32], strides = [1, 1]} : vector<2x128xf32> to vector<2x32xf32>
    %701 = vector.extract_strided_slice %698 {offsets = [0, 32], sizes = [2, 32], strides = [1, 1]} : vector<2x128xf32> to vector<2x32xf32>
    %702 = vector.extract_strided_slice %699 {offsets = [0, 64], sizes = [2, 32], strides = [1, 1]} : vector<2x128xf32> to vector<2x32xf32>
    %703 = vector.extract_strided_slice %698 {offsets = [0, 96], sizes = [2, 32], strides = [1, 1]} : vector<2x128xf32> to vector<2x32xf32>
    %704 = arith.mulf %701, %655 : vector<2x32xf32>
    %705 = arith.mulf %700, %702 : vector<2x32xf32>
    %706 = arith.addf %704, %705 : vector<2x32xf32>
    %707 = math.tanh %706 : vector<2x32xf32>
    %708 = arith.mulf %703, %707 : vector<2x32xf32>
    %709 = vector.shape_cast %10 : vector<2x1xf32> to vector<2x1xf32>
    %710 = vector.broadcast %709 : vector<2x1xf32> to vector<2x32xf32>
    %711 = arith.subf %706, %655 : vector<2x32xf32>
    %712 = arith.mulf %710, %711 : vector<2x32xf32>
    %713 = arith.addf %655, %712 : vector<2x32xf32>
    %714 = arith.subf %708, %658 : vector<2x32xf32>
    %715 = arith.mulf %710, %714 : vector<2x32xf32>
    %716 = arith.addf %658, %715 : vector<2x32xf32>
    %717 = vector.broadcast %478 : vector<2x1xf32> to vector<2x32xf32>
    %718 = arith.mulf %717, %716 : vector<2x32xf32>
    %719 = arith.addf %661, %718 : vector<2x32xf32>
    %720 = vector.extract_strided_slice %457 {offsets = [8, 0], sizes = [2, 128], strides = [1, 1]} : vector<16x256xf32> to vector<2x128xf32>
    %cst_109 = arith.constant dense<0.000000e+00> : vector<2x128xf32>
    %721 = tpu.matmul %687, %458, %cst_109 {dimension_numbers = #tpu.dot_dimension_numbers<[1], [0], [0], [1], [0, 0, 1, 1], [], []>} : vector<2x32xf32>, vector<32x128xf32>, vector<2x128xf32> -> vector<2x128xf32>
    %722 = arith.addf %720, %721 : vector<2x128xf32>
    %723 = arith.negf %722 : vector<2x128xf32>
    %724 = math.exp %723 : vector<2x128xf32>
    %cst_110 = arith.constant 1.000000e+00 : f32
    %725 = vector.broadcast %cst_110 : f32 to vector<2x128xf32>
    %726 = arith.addf %725, %724 : vector<2x128xf32>
    %727 = arith.divf %725, %726 : vector<2x128xf32>
    %728 = math.tanh %722 : vector<2x128xf32>
    %729 = vector.extract_strided_slice %727 {offsets = [0, 0], sizes = [2, 32], strides = [1, 1]} : vector<2x128xf32> to vector<2x32xf32>
    %730 = vector.extract_strided_slice %727 {offsets = [0, 32], sizes = [2, 32], strides = [1, 1]} : vector<2x128xf32> to vector<2x32xf32>
    %731 = vector.extract_strided_slice %728 {offsets = [0, 64], sizes = [2, 32], strides = [1, 1]} : vector<2x128xf32> to vector<2x32xf32>
    %732 = vector.extract_strided_slice %727 {offsets = [0, 96], sizes = [2, 32], strides = [1, 1]} : vector<2x128xf32> to vector<2x32xf32>
    %733 = arith.mulf %730, %684 : vector<2x32xf32>
    %734 = arith.mulf %729, %731 : vector<2x32xf32>
    %735 = arith.addf %733, %734 : vector<2x32xf32>
    %736 = math.tanh %735 : vector<2x32xf32>
    %737 = arith.mulf %732, %736 : vector<2x32xf32>
    %738 = vector.shape_cast %10 : vector<2x1xf32> to vector<2x1xf32>
    %739 = vector.broadcast %738 : vector<2x1xf32> to vector<2x32xf32>
    %740 = arith.subf %735, %684 : vector<2x32xf32>
    %741 = arith.mulf %739, %740 : vector<2x32xf32>
    %742 = arith.addf %684, %741 : vector<2x32xf32>
    %743 = arith.subf %737, %687 : vector<2x32xf32>
    %744 = arith.mulf %739, %743 : vector<2x32xf32>
    %745 = arith.addf %687, %744 : vector<2x32xf32>
    %746 = vector.broadcast %478 : vector<2x1xf32> to vector<2x32xf32>
    %747 = arith.mulf %746, %745 : vector<2x32xf32>
    %748 = arith.addf %690, %747 : vector<2x32xf32>
    %749 = vector.extract_strided_slice %457 {offsets = [6, 128], sizes = [2, 128], strides = [1, 1]} : vector<16x256xf32> to vector<2x128xf32>
    %cst_111 = arith.constant dense<0.000000e+00> : vector<2x128xf32>
    %750 = tpu.matmul %716, %459, %cst_111 {dimension_numbers = #tpu.dot_dimension_numbers<[1], [0], [0], [1], [0, 0, 1, 1], [], []>} : vector<2x32xf32>, vector<32x128xf32>, vector<2x128xf32> -> vector<2x128xf32>
    %751 = arith.addf %749, %750 : vector<2x128xf32>
    %752 = arith.negf %751 : vector<2x128xf32>
    %753 = math.exp %752 : vector<2x128xf32>
    %cst_112 = arith.constant 1.000000e+00 : f32
    %754 = vector.broadcast %cst_112 : f32 to vector<2x128xf32>
    %755 = arith.addf %754, %753 : vector<2x128xf32>
    %756 = arith.divf %754, %755 : vector<2x128xf32>
    %757 = math.tanh %751 : vector<2x128xf32>
    %758 = vector.extract_strided_slice %756 {offsets = [0, 0], sizes = [2, 32], strides = [1, 1]} : vector<2x128xf32> to vector<2x32xf32>
    %759 = vector.extract_strided_slice %756 {offsets = [0, 32], sizes = [2, 32], strides = [1, 1]} : vector<2x128xf32> to vector<2x32xf32>
    %760 = vector.extract_strided_slice %757 {offsets = [0, 64], sizes = [2, 32], strides = [1, 1]} : vector<2x128xf32> to vector<2x32xf32>
    %761 = vector.extract_strided_slice %756 {offsets = [0, 96], sizes = [2, 32], strides = [1, 1]} : vector<2x128xf32> to vector<2x32xf32>
    %762 = arith.mulf %759, %713 : vector<2x32xf32>
    %763 = arith.mulf %758, %760 : vector<2x32xf32>
    %764 = arith.addf %762, %763 : vector<2x32xf32>
    %765 = math.tanh %764 : vector<2x32xf32>
    %766 = arith.mulf %761, %765 : vector<2x32xf32>
    %767 = vector.shape_cast %9 : vector<2x1xf32> to vector<2x1xf32>
    %768 = vector.broadcast %767 : vector<2x1xf32> to vector<2x32xf32>
    %769 = arith.subf %764, %713 : vector<2x32xf32>
    %770 = arith.mulf %768, %769 : vector<2x32xf32>
    %771 = arith.addf %713, %770 : vector<2x32xf32>
    %772 = arith.subf %766, %716 : vector<2x32xf32>
    %773 = arith.mulf %768, %772 : vector<2x32xf32>
    %774 = arith.addf %716, %773 : vector<2x32xf32>
    %775 = vector.broadcast %477 : vector<2x1xf32> to vector<2x32xf32>
    %776 = arith.mulf %775, %774 : vector<2x32xf32>
    %777 = arith.addf %719, %776 : vector<2x32xf32>
    %778 = vector.extract_strided_slice %457 {offsets = [10, 0], sizes = [2, 128], strides = [1, 1]} : vector<16x256xf32> to vector<2x128xf32>
    %cst_113 = arith.constant dense<0.000000e+00> : vector<2x128xf32>
    %779 = tpu.matmul %745, %458, %cst_113 {dimension_numbers = #tpu.dot_dimension_numbers<[1], [0], [0], [1], [0, 0, 1, 1], [], []>} : vector<2x32xf32>, vector<32x128xf32>, vector<2x128xf32> -> vector<2x128xf32>
    %780 = arith.addf %778, %779 : vector<2x128xf32>
    %781 = arith.negf %780 : vector<2x128xf32>
    %782 = math.exp %781 : vector<2x128xf32>
    %cst_114 = arith.constant 1.000000e+00 : f32
    %783 = vector.broadcast %cst_114 : f32 to vector<2x128xf32>
    %784 = arith.addf %783, %782 : vector<2x128xf32>
    %785 = arith.divf %783, %784 : vector<2x128xf32>
    %786 = math.tanh %780 : vector<2x128xf32>
    %787 = vector.extract_strided_slice %785 {offsets = [0, 0], sizes = [2, 32], strides = [1, 1]} : vector<2x128xf32> to vector<2x32xf32>
    %788 = vector.extract_strided_slice %785 {offsets = [0, 32], sizes = [2, 32], strides = [1, 1]} : vector<2x128xf32> to vector<2x32xf32>
    %789 = vector.extract_strided_slice %786 {offsets = [0, 64], sizes = [2, 32], strides = [1, 1]} : vector<2x128xf32> to vector<2x32xf32>
    %790 = vector.extract_strided_slice %785 {offsets = [0, 96], sizes = [2, 32], strides = [1, 1]} : vector<2x128xf32> to vector<2x32xf32>
    %791 = arith.mulf %788, %742 : vector<2x32xf32>
    %792 = arith.mulf %787, %789 : vector<2x32xf32>
    %793 = arith.addf %791, %792 : vector<2x32xf32>
    %794 = math.tanh %793 : vector<2x32xf32>
    %795 = arith.mulf %790, %794 : vector<2x32xf32>
    %796 = vector.shape_cast %11 : vector<2x1xf32> to vector<2x1xf32>
    %797 = vector.broadcast %796 : vector<2x1xf32> to vector<2x32xf32>
    %798 = arith.subf %793, %742 : vector<2x32xf32>
    %799 = arith.mulf %797, %798 : vector<2x32xf32>
    %800 = arith.addf %742, %799 : vector<2x32xf32>
    %801 = arith.subf %795, %745 : vector<2x32xf32>
    %802 = arith.mulf %797, %801 : vector<2x32xf32>
    %803 = arith.addf %745, %802 : vector<2x32xf32>
    %804 = vector.broadcast %479 : vector<2x1xf32> to vector<2x32xf32>
    %805 = arith.mulf %804, %803 : vector<2x32xf32>
    %806 = arith.addf %748, %805 : vector<2x32xf32>
    %807 = vector.extract_strided_slice %457 {offsets = [4, 128], sizes = [2, 128], strides = [1, 1]} : vector<16x256xf32> to vector<2x128xf32>
    %cst_115 = arith.constant dense<0.000000e+00> : vector<2x128xf32>
    %808 = tpu.matmul %774, %459, %cst_115 {dimension_numbers = #tpu.dot_dimension_numbers<[1], [0], [0], [1], [0, 0, 1, 1], [], []>} : vector<2x32xf32>, vector<32x128xf32>, vector<2x128xf32> -> vector<2x128xf32>
    %809 = arith.addf %807, %808 : vector<2x128xf32>
    %810 = arith.negf %809 : vector<2x128xf32>
    %811 = math.exp %810 : vector<2x128xf32>
    %cst_116 = arith.constant 1.000000e+00 : f32
    %812 = vector.broadcast %cst_116 : f32 to vector<2x128xf32>
    %813 = arith.addf %812, %811 : vector<2x128xf32>
    %814 = arith.divf %812, %813 : vector<2x128xf32>
    %815 = math.tanh %809 : vector<2x128xf32>
    %816 = vector.extract_strided_slice %814 {offsets = [0, 0], sizes = [2, 32], strides = [1, 1]} : vector<2x128xf32> to vector<2x32xf32>
    %817 = vector.extract_strided_slice %814 {offsets = [0, 32], sizes = [2, 32], strides = [1, 1]} : vector<2x128xf32> to vector<2x32xf32>
    %818 = vector.extract_strided_slice %815 {offsets = [0, 64], sizes = [2, 32], strides = [1, 1]} : vector<2x128xf32> to vector<2x32xf32>
    %819 = vector.extract_strided_slice %814 {offsets = [0, 96], sizes = [2, 32], strides = [1, 1]} : vector<2x128xf32> to vector<2x32xf32>
    %820 = arith.mulf %817, %771 : vector<2x32xf32>
    %821 = arith.mulf %816, %818 : vector<2x32xf32>
    %822 = arith.addf %820, %821 : vector<2x32xf32>
    %823 = math.tanh %822 : vector<2x32xf32>
    %824 = arith.mulf %819, %823 : vector<2x32xf32>
    %825 = vector.shape_cast %8 : vector<2x1xf32> to vector<2x1xf32>
    %826 = vector.broadcast %825 : vector<2x1xf32> to vector<2x32xf32>
    %827 = arith.subf %822, %771 : vector<2x32xf32>
    %828 = arith.mulf %826, %827 : vector<2x32xf32>
    %829 = arith.addf %771, %828 : vector<2x32xf32>
    %830 = arith.subf %824, %774 : vector<2x32xf32>
    %831 = arith.mulf %826, %830 : vector<2x32xf32>
    %832 = arith.addf %774, %831 : vector<2x32xf32>
    %833 = vector.broadcast %476 : vector<2x1xf32> to vector<2x32xf32>
    %834 = arith.mulf %833, %832 : vector<2x32xf32>
    %835 = arith.addf %777, %834 : vector<2x32xf32>
    %836 = vector.extract_strided_slice %457 {offsets = [12, 0], sizes = [2, 128], strides = [1, 1]} : vector<16x256xf32> to vector<2x128xf32>
    %cst_117 = arith.constant dense<0.000000e+00> : vector<2x128xf32>
    %837 = tpu.matmul %803, %458, %cst_117 {dimension_numbers = #tpu.dot_dimension_numbers<[1], [0], [0], [1], [0, 0, 1, 1], [], []>} : vector<2x32xf32>, vector<32x128xf32>, vector<2x128xf32> -> vector<2x128xf32>
    %838 = arith.addf %836, %837 : vector<2x128xf32>
    %839 = arith.negf %838 : vector<2x128xf32>
    %840 = math.exp %839 : vector<2x128xf32>
    %cst_118 = arith.constant 1.000000e+00 : f32
    %841 = vector.broadcast %cst_118 : f32 to vector<2x128xf32>
    %842 = arith.addf %841, %840 : vector<2x128xf32>
    %843 = arith.divf %841, %842 : vector<2x128xf32>
    %844 = math.tanh %838 : vector<2x128xf32>
    %845 = vector.extract_strided_slice %843 {offsets = [0, 0], sizes = [2, 32], strides = [1, 1]} : vector<2x128xf32> to vector<2x32xf32>
    %846 = vector.extract_strided_slice %843 {offsets = [0, 32], sizes = [2, 32], strides = [1, 1]} : vector<2x128xf32> to vector<2x32xf32>
    %847 = vector.extract_strided_slice %844 {offsets = [0, 64], sizes = [2, 32], strides = [1, 1]} : vector<2x128xf32> to vector<2x32xf32>
    %848 = vector.extract_strided_slice %843 {offsets = [0, 96], sizes = [2, 32], strides = [1, 1]} : vector<2x128xf32> to vector<2x32xf32>
    %849 = arith.mulf %846, %800 : vector<2x32xf32>
    %850 = arith.mulf %845, %847 : vector<2x32xf32>
    %851 = arith.addf %849, %850 : vector<2x32xf32>
    %852 = math.tanh %851 : vector<2x32xf32>
    %853 = arith.mulf %848, %852 : vector<2x32xf32>
    %854 = vector.shape_cast %12 : vector<2x1xf32> to vector<2x1xf32>
    %855 = vector.broadcast %854 : vector<2x1xf32> to vector<2x32xf32>
    %856 = arith.subf %851, %800 : vector<2x32xf32>
    %857 = arith.mulf %855, %856 : vector<2x32xf32>
    %858 = arith.addf %800, %857 : vector<2x32xf32>
    %859 = arith.subf %853, %803 : vector<2x32xf32>
    %860 = arith.mulf %855, %859 : vector<2x32xf32>
    %861 = arith.addf %803, %860 : vector<2x32xf32>
    %862 = vector.broadcast %480 : vector<2x1xf32> to vector<2x32xf32>
    %863 = arith.mulf %862, %861 : vector<2x32xf32>
    %864 = arith.addf %806, %863 : vector<2x32xf32>
    %865 = vector.extract_strided_slice %457 {offsets = [2, 128], sizes = [2, 128], strides = [1, 1]} : vector<16x256xf32> to vector<2x128xf32>
    %cst_119 = arith.constant dense<0.000000e+00> : vector<2x128xf32>
    %866 = tpu.matmul %832, %459, %cst_119 {dimension_numbers = #tpu.dot_dimension_numbers<[1], [0], [0], [1], [0, 0, 1, 1], [], []>} : vector<2x32xf32>, vector<32x128xf32>, vector<2x128xf32> -> vector<2x128xf32>
    %867 = arith.addf %865, %866 : vector<2x128xf32>
    %868 = arith.negf %867 : vector<2x128xf32>
    %869 = math.exp %868 : vector<2x128xf32>
    %cst_120 = arith.constant 1.000000e+00 : f32
    %870 = vector.broadcast %cst_120 : f32 to vector<2x128xf32>
    %871 = arith.addf %870, %869 : vector<2x128xf32>
    %872 = arith.divf %870, %871 : vector<2x128xf32>
    %873 = math.tanh %867 : vector<2x128xf32>
    %874 = vector.extract_strided_slice %872 {offsets = [0, 0], sizes = [2, 32], strides = [1, 1]} : vector<2x128xf32> to vector<2x32xf32>
    %875 = vector.extract_strided_slice %872 {offsets = [0, 32], sizes = [2, 32], strides = [1, 1]} : vector<2x128xf32> to vector<2x32xf32>
    %876 = vector.extract_strided_slice %873 {offsets = [0, 64], sizes = [2, 32], strides = [1, 1]} : vector<2x128xf32> to vector<2x32xf32>
    %877 = vector.extract_strided_slice %872 {offsets = [0, 96], sizes = [2, 32], strides = [1, 1]} : vector<2x128xf32> to vector<2x32xf32>
    %878 = arith.mulf %875, %829 : vector<2x32xf32>
    %879 = arith.mulf %874, %876 : vector<2x32xf32>
    %880 = arith.addf %878, %879 : vector<2x32xf32>
    %881 = math.tanh %880 : vector<2x32xf32>
    %882 = arith.mulf %877, %881 : vector<2x32xf32>
    %883 = vector.shape_cast %7 : vector<2x1xf32> to vector<2x1xf32>
    %884 = vector.broadcast %883 : vector<2x1xf32> to vector<2x32xf32>
    %885 = arith.subf %880, %829 : vector<2x32xf32>
    %886 = arith.mulf %884, %885 : vector<2x32xf32>
    %887 = arith.addf %829, %886 : vector<2x32xf32>
    %888 = arith.subf %882, %832 : vector<2x32xf32>
    %889 = arith.mulf %884, %888 : vector<2x32xf32>
    %890 = arith.addf %832, %889 : vector<2x32xf32>
    %891 = vector.broadcast %475 : vector<2x1xf32> to vector<2x32xf32>
    %892 = arith.mulf %891, %890 : vector<2x32xf32>
    %893 = arith.addf %835, %892 : vector<2x32xf32>
    %894 = vector.extract_strided_slice %457 {offsets = [14, 0], sizes = [2, 128], strides = [1, 1]} : vector<16x256xf32> to vector<2x128xf32>
    %cst_121 = arith.constant dense<0.000000e+00> : vector<2x128xf32>
    %895 = tpu.matmul %861, %458, %cst_121 {dimension_numbers = #tpu.dot_dimension_numbers<[1], [0], [0], [1], [0, 0, 1, 1], [], []>} : vector<2x32xf32>, vector<32x128xf32>, vector<2x128xf32> -> vector<2x128xf32>
    %896 = arith.addf %894, %895 : vector<2x128xf32>
    %897 = arith.negf %896 : vector<2x128xf32>
    %898 = math.exp %897 : vector<2x128xf32>
    %cst_122 = arith.constant 1.000000e+00 : f32
    %899 = vector.broadcast %cst_122 : f32 to vector<2x128xf32>
    %900 = arith.addf %899, %898 : vector<2x128xf32>
    %901 = arith.divf %899, %900 : vector<2x128xf32>
    %902 = math.tanh %896 : vector<2x128xf32>
    %903 = vector.extract_strided_slice %901 {offsets = [0, 0], sizes = [2, 32], strides = [1, 1]} : vector<2x128xf32> to vector<2x32xf32>
    %904 = vector.extract_strided_slice %901 {offsets = [0, 32], sizes = [2, 32], strides = [1, 1]} : vector<2x128xf32> to vector<2x32xf32>
    %905 = vector.extract_strided_slice %902 {offsets = [0, 64], sizes = [2, 32], strides = [1, 1]} : vector<2x128xf32> to vector<2x32xf32>
    %906 = vector.extract_strided_slice %901 {offsets = [0, 96], sizes = [2, 32], strides = [1, 1]} : vector<2x128xf32> to vector<2x32xf32>
    %907 = arith.mulf %904, %858 : vector<2x32xf32>
    %908 = arith.mulf %903, %905 : vector<2x32xf32>
    %909 = arith.addf %907, %908 : vector<2x32xf32>
    %910 = math.tanh %909 : vector<2x32xf32>
    %911 = arith.mulf %906, %910 : vector<2x32xf32>
    %912 = vector.shape_cast %13 : vector<2x1xf32> to vector<2x1xf32>
    %913 = vector.broadcast %912 : vector<2x1xf32> to vector<2x32xf32>
    %914 = arith.subf %911, %861 : vector<2x32xf32>
    %915 = arith.mulf %913, %914 : vector<2x32xf32>
    %916 = arith.addf %861, %915 : vector<2x32xf32>
    %917 = vector.broadcast %481 : vector<2x1xf32> to vector<2x32xf32>
    %918 = arith.mulf %917, %916 : vector<2x32xf32>
    %919 = arith.addf %864, %918 : vector<2x32xf32>
    %920 = vector.extract_strided_slice %457 {offsets = [0, 128], sizes = [2, 128], strides = [1, 1]} : vector<16x256xf32> to vector<2x128xf32>
    %cst_123 = arith.constant dense<0.000000e+00> : vector<2x128xf32>
    %921 = tpu.matmul %890, %459, %cst_123 {dimension_numbers = #tpu.dot_dimension_numbers<[1], [0], [0], [1], [0, 0, 1, 1], [], []>} : vector<2x32xf32>, vector<32x128xf32>, vector<2x128xf32> -> vector<2x128xf32>
    %922 = arith.addf %920, %921 : vector<2x128xf32>
    %923 = arith.negf %922 : vector<2x128xf32>
    %924 = math.exp %923 : vector<2x128xf32>
    %cst_124 = arith.constant 1.000000e+00 : f32
    %925 = vector.broadcast %cst_124 : f32 to vector<2x128xf32>
    %926 = arith.addf %925, %924 : vector<2x128xf32>
    %927 = arith.divf %925, %926 : vector<2x128xf32>
    %928 = math.tanh %922 : vector<2x128xf32>
    %929 = vector.extract_strided_slice %927 {offsets = [0, 0], sizes = [2, 32], strides = [1, 1]} : vector<2x128xf32> to vector<2x32xf32>
    %930 = vector.extract_strided_slice %927 {offsets = [0, 32], sizes = [2, 32], strides = [1, 1]} : vector<2x128xf32> to vector<2x32xf32>
    %931 = vector.extract_strided_slice %928 {offsets = [0, 64], sizes = [2, 32], strides = [1, 1]} : vector<2x128xf32> to vector<2x32xf32>
    %932 = vector.extract_strided_slice %927 {offsets = [0, 96], sizes = [2, 32], strides = [1, 1]} : vector<2x128xf32> to vector<2x32xf32>
    %933 = arith.mulf %930, %887 : vector<2x32xf32>
    %934 = arith.mulf %929, %931 : vector<2x32xf32>
    %935 = arith.addf %933, %934 : vector<2x32xf32>
    %936 = math.tanh %935 : vector<2x32xf32>
    %937 = arith.mulf %932, %936 : vector<2x32xf32>
    %938 = vector.shape_cast %6 : vector<2x1xf32> to vector<2x1xf32>
    %939 = vector.broadcast %938 : vector<2x1xf32> to vector<2x32xf32>
    %940 = arith.subf %937, %890 : vector<2x32xf32>
    %941 = arith.mulf %939, %940 : vector<2x32xf32>
    %942 = arith.addf %890, %941 : vector<2x32xf32>
    %943 = vector.broadcast %474 : vector<2x1xf32> to vector<2x32xf32>
    %944 = arith.mulf %943, %942 : vector<2x32xf32>
    %945 = arith.addf %893, %944 : vector<2x32xf32>
    %c0_125 = arith.constant 0 : index
    %c0_126 = arith.constant 0 : index
    %946 = vector.load %arg11[%c0_125, %c0_126] : memref<64x32xf32, #tpu.memory_space<vmem>>, vector<32x32xf32>
    %cst_127 = arith.constant dense<0.000000e+00> : vector<2x32xf32>
    %947 = tpu.matmul %919, %946, %cst_127 {dimension_numbers = #tpu.dot_dimension_numbers<[1], [0], [0], [1], [0, 0, 1, 1], [], []>} : vector<2x32xf32>, vector<32x32xf32>, vector<2x32xf32> -> vector<2x32xf32>
    %c32_128 = arith.constant 32 : index
    %c0_129 = arith.constant 0 : index
    %948 = vector.load %arg11[%c32_128, %c0_129] : memref<64x32xf32, #tpu.memory_space<vmem>>, vector<32x32xf32>
    %cst_130 = arith.constant dense<0.000000e+00> : vector<2x32xf32>
    %949 = tpu.matmul %945, %948, %cst_130 {dimension_numbers = #tpu.dot_dimension_numbers<[1], [0], [0], [1], [0, 0, 1, 1], [], []>} : vector<2x32xf32>, vector<32x32xf32>, vector<2x32xf32> -> vector<2x32xf32>
    %950 = arith.addf %947, %949 : vector<2x32xf32>
    %c0_131 = arith.constant 0 : index
    %c0_132 = arith.constant 0 : index
    %951 = vector.load %arg12[%c0_131, %c0_132] : memref<1x32xf32, #tpu.memory_space<vmem>>, vector<1x32xf32>
    %952 = vector.broadcast %951 : vector<1x32xf32> to vector<2x32xf32>
    %953 = arith.addf %950, %952 : vector<2x32xf32>
    %cst_133 = arith.constant 0.000000e+00 : f32
    %954 = vector.broadcast %cst_133 : f32 to vector<2x32xf32>
    %955 = arith.maximumf %953, %954 : vector<2x32xf32>
    %c0_134 = arith.constant 0 : index
    %c0_135 = arith.constant 0 : index
    %956 = vector.load %arg13[%c0_134, %c0_135] : memref<32x8xf32, #tpu.memory_space<vmem>>, vector<32x8xf32>
    %cst_136 = arith.constant dense<0.000000e+00> : vector<2x8xf32>
    %957 = tpu.matmul %955, %956, %cst_136 {dimension_numbers = #tpu.dot_dimension_numbers<[1], [0], [0], [1], [0, 0, 1, 1], [], []>} : vector<2x32xf32>, vector<32x8xf32>, vector<2x8xf32> -> vector<2x8xf32>
    %c0_137 = arith.constant 0 : index
    %c0_138 = arith.constant 0 : index
    %958 = vector.load %arg14[%c0_137, %c0_138] : memref<1x8xf32, #tpu.memory_space<vmem>>, vector<1x8xf32>
    %959 = vector.broadcast %958 : vector<1x8xf32> to vector<2x8xf32>
    %960 = arith.addf %957, %959 : vector<2x8xf32>
    %961 = arith.mulf %5, %960 : vector<2x8xf32>
    %cst_139 = arith.constant 1.000000e+00 : f32
    %962 = vector.broadcast %cst_139 : f32 to vector<2x8xf32>
    %963 = arith.subf %962, %5 : vector<2x8xf32>
    %cst_140 = arith.constant -1.000000e+30 : f32
    %964 = vector.broadcast %cst_140 : f32 to vector<2x8xf32>
    %965 = arith.mulf %963, %964 : vector<2x8xf32>
    %966 = arith.addf %961, %965 : vector<2x8xf32>
    %c0_141 = arith.constant 0 : index
    %c0_142 = arith.constant 0 : index
    %967 = vector.load %arg15[%c0_141, %c0_142] : memref<2x8xf32, #tpu.memory_space<vmem>>, vector<2x8xf32>
    tpu.vector_store %arg15[%c0_141, %c0_142], %966 {strides = array<i32>} : memref<2x8xf32, #tpu.memory_space<vmem>>, vector<2x8xf32>,
    return
  }
}

</mosaic_0001>

<bundles_post_ra>
// kernel: net_forward.1
= control target key start
LH: loop header
LB: loop body
LE: loop exit
PB: predicated region body
PF: predicated region fallthrough
CT: control target
= control target key end

     0   :  { %20 = vsyncpa [#allocation4], 0  ;;  %s7178_s0 = inlined_call_operand.vmem [shape: f32[16,16], index: 0, kind: input, shape index: {}]   ;;  %s7179_s1 = inlined_call_operand.vmem [shape: s32[2,1], index: 1, kind: input, shape index: {}]   ;;  %s7180_s2 = inlined_call_operand.vmem [shape: f32[1,8], index: 2, kind: input, shape index: {}]   ;;  %s7181_s3 = inlined_call_operand.vmem [shape: f32[16,256], index: 3, kind: input, shape index: {}]   ;;  %s7182_s4 = inlined_call_operand.vmem [shape: f32[32,128], index: 4, kind: input, shape index: {}]   ;;  %s7183_s5 = inlined_call_operand.vmem [shape: f32[32,128], index: 5, kind: input, shape index: {}]   ;;  %s7184_s6 = inlined_call_operand.vmem [shape: f32[1,256], index: 6, kind: input, shape index: {}]   ;;  %s7185_s7 = inlined_call_operand.vmem [shape: f32[64,256], index: 7, kind: input, shape index: {}]   ;;  %s7186_s8 = inlined_call_operand.hbm [shape: f32[32,128], index: 8, kind: input, shape index: {}]   ;;  %s7187_s9 = inlined_call_operand.hbm [shape: f32[32,128], index: 9, kind: input, shape index: {}]   ;;  %s7188_s10 = inlined_call_operand.vmem [shape: f32[1,256], index: 10, kind: input, shape index: {}]   ;;  %s7189_s11 = inlined_call_operand.vmem [shape: f32[64,32], index: 11, kind: input, shape index: {}]   ;;  %s7190_s12 = inlined_call_operand.vmem [shape: f32[1,32], index: 12, kind: input, shape index: {}]   ;;  %s7191_s13 = inlined_call_operand.vmem [shape: f32[32,8], index: 13, kind: input, shape index: {}]   ;;  %s7192_s14 = inlined_call_operand.vmem [shape: f32[1,8], index: 14, kind: input, shape index: {}]   ;;  %s7193_s15 = inlined_call_operand.hbm [shape: f32[2,8], index: 15, kind: output, shape index: {}]  }
   0x1   :  { %21 = vsyncpa [#allocation7], 0 }
   0x2   :  { %22 = vsyncpa [#allocation5], 0  ;;  %s5911_s18 = smov [#allocation3]   ;;  %s5839_s22 = scalar_lea.hbm %s7186_s8, 512 }
   0x3   :  { %s44_s19 = sshll.u32 %s5911_s18, 4  ;;  %p5840_p0 = scmp.ne.s32.totalorder %s7186_s8, %s5839_s22  ;;  %s45_s19 = int_to_ptr.vmem [resolvable:$true] %s44_s19 }
   0x4   :  { %p5843_p1 = scmp.lt.u32.totalorder %s5839_s22, %s7186_s8 }
   0x6   :  { %p5845_p2 = pnand %p5843_p1, %p5840_p0 }
   0x8   :  { %5848 = shalt.err (!%p5845_p2)
}
   0x9   :  { %s5849_s27 = scalar_lea.vmem %s45_s19, 512  ;;  %p5854_p4 = scmp.lt.s32.totalorder %s45_s19, %s45_s19 }
   0xa   :  { %p5850_p3 = scmp.ne.s32.totalorder %s45_s19, %s5849_s27  ;;  %p5855_p5 = scmp.lt.s32.totalorder %s5849_s27, %s5849_s27 }
   0xc   :  { %p5856_p6 = por %p5855_p5, %p5854_p4 }
   0xe   :  { %p5857_p7 = pnand %p5856_p6, %p5850_p3 }
  0x10   :  { %5860 = shalt.err (!%p5857_p7)
}
  0x11   :  { %s5912_s28 = smov 128   ;;  %s5913_s29 = smov 8  }
  0x12   :  { %50 = dma.hbm_to_vmem [thread:$0]  %s7186_s8, 512, %s45_s19, [#allocation4], %s5912_s28, %s5912_s28, %s5913_s29  }
  0x13   :  { %s5914_s17 = smov [#allocation6]   ;;  %s5861_s22 = scalar_lea.hbm %s7187_s9, 512 }
  0x14   :  { %s56_s18 = sshll.u32 %s5914_s17, 4  ;;  %p5862_p8 = scmp.ne.s32.totalorder %s7187_s9, %s5861_s22  ;;  %s57_s18 = int_to_ptr.vmem [resolvable:$true] %s56_s18 }
  0x15   :  { %p5865_p9 = scmp.lt.u32.totalorder %s5861_s22, %s7187_s9 }
  0x17   :  { %p5867_p10 = pnand %p5865_p9, %p5862_p8 }
  0x19   :  { %5870 = shalt.err (!%p5867_p10)
}
  0x1a   :  { %s5871_s27 = scalar_lea.vmem %s57_s18, 512  ;;  %p5876_p12 = scmp.lt.s32.totalorder %s57_s18, %s57_s18 }
  0x1b   :  { %p5872_p11 = scmp.ne.s32.totalorder %s57_s18, %s5871_s27  ;;  %p5877_p13 = scmp.lt.s32.totalorder %s5871_s27, %s5871_s27 }
  0x1d   :  { %p5878_p0 = por %p5877_p13, %p5876_p12 }
  0x1f   :  { %p5879_p1 = pnand %p5878_p0, %p5872_p11 }
  0x21   :  { %5882 = shalt.err (!%p5879_p1)
}
  0x22   :  { %62 = dma.hbm_to_vmem [thread:$0]  %s7187_s9, 512, %s57_s18, [#allocation7], %s5912_s28, %s5912_s28, %s5913_s29  }
  0x23   :  { %5905 = dma.done.wait [#allocation4], 512  }
  0x24   :  { %5906 = vsyncadd [#allocation4], 4294966784 }
  0x25   :  { %5907 = dma.done.wait [#allocation7], 512  }
  0x26   :  { %5908 = vsyncadd [#allocation7], 4294966784  ;;  %v5915_v0 = vmov 0.0|0.0   ;;  %v5916_v1 = vmov 0.0   ;;  %vm5917_vm0 = vmmov 0   ;;  %v91_v2 = vld [vmem:[%s7181_s3 + $0x8] sm:$0xff]  ;;  %v79_v23 = vlaneseq }
  0x27   :  { %5317 = vmatprep.subr.bf16.mxu1 %v5915_v0  ;;  %177 = vmatprep.mubr.f32.mxu0 %v5916_v1  ;;  %v93_v3 = vld [vmem:[%s7181_s3 + $0x18] sm:$0xff]  ;;  %v190_v4 = vld [vmem:[%s7182_s4] sm:$0xff]  ;;  %v191_v6 = vld [vmem:[%s7182_s4 + $0x8] sm:$0xff]  ;;  %vm106_vm1 = vcmask 130048   ;;  %v5918_v22 = vmov 0   ;;  %v5920_v48 = vmov 7  }
  0x28   :  { %4936 = vmatprep.mubr.msk.f32.mxu1 %vm5917_vm0, %v5916_v1  ;;  %v5313_v5 = vpack.c.bf16 %v93_v3, %v91_v2  ;;  %v90_v7 = vld [vmem:[%s7181_s3] sm:$0xff]  ;;  %v92_v8 = vld [vmem:[%s7181_s3 + $0x10] sm:$0xff]  ;;  %v6056_v9 = vpack.c.bf16 %v191_v6, %v190_v4  ;;  %v193_v12 = vld [vmem:[%s7182_s4 + $0x18] sm:$0xff]  ;;  %5562 = vset.pattern.permute.xlu0 %v5918_v22  ;;  %v6118_v24 = vshrl.u32 %v79_v23, 7  ;;  %s5921_s24 = smov 32   ;;  %v80_v58 = vand.u32 127, %v79_v23 }
  0x29   :  { %v5315_v10 = vpack.c.bf16 %v92_v8, %v90_v7  ;;  %v192_v11 = vld [vmem:[%s7182_s4 + $0x10] sm:$0xff]  ;;  %v194_v13 = vld [vmem:[%s7183_s5] sm:$0xff]  ;;  %v195_v14 = vld [vmem:[%s7183_s5 + $0x8] sm:$0xff]  ;;  %5563 = vset.pattern.permute.xlu1 %v5918_v22  ;;  %vm310_vm3 = vcmask 254976   ;;  %vm198_vm4 = vcmask 261120   ;;  %vm432_vm5 = vcmask 517376  }
  0x2a   :  { %5314 = vmatprep.subr.bf16.mxu0 %v5313_v5  ;;  %5319 = vmatpush3.bf16.msra.mxu1 %v6056_v9  ;;  %v88_v15 = vld [vmem:[%s7178_s0] sm:$0xff]  ;;  %v6074_v16 = vpack.c.bf16 %v193_v12, %v192_v11  ;;  %v6076_v17 = vpack.c.bf16 %v195_v14, %v194_v13  ;;  %v196_v18 = vld [vmem:[%s7183_s5 + $0x10] sm:$0xff]  ;;  %v197_v19 = vld [vmem:[%s7183_s5 + $0x18] sm:$0xff]  ;;  %v6121_v25 = vsub.s32 0, %v6118_v24  ;;  %v102_v27 = vsub.s32 1, %v6118_v24 }
  0x2b   :  { %5316 = vmatpush1.bf16.msra.mxu0 %v5315_v10  ;;  %5320 = vmatprep.subr.bf16.mxu1 %v5915_v0  ;;  %v89_v20 = vld [vmem:[%s7178_s0 + $0x8] sm:$0xff]  ;;  %v6092_v21 = vpack.c.bf16 %v197_v19, %v196_v18  ;;  %v94_v26 = vld [vmem:[%s7184_s6] sm:$0x3]  ;;  %s5919_s6 = smov 64   ;;  %vm2277_vm6 = vcmask 523264   ;;  %vm2370_vm7 = vcmask 57344  }
  0x2c   :  { %5323 = vmatprep.subr.bf16.mxu0 %v5915_v0  ;;  %v99_v28 = vrot.slane %v94_v26, %v6121_v25  ;;  %v103_v29 = vrot.slane %v94_v26, %v102_v27  ;;  %v81_v46 = vld [vmem:[%s7179_s1] sm:$0x3]  ;;  %s5923_s1 = smov 96   ;;  %vm4665_vm8 = vcmask 58368  }
  0x2e   :  { %4684 = vmatmul.mubr.msk.f32.vlgmr.msra.gmra.mrb[0].mxu0 %vm106_vm1, %v88_v15  ;;  %5322 = vmatpush3.bf16.msra.mxu1 %v6074_v16 }
  0x2f   :  { %5325 = vmatpush3.bf16.msra.mxu0 %v6076_v17  ;;  %183 = vmatprep.mubr.f32.mxu0 %v5916_v1 }
  0x30   :  { %5326 = vmatprep.subr.bf16.mxu0 %v5915_v0  ;;  %5329 = vmatprep.subr.bf16.mxu1 %v5915_v0 }
  0x31   :  { %4937 = vmatmul.mubr.f32.vlgmr.msra.gmra.mrb[0].mxu1 %v5916_v1 }
  0x32   :  { %4685 = vmatmul.mubr.msk.f32.gmra.mrb[2].mxu0 %vm106_vm1, %v89_v20  ;;  %5331 = vmatpush3.bf16.msra.mxu1 %v6056_v9 }
  0x33   :  { %5328 = vmatpush3.bf16.msra.mxu0 %v6092_v21  ;;  %4947 = vmatprep.mubr.msk.f32.mxu0 %vm5917_vm0, %v5916_v1 }
  0x34   :  { %4958 = vmatprep.mubr.msk.f32.mxu1 %vm5917_vm0, %v5916_v1  ;;  %5332 = vmatprep.subr.bf16.mxu1 %v5915_v0 }
  0x35   :  { %5335 = vmatprep.subr.bf16.mxu0 %v5915_v0 }
  0x36   :  { %4948 = vmatmul.mubr.f32.vlgmr.msra.gmra.mrb[4].mxu0 %v5916_v1  ;;  %5334 = vmatpush3.bf16.msra.mxu1 %v6074_v16 }
  0x37   :  { %5337 = vmatpush3.bf16.msra.mxu0 %v6076_v17  ;;  %4969 = vmatprep.mubr.msk.f32.mxu0 %vm5917_vm0, %v5916_v1 }
  0x38   :  { %5338 = vmatprep.subr.bf16.mxu0 %v5915_v0  ;;  %5341 = vmatprep.subr.bf16.mxu1 %v5915_v0 }
  0x3b   :  { %5340 = vmatpush3.bf16.msra.mxu0 %v6092_v21 }
  0x3c   :  { %5347 = vmatprep.subr.bf16.mxu0 %v5915_v0 }
 0x101   :  { %v179_v30 = vpop.f32.mrb[0].mxu0 }
 0x102   :  { %v6130_v31 = vadd.f32 %v179_v30, %v99_v28  ;;  %v181_v32 = vpop.f32.mrb[1].mxu0 }
 0x103   :  { %v6132_v33 = vadd.f32 %v181_v32, %v103_v29 }
 0x104   :  { %v268_v34 = vpop.f32.mrb[0].mxu1 }
 0x105   :  { %v185_v35 = vpop.f32.mrb[2].mxu0  ;;  %v272_v36 = vadd.f32 %v268_v34, %v6130_v31  ;;  %v4938_v37 = vpop.f32.mrb[1].mxu1 }
 0x106   :  { %v6135_v38 = vadd.f32 %v185_v35, %v99_v28  ;;  %v187_v39 = vpop.f32.mrb[3].mxu0  ;;  %v5922_v35 = vmov 1  }
 0x107   :  { %5579 = vtanh.f32 %v272_v36  ;;  %v6137_v40 = vadd.f32 %v187_v39, %v103_v29  ;;  %v4686_v49 = vmul.f32 -1.442695, %v272_v36 }
 0x109   :  { %v378_v41 = vpop.f32.mrb[4].mxu0 }
 0x10a   :  { %v383_v42 = vrot.slane %v378_v41, 2  ;;  %v4949_v43 = vpop.f32.mrb[5].mxu0 }
 0x10c   :  { %v385_v44 = vadd.f32 %v383_v42, %v6137_v40 }
 0x10e   :  { %5581 = vtanh.f32 %v385_v44  ;;  %v4687_v52 = vmul.f32 -1.442695, %v385_v44 }
 0x10f   :  { %5583 = vpow2.f32 %v4686_v49 }
 0x111   :  { %v5580_v45 = vpop.eup %5579 }
 0x112   :  { %282 = vrot.lane.b32.xlu0 %v5580_v45, %s5919_s6 }
 0x116   :  { %83 = vperm.xlu0 %5562, %v81_v46  }
 0x118   :  { %v5582_v47 = vpop.eup %5581 }
 0x119   :  { %v5584_v50 = vpop.eup %5583 }
 0x11a   :  { %395 = vrot.lane.b32.xlu0 %v5582_v47, %s5919_s6  ;;  %v276_v51 = vadd.f32 1.0, %v5584_v50 }
 0x11b   :  { %5564 = vset.pattern.permute.xlu0 %v5920_v48 }
 0x11c   :  { %5585 = vrcp.f32 %v276_v51 }
 0x11d   :  { %5587 = vpow2.f32 %v4687_v52 }
 0x126   :  { %v5586_v53 = vpop.eup %5585 }
 0x127   :  { %v5588_v56 = vpop.eup %5587  ;;  %v280_v2 = vmul.f32 0.0, %v5586_v53 }
 0x128   :  { %v389_v57 = vadd.f32 1.0, %v5588_v56 }
 0x12a   :  { %5589 = vrcp.f32 %v389_v57 }
 0x134   :  { %v5590_v60 = vpop.eup %5589 }
 0x135   :  { %v393_v6 = vmul.f32 0.0, %v5590_v60 }
 0x184   :  { %v283_v54 = vpop.permute.xlu0 %282 }
 0x185   :  { %v285_v55 = vmul.f32 %v5586_v53, %v283_v54 }
 0x187   :  { %287 = vrot.lane.b32.xlu1 %v285_v55, %s5921_s24 }
 0x195   :  { %v84_v59 = vpop.permute.xlu0 %83 }
 0x196   :  { %vm85_vm2 = vcmp.lt.s32.totalorder %v80_v58, %v84_v59 }
 0x197   :  { %v6148_v61 = vsel %vm85_vm2, 1.0, %v5916_v1 }
 0x198   :  { %299 = vperm.xlu1 %5563, %v6148_v61  }
 0x199   :  { %v396_v62 = vpop.permute.xlu0 %395 }
 0x19a   :  { %v398_v63 = vmul.f32 %v5590_v60, %v396_v62 }
 0x19c   :  { %400 = vrot.lane.b32.xlu0 %v398_v63, %s5921_s24 }
 0x1a0   :  { %411 = vperm.xlu0 %5564, %v6148_v61  }
 0x1a4   :  { %5565 = vset.pattern.permute.xlu0 %v5922_v35 }
 0x1f9   :  { %v288_v3 = vpop.permute.xlu1 %287 }
 0x1fa   :  { %v290_v4 = vadd.f32 %v288_v3, %v280_v2 }
 0x1fc   :  { %5591 = vtanh.f32 %v290_v4 }
 0x206   :  { %v5592_v5 = vpop.eup %5591 }
 0x207   :  { %293 = vrot.lane.b32.xlu1 %v5592_v5, %s5919_s6  ;;  %v5924_v5 = vmov 6  }
 0x208   :  { %5566 = vset.pattern.permute.xlu1 %v5924_v5 }
 0x20e   :  { %v401_v7 = vpop.permute.xlu0 %400 }
 0x20f   :  { %v403_v8 = vadd.f32 %v401_v7, %v393_v6 }
 0x211   :  { %5593 = vtanh.f32 %v403_v8  ;;  %v415_v47 = vrot.slane %v403_v8, 6 }
 0x217   :  { %v6154_v10 = vpop.permute.xlu1 %299 }
 0x218   :  { %v6191_v49 = vmul.f32 %v6154_v10, %v290_v4 }
 0x21a   :  { %v518_v50 = vrot.slane %v6191_v49, 6 }
 0x21b   :  { %v5594_v14 = vpop.eup %5593 }
 0x21f   :  { %v6171_v23 = vpop.permute.xlu0 %411 }
 0x279   :  { %v294_v11 = vpop.permute.xlu1 %293 }
 0x27a   :  { %v296_v12 = vmul.f32 %v5586_v53, %v294_v11 }
 0x27c   :  { %v6157_v13 = vmul.f32 %v6154_v10, %v296_v12 }
 0x27e   :  { %307 = vrot.lane.b32.xlu1 %v6157_v13, %s5921_s24  ;;  %v553_v63 = vrot.slane %v6157_v13, 6 }
 0x282   :  { %406 = vrot.lane.b32.xlu1 %v5594_v14, %s5919_s6 }
 0x2f0   :  { %v308_v15 = vpop.permute.xlu1 %307 }
 0x2f1   :  { %311 = vst.msk [vmem:[#allocation2] sm:$0x3] %vm310_vm3, %v308_v15  ;;  %4959 = vmatmul.mubr.msk.f32.vlgmr.msra.gmra.mrb[2].mxu1 %vm198_vm4, %v308_v15 }
 0x2f2   :  { %5343 = vmatpush3.bf16.msra.mxu1 %v6056_v9  ;;  %4980 = vmatprep.mubr.msk.f32.mxu1 %vm5917_vm0, %v5916_v1 }
 0x2f3   :  { %5344 = vmatprep.subr.bf16.mxu1 %v5915_v0 }
 0x2f4   :  { %v407_v18 = vpop.permute.xlu1 %406 }
 0x2f5   :  { %v409_v19 = vmul.f32 %v5590_v60, %v407_v18 }
 0x2f6   :  { %5346 = vmatpush3.bf16.msra.mxu1 %v6074_v16 }
 0x2f7   :  { %v422_v20 = vrot.slane %v409_v19, 6  ;;  %5353 = vmatprep.subr.bf16.mxu1 %v5915_v0 }
 0x2f9   :  { %423 = vrot.lane.b32.xlu1 %v422_v20, %s5921_s24 }
 0x36b   :  { %v424_v26 = vpop.permute.xlu1 %423 }
 0x36c   :  { %v6174_v28 = vmul.f32 %v424_v26, %v6171_v23 }
 0x36e   :  { %4970 = vmatmul.mubr.msk.f32.vlgmr.msra.gmra.mrb[6].mxu0 %vm198_vm4, %v6174_v28 }
 0x36f   :  { %5349 = vmatpush3.bf16.msra.mxu0 %v6076_v17  ;;  %4991 = vmatprep.mubr.msk.f32.mxu0 %vm5917_vm0, %v5916_v1 }
 0x370   :  { %5350 = vmatprep.subr.bf16.mxu0 %v5915_v0 }
 0x373   :  { %5352 = vmatpush3.bf16.msra.mxu0 %v6092_v21 }
 0x374   :  { %5359 = vmatprep.subr.bf16.mxu0 %v5915_v0 }
 0x3c4   :  { %v502_v29 = vpop.f32.mrb[2].mxu1 }
 0x3c5   :  { %v507_v30 = vrot.slane %v502_v29, 6  ;;  %v4960_v32 = vpop.f32.mrb[3].mxu1  ;;  %v689_v29 = vrot.slane %v6174_v28, 4 }
 0x3c7   :  { %v509_v34 = vadd.f32 %v507_v30, %v6130_v31 }
 0x3c9   :  { %5595 = vtanh.f32 %v509_v34  ;;  %v4689_v37 = vmul.f32 -1.442695, %v509_v34 }
 0x3cb   :  { %5597 = vpow2.f32 %v4689_v37 }
 0x3d3   :  { %v5596_v36 = vpop.eup %5595 }
 0x3d4   :  { %522 = vrot.lane.b32.xlu1 %v5596_v36, %s5919_s6 }
 0x3d5   :  { %v5598_v39 = vpop.eup %5597 }
 0x3d6   :  { %v513_v41 = vadd.f32 1.0, %v5598_v39 }
 0x3d8   :  { %5599 = vrcp.f32 %v513_v41 }
 0x3e2   :  { %v5600_v44 = vpop.eup %5599 }
 0x3e3   :  { %v520_v52 = vmul.f32 %v5600_v44, %v518_v50 }
 0x441   :  { %v640_v42 = vpop.f32.mrb[6].mxu0 }
 0x442   :  { %v4971_v43 = vpop.f32.mrb[7].mxu0  ;;  %v645_v51 = vrot.slane %v640_v42, 4 }
 0x444   :  { %v647_v55 = vadd.f32 %v645_v51, %v6137_v40 }
 0x446   :  { %v523_v45 = vpop.permute.xlu1 %522  ;;  %v4691_v58 = vmul.f32 -1.442695, %v647_v55 }
 0x447   :  { %v525_v46 = vmul.f32 %v5600_v44, %v523_v45 }
 0x449   :  { %527 = vrot.lane.b32.xlu0 %v525_v46, %s5921_s24 }
 0x44d   :  { %416 = vrot.lane.b32.xlu0 %v415_v47, %s5923_s1 }
 0x451   :  { %538 = vperm.xlu0 %5565, %v6148_v61  }
 0x4bb   :  { %v528_v53 = vpop.permute.xlu0 %527 }
 0x4bc   :  { %v530_v54 = vadd.f32 %v528_v53, %v520_v52 }
 0x4be   :  { %5601 = vtanh.f32 %v530_v54  ;;  %v541_v34 = vsub.f32 %v530_v54, %v518_v50 }
 0x4bf   :  { %5603 = vtanh.f32 %v647_v55  ;;  %v417_v3 = vpop.permute.xlu0 %416 }
 0x4c0   :  { %5605 = vpow2.f32 %v4691_v58  ;;  %v419_v8 = vmul.f32 %v417_v3, %v6171_v23  ;;  %v543_v37 = vrot.slane %v541_v34, 2 }
 0x4c2   :  { %v656_v14 = vrot.slane %v419_v8, 4 }
 0x4c8   :  { %v5602_v56 = vpop.eup %5601 }
 0x4c9   :  { %533 = vrot.lane.b32.xlu1 %v5602_v56, %s5919_s6  ;;  %v5604_v57 = vpop.eup %5603 }
 0x4ca   :  { %v5606_v59 = vpop.eup %5605 }
 0x4cb   :  { %v651_v60 = vadd.f32 1.0, %v5606_v59 }
 0x4cd   :  { %662 = vrot.lane.b32.xlu1 %v5604_v57, %s5919_s6  ;;  %5607 = vrcp.f32 %v651_v60 }
 0x4d0   :  { %v6203_v15 = vpop.permute.xlu0 %538 }
 0x4d7   :  { %v5608_v6 = vpop.eup %5607 }
 0x53b   :  { %v534_v62 = vpop.permute.xlu1 %533 }
 0x53c   :  { %v536_v2 = vmul.f32 %v5600_v44, %v534_v62 }
 0x53e   :  { %v555_v4 = vsub.f32 %v536_v2, %v553_v63 }
 0x53f   :  { %v663_v7 = vpop.permute.xlu1 %662 }
 0x540   :  { %v665_v11 = vmul.f32 %v5608_v6, %v663_v7  ;;  %v557_v12 = vrot.slane %v555_v4, 2 }
 0x542   :  { %558 = vrot.lane.b32.xlu1 %v557_v12, %s5921_s24  ;;  %667 = vrot.lane.b32.xlu0 %v665_v11, %s5921_s24 }
 0x546   :  { %657 = vrot.lane.b32.xlu1 %v656_v14, %s5921_s24 }
 0x5b4   :  { %v559_v18 = vpop.permute.xlu1 %558  ;;  %v668_v30 = vpop.permute.xlu0 %667 }
 0x5b5   :  { %v561_v19 = vmul.f32 %v559_v18, %v6203_v15 }
 0x5b7   :  { %563 = vrot.lane.b32.xlu1 %v561_v19, %s5923_s1 }
 0x5b8   :  { %v658_v20 = vpop.permute.xlu1 %657 }
 0x5b9   :  { %v660_v26 = vmul.f32 %v5608_v6, %v658_v20 }
 0x5bb   :  { %v670_v32 = vadd.f32 %v668_v30, %v660_v26  ;;  %690 = vrot.lane.b32.xlu1 %v689_v29, %s5923_s1 }
 0x5bd   :  { %5609 = vtanh.f32 %v670_v32  ;;  %v681_v36 = vsub.f32 %v670_v32, %v658_v20 }
 0x5bf   :  { %678 = vperm.xlu1 %5566, %v6148_v61   ;;  %v683_v39 = vrot.slane %v681_v36, 4 }
 0x5c3   :  { %544 = vrot.lane.b32.xlu1 %v543_v37, %s5923_s1 }
 0x5c7   :  { %v5610_v41 = vpop.eup %5609  ;;  %684 = vrot.lane.b32.xlu1 %v683_v39, %s5923_s1 }
 0x5c8   :  { %673 = vrot.lane.b32.xlu0 %v5610_v41, %s5919_s6  ;;  %v5925_v41 = vmov 2  }
 0x5c9   :  { %5567 = vset.pattern.permute.xlu0 %v5925_v41 }
 0x629   :  { %v564_v42 = vpop.permute.xlu1 %563 }
 0x62a   :  { %v6214_v43 = vadd.f32 %v564_v42, %v6157_v13 }
 0x62c   :  { %568 = vrot.lane.b32.xlu0 %v6214_v43, %s5921_s24 }
 0x62d   :  { %v691_v44 = vpop.permute.xlu1 %690 }
 0x63a   :  { %v674_v45 = vpop.permute.xlu0 %673 }
 0x63b   :  { %v676_v46 = vmul.f32 %v5608_v6, %v674_v45 }
 0x63d   :  { %v693_v47 = vsub.f32 %v676_v46, %v691_v44 }
 0x63e   :  { %v6218_v50 = vpop.permute.xlu1 %678 }
 0x63f   :  { %v695_v51 = vrot.slane %v693_v47, 4 }
 0x641   :  { %696 = vrot.lane.b32.xlu0 %v695_v51, %s5921_s24 }
 0x642   :  { %v545_v52 = vpop.permute.xlu1 %544 }
 0x643   :  { %v547_v53 = vmul.f32 %v545_v52, %v6203_v15  ;;  %v5926_v52 = vmov 5  }
 0x644   :  { %5568 = vset.pattern.permute.xlu1 %v5926_v52 }
 0x645   :  { %549 = vrot.lane.b32.xlu1 %v547_v53, %s5921_s24 }
 0x646   :  { %v685_v54 = vpop.permute.xlu1 %684 }
 0x647   :  { %v687_v13 = vmul.f32 %v685_v54, %v6218_v50 }
 0x649   :  { %v6224_v55 = vadd.f32 %v687_v13, %v419_v8 }
 0x64b   :  { %v928_v56 = vrot.slane %v6224_v55, 6 }
 0x64d   :  { %929 = vrot.lane.b32.xlu1 %v928_v56, %s5921_s24 }
 0x69e   :  { %v569_v57 = vpop.permute.xlu0 %568 }
 0x69f   :  { %571 = vst.msk [vmem:[#allocation2 + $0x2] sm:$0x3] %vm310_vm3, %v569_v57  ;;  %4981 = vmatmul.mubr.msk.f32.vlgmr.msra.gmra.mrb[4].mxu1 %vm198_vm4, %v569_v57 }
 0x6a0   :  { %5355 = vmatpush3.bf16.msra.mxu1 %v6056_v9  ;;  %5002 = vmatprep.mubr.msk.f32.mxu1 %vm5917_vm0, %v5916_v1 }
 0x6a1   :  { %5356 = vmatprep.subr.bf16.mxu1 %v5915_v0 }
 0x6a4   :  { %5358 = vmatpush3.bf16.msra.mxu1 %v6074_v16 }
 0x6a5   :  { %5365 = vmatprep.subr.bf16.mxu1 %v5915_v0 }
 0x6b3   :  { %v697_v58 = vpop.permute.xlu0 %696 }
 0x6b4   :  { %v699_v59 = vmul.f32 %v697_v58, %v6218_v50 }
 0x6b6   :  { %v6238_v60 = vadd.f32 %v699_v59, %v6174_v28 }
 0x6b7   :  { %v550_v42 = vpop.permute.xlu1 %549 }
 0x6b8   :  { %4992 = vmatmul.mubr.msk.f32.vlgmr.msra.gmra.mrb[8].mxu0 %vm198_vm4, %v6238_v60  ;;  %v6256_v44 = vadd.f32 %v550_v42, %v6191_v49  ;;  %v961_v54 = vrot.slane %v6238_v60, 6 }
 0x6b9   :  { %5361 = vmatpush3.bf16.msra.mxu0 %v6076_v17  ;;  %5013 = vmatprep.mubr.msk.f32.mxu0 %vm5917_vm0, %v5916_v1 }
 0x6ba   :  { %5362 = vmatprep.subr.bf16.mxu0 %v5915_v0  ;;  %v790_v45 = vrot.slane %v6256_v44, 4 }
 0x6bd   :  { %5364 = vmatpush3.bf16.msra.mxu0 %v6092_v21 }
 0x6be   :  { %5371 = vmatprep.subr.bf16.mxu0 %v5915_v0 }
 0x6bf   :  { %v930_v49 = vpop.permute.xlu1 %929 }
 0x772   :  { %v774_v62 = vpop.f32.mrb[4].mxu1 }
 0x773   :  { %v779_v63 = vrot.slane %v774_v62, 4  ;;  %v4982_v2 = vpop.f32.mrb[5].mxu1  ;;  %v825_v62 = vrot.slane %v6214_v43, 4 }
 0x775   :  { %v781_v3 = vadd.f32 %v779_v63, %v6130_v31 }
 0x777   :  { %5611 = vtanh.f32 %v781_v3  ;;  %v4693_v14 = vmul.f32 -1.442695, %v781_v3 }
 0x781   :  { %v5612_v4 = vpop.eup %5611 }
 0x782   :  { %794 = vrot.lane.b32.xlu0 %v5612_v4, %s5919_s6 }
 0x78b   :  { %v912_v6 = vpop.f32.mrb[8].mxu0 }
 0x78c   :  { %v917_v7 = vrot.slane %v912_v6, 6  ;;  %v4993_v8 = vpop.f32.mrb[9].mxu0 }
 0x78e   :  { %v919_v11 = vadd.f32 %v917_v7, %v6137_v40 }
 0x790   :  { %5613 = vtanh.f32 %v919_v11  ;;  %v4695_v20 = vmul.f32 -1.442695, %v919_v11 }
 0x791   :  { %5615 = vpow2.f32 %v4693_v14 }
 0x79a   :  { %v5614_v12 = vpop.eup %5613 }
 0x79b   :  { %934 = vrot.lane.b32.xlu0 %v5614_v12, %s5919_s6  ;;  %v5616_v18 = vpop.eup %5615 }
 0x79c   :  { %v785_v19 = vadd.f32 1.0, %v5616_v18 }
 0x79e   :  { %5617 = vrcp.f32 %v785_v19 }
 0x79f   :  { %5619 = vpow2.f32 %v4695_v20 }
 0x7a8   :  { %v5618_v26 = vpop.eup %5617 }
 0x7a9   :  { %v5620_v32 = vpop.eup %5619  ;;  %v792_v46 = vmul.f32 %v5618_v26, %v790_v45 }
 0x7aa   :  { %v923_v34 = vadd.f32 1.0, %v5620_v32 }
 0x7ac   :  { %5621 = vrcp.f32 %v923_v34 }
 0x7b6   :  { %v5622_v36 = vpop.eup %5621 }
 0x7b7   :  { %v932_v13 = vmul.f32 %v5622_v36, %v930_v49 }
 0x7f4   :  { %v795_v29 = vpop.permute.xlu0 %794 }
 0x7f5   :  { %v797_v30 = vmul.f32 %v5618_v26, %v795_v29 }
 0x7f7   :  { %799 = vrot.lane.b32.xlu0 %v797_v30, %s5921_s24 }
 0x80d   :  { %v935_v37 = vpop.permute.xlu0 %934 }
 0x80e   :  { %v937_v39 = vmul.f32 %v5622_v36, %v935_v37 }
 0x810   :  { %939 = vrot.lane.b32.xlu0 %v937_v39, %s5921_s24 }
 0x869   :  { %v800_v47 = vpop.permute.xlu0 %799 }
 0x86a   :  { %v6261_v51 = vadd.f32 %v800_v47, %v792_v46 }
 0x86c   :  { %5623 = vtanh.f32 %v6261_v51 }
 0x876   :  { %v5624_v53 = vpop.eup %5623 }
 0x877   :  { %805 = vrot.lane.b32.xlu1 %v5624_v53, %s5919_s6  ;;  %v5927_v53 = vmov 4  }
 0x87b   :  { %962 = vrot.lane.b32.xlu1 %v961_v54, %s5923_s1  ;;  %v813_v54 = vsub.f32 %v6261_v51, %v790_v45 }
 0x882   :  { %v940_v56 = vpop.permute.xlu0 %939 }
 0x883   :  { %v942_v57 = vadd.f32 %v940_v56, %v932_v13  ;;  %v815_v13 = vrot.slane %v813_v54, 4 }
 0x885   :  { %5625 = vtanh.f32 %v942_v57  ;;  %v953_v18 = vsub.f32 %v942_v57, %v930_v49 }
 0x887   :  { %v955_v20 = vrot.slane %v953_v18, 2 }
 0x88f   :  { %v5626_v58 = vpop.eup %5625 }
 0x890   :  { %945 = vrot.lane.b32.xlu0 %v5626_v58, %s5919_s6 }
 0x894   :  { %810 = vperm.xlu0 %5567, %v6148_v61  }
 0x8e9   :  { %v806_v59 = vpop.permute.xlu1 %805 }
 0x8ea   :  { %v808_v63 = vmul.f32 %v5618_v26, %v806_v59 }
 0x8ec   :  { %v827_v2 = vsub.f32 %v808_v63, %v825_v62 }
 0x8ed   :  { %v963_v7 = vpop.permute.xlu1 %962 }
 0x8ee   :  { %v829_v3 = vrot.slane %v827_v2, 4 }
 0x8f0   :  { %830 = vrot.lane.b32.xlu1 %v829_v3, %s5921_s24 }
 0x8f4   :  { %950 = vperm.xlu1 %5568, %v6148_v61  }
 0x8f8   :  { %5569 = vset.pattern.permute.xlu1 %v5927_v53 }
 0x902   :  { %v946_v4 = vpop.permute.xlu0 %945 }
 0x903   :  { %v948_v6 = vmul.f32 %v5622_v36, %v946_v4 }
 0x905   :  { %v965_v8 = vsub.f32 %v948_v6, %v963_v7 }
 0x907   :  { %v967_v11 = vrot.slane %v965_v8, 2 }
 0x909   :  { %968 = vrot.lane.b32.xlu0 %v967_v11, %s5921_s24 }
 0x913   :  { %v6274_v12 = vpop.permute.xlu0 %810 }
 0x962   :  { %v831_v14 = vpop.permute.xlu1 %830 }
 0x963   :  { %v833_v19 = vmul.f32 %v831_v14, %v6274_v12 }
 0x965   :  { %835 = vrot.lane.b32.xlu1 %v833_v19, %s5923_s1 }
 0x969   :  { %956 = vrot.lane.b32.xlu1 %v955_v20, %s5923_s1 }
 0x973   :  { %v6279_v26 = vpop.permute.xlu1 %950 }
 0x97b   :  { %v969_v29 = vpop.permute.xlu0 %968 }
 0x97c   :  { %v971_v30 = vmul.f32 %v969_v29, %v6279_v26 }
 0x97e   :  { %v6283_v32 = vadd.f32 %v971_v30, %v6238_v60 }
 0x980   :  { %5014 = vmatmul.mubr.msk.f32.vlgmr.msra.gmra.mrb[10].mxu0 %vm198_vm4, %v6283_v32 }
 0x981   :  { %5373 = vmatpush3.bf16.msra.mxu0 %v6076_v17  ;;  %5035 = vmatprep.mubr.msk.f32.mxu0 %vm5917_vm0, %v5916_v1 }
 0x982   :  { %5374 = vmatprep.subr.bf16.mxu0 %v5915_v0 }
 0x985   :  { %5376 = vmatpush3.bf16.msra.mxu0 %v6092_v21 }
 0x986   :  { %5383 = vmatprep.subr.bf16.mxu0 %v5915_v0 }
 0x9d7   :  { %v836_v34 = vpop.permute.xlu1 %835 }
 0x9d8   :  { %v6294_v36 = vadd.f32 %v836_v34, %v6214_v43  ;;  %v5928_v34 = vmov 3  }
 0x9d9   :  { %5570 = vset.pattern.permute.xlu0 %v5928_v34 }
 0x9da   :  { %840 = vrot.lane.b32.xlu0 %v6294_v36, %s5921_s24 }
 0x9db   :  { %v957_v37 = vpop.permute.xlu1 %956 }
 0x9dc   :  { %v959_v39 = vmul.f32 %v957_v37, %v6279_v26 }
 0x9de   :  { %v6300_v42 = vadd.f32 %v959_v39, %v6224_v55 }
 0x9e0   :  { %1197 = vrot.lane.b32.xlu1 %v6300_v42, %s5921_s24 }
 0xa4c   :  { %v841_v46 = vpop.permute.xlu0 %840 }
 0xa4d   :  { %843 = vst.msk [vmem:[#allocation2 + $0x4] sm:$0x3] %vm310_vm3, %v841_v46  ;;  %5003 = vmatmul.mubr.msk.f32.vlgmr.msra.gmra.mrb[6].mxu1 %vm198_vm4, %v841_v46 }
 0xa4e   :  { %5367 = vmatpush3.bf16.msra.mxu1 %v6056_v9  ;;  %5024 = vmatprep.mubr.msk.f32.mxu1 %vm5917_vm0, %v5916_v1 }
 0xa4f   :  { %5368 = vmatprep.subr.bf16.mxu1 %v5915_v0 }
 0xa52   :  { %5370 = vmatpush3.bf16.msra.mxu1 %v6074_v16  ;;  %v1198_v11 = vpop.permute.xlu1 %1197 }
 0xa53   :  { %v1184_v43 = vpop.f32.mrb[10].mxu0  ;;  %5377 = vmatprep.subr.bf16.mxu1 %v5915_v0 }
 0xa54   :  { %v1188_v55 = vadd.f32 %v1184_v43, %v6137_v40  ;;  %v5015_v47 = vpop.f32.mrb[11].mxu0 }
 0xa56   :  { %5627 = vtanh.f32 %v1188_v55  ;;  %v4699_v56 = vmul.f32 -1.442695, %v1188_v55 }
 0xa58   :  { %5629 = vpow2.f32 %v4699_v56 }
 0xa60   :  { %v5628_v49 = vpop.eup %5627 }
 0xa61   :  { %1202 = vrot.lane.b32.xlu0 %v5628_v49, %s5919_s6 }
 0xa62   :  { %v5630_v57 = vpop.eup %5629 }
 0xa63   :  { %v1192_v58 = vadd.f32 1.0, %v5630_v57 }
 0xa65   :  { %816 = vrot.lane.b32.xlu0 %v815_v13, %s5923_s1  ;;  %5631 = vrcp.f32 %v1192_v58 }
 0xa6f   :  { %v5632_v40 = vpop.eup %5631 }
 0xa70   :  { %v1200_v19 = vmul.f32 %v5632_v40, %v1198_v11 }
 0xad3   :  { %v1203_v59 = vpop.permute.xlu0 %1202 }
 0xad4   :  { %v1205_v62 = vmul.f32 %v5632_v40, %v1203_v59 }
 0xad6   :  { %1207 = vrot.lane.b32.xlu1 %v1205_v62, %s5921_s24 }
 0xad7   :  { %v817_v63 = vpop.permute.xlu0 %816 }
 0xad8   :  { %v819_v2 = vmul.f32 %v817_v63, %v6274_v12 }
 0xada   :  { %821 = vrot.lane.b32.xlu1 %v819_v2, %s5921_s24 }
 0xade   :  { %1218 = vperm.xlu1 %5569, %v6148_v61  }
 0xae2   :  { %1228 = vrot.lane.b32.xlu1 %v6283_v32, %s5923_s1 }
 0xae3   :  { %5571 = vset.pattern.permute.xlu1 %v5918_v22 }
 0xb20   :  { %v1046_v45 = vpop.f32.mrb[6].mxu1 }
 0xb21   :  { %v1051_v51 = vrot.slane %v1046_v45, 2  ;;  %v5004_v3 = vpop.f32.mrb[7].mxu1 }
 0xb23   :  { %v1053_v4 = vadd.f32 %v1051_v51, %v6130_v31 }
 0xb25   :  { %5633 = vtanh.f32 %v1053_v4  ;;  %v4697_v7 = vmul.f32 -1.442695, %v1053_v4 }
 0xb27   :  { %5635 = vpow2.f32 %v4697_v7 }
 0xb2f   :  { %v5634_v6 = vpop.eup %5633 }
 0xb30   :  { %1066 = vrot.lane.b32.xlu0 %v5634_v6, %s5919_s6 }
 0xb31   :  { %v5636_v8 = vpop.eup %5635 }
 0xb32   :  { %v1057_v14 = vadd.f32 1.0, %v5636_v8 }
 0xb34   :  { %5637 = vrcp.f32 %v1057_v14 }
 0xb3e   :  { %v5638_v22 = vpop.eup %5637 }
 0xb48   :  { %v1208_v18 = vpop.permute.xlu1 %1207 }
 0xb49   :  { %v1210_v20 = vadd.f32 %v1208_v18, %v1200_v19 }
 0xb4b   :  { %5639 = vtanh.f32 %v1210_v20  ;;  %v1221_v7 = vsub.f32 %v1210_v20, %v1198_v11 }
 0xb4c   :  { %v822_v37 = vpop.permute.xlu1 %821 }
 0xb4d   :  { %v6331_v39 = vadd.f32 %v822_v37, %v6256_v44 }
 0xb4f   :  { %v1062_v46 = vrot.slane %v6331_v39, 2 }
 0xb51   :  { %v1064_v43 = vmul.f32 %v5638_v22, %v1062_v46 }
 0xb55   :  { %v5640_v31 = vpop.eup %5639 }
 0xb5d   :  { %v6336_v55 = vpop.permute.xlu1 %1218 }
 0xb5e   :  { %v1222_v8 = vmul.f32 %v1221_v7, %v6336_v55 }
 0xb61   :  { %v1229_v56 = vpop.permute.xlu1 %1228 }
 0xba2   :  { %v1067_v29 = vpop.permute.xlu0 %1066 }
 0xba3   :  { %v1069_v30 = vmul.f32 %v5638_v22, %v1067_v29 }
 0xba5   :  { %1071 = vrot.lane.b32.xlu0 %v1069_v30, %s5921_s24 }
 0xba9   :  { %1213 = vrot.lane.b32.xlu0 %v5640_v31, %s5919_s6 }
 0xc17   :  { %v1072_v47 = vpop.permute.xlu0 %1071 }
 0xc18   :  { %v6338_v54 = vadd.f32 %v1072_v47, %v1064_v43 }
 0xc1a   :  { %5641 = vtanh.f32 %v6338_v54 }
 0xc1b   :  { %v1214_v49 = vpop.permute.xlu0 %1213 }
 0xc1c   :  { %v1216_v13 = vmul.f32 %v5632_v40, %v1214_v49  ;;  %v1097_v40 = vrot.slane %v6294_v36, 2 }
 0xc1e   :  { %v1231_v57 = vsub.f32 %v1216_v13, %v1229_v56 }
 0xc20   :  { %v1232_v58 = vmul.f32 %v1231_v57, %v6336_v55 }
 0xc22   :  { %1234 = vrot.lane.b32.xlu0 %v1232_v58, %s5921_s24 }
 0xc24   :  { %v5642_v44 = vpop.eup %5641 }
 0xc25   :  { %1077 = vrot.lane.b32.xlu1 %v5642_v44, %s5919_s6 }
 0xc26   :  { %1082 = vperm.xlu0 %5570, %v6148_v61  }
 0xc94   :  { %v1235_v59 = vpop.permute.xlu0 %1234 }
 0xc95   :  { %v6346_v62 = vadd.f32 %v1235_v59, %v6283_v32 }
 0xc97   :  { %v1078_v63 = vpop.permute.xlu1 %1077  ;;  %5036 = vmatmul.mubr.msk.f32.vlgmr.msra.gmra.mrb[12].mxu0 %vm198_vm4, %v6346_v62  ;;  %v1464_v56 = vrot.slane %v6346_v62, 2 }
 0xc98   :  { %v1080_v2 = vmul.f32 %v5638_v22, %v1078_v63  ;;  %5385 = vmatpush3.bf16.msra.mxu0 %v6076_v17  ;;  %5057 = vmatprep.mubr.msk.f32.mxu0 %vm5917_vm0, %v5916_v1  ;;  %v1085_v63 = vsub.f32 %v6338_v54, %v1062_v46 }
 0xc99   :  { %5386 = vmatprep.subr.bf16.mxu0 %v5915_v0 }
 0xc9a   :  { %v1099_v45 = vsub.f32 %v1080_v2, %v1097_v40  ;;  %v1087_v2 = vrot.slane %v1085_v63, 6 }
 0xc9c   :  { %v1101_v51 = vrot.slane %v1099_v45, 6  ;;  %5388 = vmatpush3.bf16.msra.mxu0 %v6092_v21 }
 0xc9d   :  { %5395 = vmatprep.subr.bf16.mxu0 %v5915_v0 }
 0xc9e   :  { %1102 = vrot.lane.b32.xlu1 %v1101_v51, %s5921_s24 }
 0xca5   :  { %v6358_v3 = vpop.permute.xlu0 %1082 }
 0xd10   :  { %v1103_v4 = vpop.permute.xlu1 %1102 }
 0xd11   :  { %v1105_v6 = vmul.f32 %v1103_v4, %v6358_v3 }
 0xd13   :  { %1107 = vrot.lane.b32.xlu1 %v1105_v6, %s5923_s1 }
 0xd17   :  { %1224 = vrot.lane.b32.xlu1 %v1222_v8, %s5923_s1 }
 0xd6a   :  { %v1419_v14 = vpop.f32.mrb[12].mxu0 }
 0xd6b   :  { %v5037_v18 = vpop.f32.mrb[13].mxu0  ;;  %v1424_v19 = vrot.slane %v1419_v14, 2 }
 0xd6d   :  { %v1426_v22 = vadd.f32 %v1424_v19, %v6132_v33 }
 0xd6f   :  { %5643 = vtanh.f32 %v1426_v22  ;;  %v4703_v37 = vmul.f32 -1.442695, %v1426_v22 }
 0xd71   :  { %5645 = vpow2.f32 %v4703_v37 }
 0xd79   :  { %v5644_v34 = vpop.eup %5643 }
 0xd7b   :  { %v5646_v43 = vpop.eup %5645 }
 0xd7c   :  { %v1430_v47 = vadd.f32 1.0, %v5646_v43 }
 0xd7e   :  { %5647 = vrcp.f32 %v1430_v47 }
 0xd85   :  { %v1108_v29 = vpop.permute.xlu1 %1107 }
 0xd86   :  { %v6366_v30 = vadd.f32 %v1108_v29, %v6294_v36 }
 0xd88   :  { %1112 = vrot.lane.b32.xlu0 %v6366_v30, %s5921_s24 }
 0xd89   :  { %v1225_v11 = vpop.permute.xlu1 %1224 }
 0xd8a   :  { %v6371_v20 = vadd.f32 %v1225_v11, %v6300_v42  ;;  %v5648_v42 = vpop.eup %5647 }
 0xd8c   :  { %v1435_v31 = vrot.slane %v6371_v20, 2  ;;  %1441 = vrot.lane.b32.xlu0 %v5644_v34, %s5919_s6 }
 0xd8e   :  { %1436 = vrot.lane.b32.xlu1 %v1435_v31, %s5921_s24 }
 0xdfa   :  { %v1113_v36 = vpop.permute.xlu0 %1112 }
 0xdfb   :  { %1115 = vst.msk [vmem:[#allocation2 + $0x6] sm:$0x3] %vm310_vm3, %v1113_v36  ;;  %5025 = vmatmul.mubr.msk.f32.vlgmr.msra.gmra.mrb[8].mxu1 %vm198_vm4, %v1113_v36 }
 0xdfc   :  { %5379 = vmatpush3.bf16.msra.mxu1 %v6056_v9  ;;  %5046 = vmatprep.mubr.msk.f32.mxu1 %vm5917_vm0, %v5916_v1 }
 0xdfd   :  { %5380 = vmatprep.subr.bf16.mxu1 %v5915_v0 }
 0xdfe   :  { %v1442_v49 = vpop.permute.xlu0 %1441 }
 0xdff   :  { %v1444_v13 = vmul.f32 %v5648_v42, %v1442_v49 }
 0xe00   :  { %5382 = vmatpush3.bf16.msra.mxu1 %v6074_v16  ;;  %v1437_v57 = vpop.permute.xlu1 %1436 }
 0xe01   :  { %1446 = vrot.lane.b32.xlu0 %v1444_v13, %s5921_s24  ;;  %5389 = vmatprep.subr.bf16.mxu1 %v5915_v0  ;;  %v1439_v58 = vmul.f32 %v5648_v42, %v1437_v57 }
 0xe05   :  { %1465 = vrot.lane.b32.xlu0 %v1464_v56, %s5923_s1 }
 0xe73   :  { %v1447_v44 = vpop.permute.xlu0 %1446 }
 0xe74   :  { %v1449_v59 = vadd.f32 %v1447_v44, %v1439_v58 }
 0xe76   :  { %5649 = vtanh.f32 %v1449_v59  ;;  %v1456_v44 = vsub.f32 %v1449_v59, %v1437_v57 }
 0xe77   :  { %v1466_v14 = vpop.permute.xlu0 %1465 }
 0xe80   :  { %v5650_v40 = vpop.eup %5649 }
 0xe81   :  { %1452 = vrot.lane.b32.xlu1 %v5650_v40, %s5919_s6  ;;  %v1458_v40 = vrot.slane %v1456_v44, 6 }
 0xe85   :  { %1088 = vrot.lane.b32.xlu1 %v1087_v2, %s5923_s1 }
 0xece   :  { %v1311_v45 = vpop.f32.mrb[8].mxu1 }
 0xecf   :  { %v1315_v51 = vadd.f32 %v1311_v45, %v6135_v38  ;;  %v5026_v4 = vpop.f32.mrb[9].mxu1 }
 0xed1   :  { %5651 = vtanh.f32 %v1315_v51  ;;  %v4701_v22 = vmul.f32 -1.442695, %v1315_v51 }
 0xed3   :  { %5653 = vpow2.f32 %v4701_v22 }
 0xedb   :  { %v5652_v6 = vpop.eup %5651 }
 0xedc   :  { %1325 = vrot.lane.b32.xlu0 %v5652_v6, %s5919_s6 }
 0xedd   :  { %v5654_v29 = vpop.eup %5653 }
 0xede   :  { %v1319_v11 = vadd.f32 1.0, %v5654_v29 }
 0xee0   :  { %5655 = vrcp.f32 %v1319_v11 }
 0xeea   :  { %v5656_v34 = vpop.eup %5655 }
 0xef3   :  { %v1453_v7 = vpop.permute.xlu1 %1452 }
 0xef4   :  { %v1455_v8 = vmul.f32 %v5648_v42, %v1453_v7 }
 0xef6   :  { %v1468_v18 = vsub.f32 %v1455_v8, %v1466_v14 }
 0xef7   :  { %v1089_v19 = vpop.permute.xlu1 %1088 }
 0xef8   :  { %v1091_v46 = vmul.f32 %v1089_v19, %v6358_v3  ;;  %v1470_v54 = vrot.slane %v1468_v18, 6 }
 0xefa   :  { %1471 = vrot.lane.b32.xlu1 %v1470_v54, %s5921_s24  ;;  %1093 = vrot.lane.b32.xlu0 %v1091_v46, %s5921_s24 }
 0xf4e   :  { %v1326_v31 = vpop.permute.xlu0 %1325 }
 0xf4f   :  { %v1328_v37 = vmul.f32 %v5656_v34, %v1326_v31 }
 0xf51   :  { %1330 = vrot.lane.b32.xlu1 %v1328_v37, %s5921_s24 }
 0xf6c   :  { %v1472_v43 = vpop.permute.xlu1 %1471  ;;  %v1094_v42 = vpop.permute.xlu0 %1093 }
 0xf6d   :  { %v1474_v47 = vmul.f32 %v1472_v43, %v6358_v3  ;;  %v6411_v49 = vadd.f32 %v1094_v42, %v6331_v39 }
 0xf6f   :  { %v6400_v36 = vadd.f32 %v1474_v47, %v6346_v62  ;;  %v1323_v13 = vmul.f32 %v5656_v34, %v6411_v49 }
 0xf71   :  { %5058 = vmatmul.mubr.msk.f32.vlgmr.msra.gmra.mrb[14].mxu0 %vm198_vm4, %v6400_v36  ;;  %v1728_v31 = vrot.slane %v6400_v36, 4 }
 0xf72   :  { %5397 = vmatpush3.bf16.msra.mxu0 %v6076_v17  ;;  %5079 = vmatprep.mubr.msk.f32.mxu0 %vm5917_vm0, %v5916_v1 }
 0xf73   :  { %5398 = vmatprep.subr.bf16.mxu0 %v5915_v0 }
 0xf76   :  { %5400 = vmatpush3.bf16.msra.mxu0 %v6092_v21 }
 0xf77   :  { %5407 = vmatprep.subr.bf16.mxu0 %v5915_v0 }
 0xfc3   :  { %v1331_v56 = vpop.permute.xlu1 %1330 }
 0xfc4   :  { %v6414_v58 = vadd.f32 %v1331_v56, %v1323_v13 }
 0xfc6   :  { %5657 = vtanh.f32 %v6414_v58 }
 0xfd0   :  { %v5658_v63 = vpop.eup %5657 }
 0xfd1   :  { %1336 = vrot.lane.b32.xlu0 %v5658_v63, %s5919_s6 }
 0xfd5   :  { %1459 = vrot.lane.b32.xlu0 %v1458_v40, %s5923_s1 }
0x1043   :  { %v1337_v2 = vpop.permute.xlu0 %1336 }
0x1044   :  { %v1339_v45 = vmul.f32 %v5656_v34, %v1337_v2  ;;  %v1683_v51 = vpop.f32.mrb[14].mxu0 }
0x1045   :  { %v1688_v4 = vrot.slane %v1683_v51, 4  ;;  %v5059_v39 = vpop.f32.mrb[15].mxu0 }
0x1046   :  { %v1343_v6 = vsub.f32 %v1339_v45, %v6366_v30 }
0x1047   :  { %v1690_v7 = vadd.f32 %v1688_v4, %v6132_v33  ;;  %v1460_v8 = vpop.permute.xlu0 %1459 }
0x1048   :  { %v1344_v14 = vmul.f32 %v1343_v6, %v6336_v55  ;;  %v1462_v57 = vmul.f32 %v1460_v8, %v6358_v3 }
0x1049   :  { %5659 = vtanh.f32 %v1690_v7  ;;  %v4707_v54 = vmul.f32 -1.442695, %v1690_v7 }
0x104a   :  { %v6424_v59 = vadd.f32 %v1462_v57, %v6371_v20  ;;  %v6427_v18 = vadd.f32 %v1344_v14, %v6366_v30 }
0x104b   :  { %5661 = vpow2.f32 %v4707_v54 }
0x104c   :  { %1347 = vrot.lane.b32.xlu1 %v6427_v18, %s5921_s24  ;;  %v1699_v19 = vrot.slane %v6424_v59, 4 }
0x104e   :  { %1700 = vrot.lane.b32.xlu0 %v1699_v19, %s5921_s24 }
0x1053   :  { %v5660_v46 = vpop.eup %5659 }
0x1054   :  { %1705 = vrot.lane.b32.xlu1 %v5660_v46, %s5919_s6 }
0x1055   :  { %v5662_v22 = vpop.eup %5661 }
0x1056   :  { %v1694_v29 = vadd.f32 1.0, %v5662_v22 }
0x1058   :  { %5663 = vrcp.f32 %v1694_v29 }
0x1062   :  { %v5664_v30 = vpop.eup %5663 }
0x10be   :  { %v6434_v20 = vpop.permute.xlu1 %1347 }
0x10bf   :  { %5047 = vmatmul.mubr.msk.f32.vlgmr.msra.gmra.mrb[10].mxu1 %vm198_vm4, %v6434_v20 }
0x10c0   :  { %5391 = vmatpush3.bf16.msra.mxu1 %v6056_v9  ;;  %5068 = vmatprep.mubr.msk.f32.mxu1 %vm5917_vm0, %v5916_v1  ;;  %v1701_v37 = vpop.permute.xlu0 %1700 }
0x10c1   :  { %5392 = vmatprep.subr.bf16.mxu1 %v5915_v0  ;;  %v1703_v43 = vmul.f32 %v5664_v30, %v1701_v37 }
0x10c4   :  { %5394 = vmatpush3.bf16.msra.mxu1 %v6074_v16 }
0x10c5   :  { %5401 = vmatprep.subr.bf16.mxu1 %v5915_v0 }
0x10c6   :  { %v1706_v11 = vpop.permute.xlu1 %1705 }
0x10c7   :  { %v1708_v34 = vmul.f32 %v5664_v30, %v1706_v11 }
0x10c9   :  { %1710 = vrot.lane.b32.xlu1 %v1708_v34, %s5921_s24 }
0x10cd   :  { %1729 = vrot.lane.b32.xlu1 %v1728_v31, %s5923_s1 }
0x113b   :  { %v1711_v47 = vpop.permute.xlu1 %1710 }
0x113c   :  { %v1713_v42 = vadd.f32 %v1711_v47, %v1703_v43 }
0x113e   :  { %5665 = vtanh.f32 %v1713_v42 }
0x113f   :  { %v1730_v4 = vpop.permute.xlu1 %1729 }
0x1148   :  { %v5666_v13 = vpop.eup %5665 }
0x1149   :  { %1716 = vrot.lane.b32.xlu0 %v5666_v13, %s5919_s6 }
0x1192   :  { %v1549_v56 = vpop.f32.mrb[10].mxu1 }
0x1193   :  { %v1554_v44 = vrot.slane %v1549_v56, 6  ;;  %v5048_v63 = vpop.f32.mrb[11].mxu1  ;;  %v1596_v56 = vrot.slane %v6427_v18, 6 }
0x1195   :  { %v1556_v40 = vadd.f32 %v1554_v44, %v6135_v38 }
0x1197   :  { %5667 = vtanh.f32 %v1556_v40  ;;  %v4705_v7 = vmul.f32 -1.442695, %v1556_v40 }
0x1199   :  { %5669 = vpow2.f32 %v4705_v7 }
0x11a1   :  { %v5668_v2 = vpop.eup %5667 }
0x11a2   :  { %1569 = vrot.lane.b32.xlu0 %v5668_v2, %s5919_s6  ;;  %v1720_v2 = vsub.f32 %v1713_v42, %v1701_v37 }
0x11a3   :  { %v5670_v8 = vpop.eup %5669 }
0x11a4   :  { %v1560_v14 = vadd.f32 1.0, %v5670_v8 }
0x11a6   :  { %5671 = vrcp.f32 %v1560_v14 }
0x11b0   :  { %v5672_v57 = vpop.eup %5671 }
0x11bb   :  { %v1717_v45 = vpop.permute.xlu0 %1716 }
0x11bc   :  { %v1719_v51 = vmul.f32 %v5664_v30, %v1717_v45  ;;  %v1340_v30 = vsub.f32 %v6414_v58, %v6411_v49 }
0x11be   :  { %v1732_v39 = vsub.f32 %v1719_v51, %v1730_v4  ;;  %v1341_v11 = vmul.f32 %v1340_v30, %v6336_v55 }
0x11c0   :  { %v1734_v6 = vrot.slane %v1732_v39, 4  ;;  %v6468_v34 = vadd.f32 %v1341_v11, %v6411_v49  ;;  %v1722_v49 = vrot.slane %v1720_v2, 4 }
0x11c2   :  { %1735 = vrot.lane.b32.xlu1 %v1734_v6, %s5921_s24  ;;  %v1565_v31 = vrot.slane %v6468_v34, 6 }
0x1214   :  { %v1570_v19 = vpop.permute.xlu0 %1569 }
0x1215   :  { %v1572_v46 = vmul.f32 %v5672_v57, %v1570_v19 }
0x1217   :  { %1574 = vrot.lane.b32.xlu0 %v1572_v46, %s5921_s24 }
0x1234   :  { %v1736_v54 = vpop.permute.xlu1 %1735 }
0x1235   :  { %v1738_v22 = vmul.f32 %v1736_v54, %v6274_v12 }
0x1237   :  { %v6454_v29 = vadd.f32 %v1738_v22, %v6400_v36 }
0x1239   :  { %5080 = vmatmul.mubr.msk.f32.vlgmr.msra.gmra.mrb[16].mxu0 %vm198_vm4, %v6454_v29 }
0x123a   :  { %5409 = vmatpush3.bf16.msra.mxu0 %v6076_v17  ;;  %5101 = vmatprep.mubr.msk.f32.mxu0 %vm5917_vm0, %v5916_v1  ;;  %v1567_v17 = vmul.f32 %v5672_v57, %v1565_v31 }
0x123b   :  { %5410 = vmatprep.subr.bf16.mxu0 %v5915_v0 }
0x123e   :  { %5412 = vmatpush3.bf16.msra.mxu0 %v6092_v21 }
0x123f   :  { %5429 = vmatprep.subr.bf16.mxu0 %v5915_v0 }
0x1289   :  { %v1575_v43 = vpop.permute.xlu0 %1574 }
0x128a   :  { %v1577_v47 = vadd.f32 %v1575_v43, %v1567_v17  ;;  %v1992_v43 = vrot.slane %v6454_v29, 6 }
0x128c   :  { %5673 = vtanh.f32 %v1577_v47  ;;  %v1584_v17 = vsub.f32 %v1577_v47, %v1565_v31 }
0x1296   :  { %v5674_v13 = vpop.eup %5673 }
0x1297   :  { %1580 = vrot.lane.b32.xlu1 %v5674_v13, %s5919_s6  ;;  %v1586_v13 = vrot.slane %v1584_v17, 2 }
0x1309   :  { %v1581_v21 = vpop.permute.xlu1 %1580 }
0x130a   :  { %v1583_v44 = vmul.f32 %v5672_v57, %v1581_v21 }
0x130c   :  { %v1598_v63 = vsub.f32 %v1583_v44, %v1596_v56  ;;  %v1947_v58 = vpop.f32.mrb[16].mxu0 }
0x130d   :  { %v5081_v40 = vpop.f32.mrb[17].mxu0  ;;  %v1952_v51 = vrot.slane %v1947_v58, 6 }
0x130e   :  { %v1600_v45 = vrot.slane %v1598_v63, 2 }
0x130f   :  { %v1954_v4 = vadd.f32 %v1952_v51, %v6132_v33 }
0x1310   :  { %1601 = vrot.lane.b32.xlu0 %v1600_v45, %s5921_s24 }
0x1311   :  { %5675 = vtanh.f32 %v1954_v4  ;;  %v4711_v57 = vmul.f32 -1.442695, %v1954_v4 }
0x1313   :  { %5677 = vpow2.f32 %v4711_v57 }
0x1314   :  { %1723 = vrot.lane.b32.xlu0 %v1722_v49, %s5923_s1 }
0x131b   :  { %v5676_v14 = vpop.eup %5675 }
0x131d   :  { %v5678_v19 = vpop.eup %5677 }
0x131e   :  { %v1958_v46 = vadd.f32 1.0, %v5678_v19 }
0x1320   :  { %5679 = vrcp.f32 %v1958_v46 }
0x1382   :  { %v1602_v39 = vpop.permute.xlu0 %1601 }
0x1383   :  { %v1604_v6 = vmul.f32 %v1602_v39, %v6279_v26 }
0x1385   :  { %1606 = vrot.lane.b32.xlu1 %v1604_v6, %s5923_s1 }
0x1386   :  { %v1724_v7 = vpop.permute.xlu0 %1723 }
0x1387   :  { %v1726_v8 = vmul.f32 %v1724_v7, %v6274_v12 }
0x1389   :  { %v6480_v37 = vadd.f32 %v1726_v8, %v6424_v59  ;;  %1969 = vrot.lane.b32.xlu1 %v5676_v14, %s5919_s6  ;;  %v5680_v59 = vpop.eup %5679 }
0x138b   :  { %v1963_v42 = vrot.slane %v6480_v37, 6 }
0x138d   :  { %1964 = vrot.lane.b32.xlu1 %v1963_v42, %s5921_s24 }
0x13f7   :  { %v1607_v54 = vpop.permute.xlu1 %1606 }
0x13f8   :  { %v6486_v22 = vadd.f32 %v1607_v54, %v6427_v18 }
0x13fa   :  { %1611 = vrot.lane.b32.xlu0 %v6486_v22, %s5921_s24 }
0x13fb   :  { %v1970_v30 = vpop.permute.xlu1 %1969 }
0x13fc   :  { %v1972_v11 = vmul.f32 %v5680_v59, %v1970_v30 }
0x13fe   :  { %1974 = vrot.lane.b32.xlu0 %v1972_v11, %s5921_s24 }
0x13ff   :  { %v1965_v21 = vpop.permute.xlu1 %1964 }
0x1400   :  { %v1967_v18 = vmul.f32 %v5680_v59, %v1965_v21 }
0x1402   :  { %1993 = vrot.lane.b32.xlu0 %v1992_v43, %s5923_s1 }
0x1406   :  { %1587 = vrot.lane.b32.xlu0 %v1586_v13, %s5923_s1 }
0x146c   :  { %v6494_v56 = vpop.permute.xlu0 %1611 }
0x146d   :  { %5069 = vmatmul.mubr.msk.f32.vlgmr.msra.gmra.mrb[12].mxu1 %vm198_vm4, %v6494_v56 }
0x146e   :  { %5403 = vmatpush3.bf16.msra.mxu1 %v6056_v9  ;;  %5090 = vmatprep.mubr.msk.f32.mxu1 %vm5917_vm0, %v5916_v1 }
0x146f   :  { %5404 = vmatprep.subr.bf16.mxu1 %v5915_v0 }
0x1470   :  { %v1975_v31 = vpop.permute.xlu0 %1974 }
0x1471   :  { %v1977_v47 = vadd.f32 %v1975_v31, %v1967_v18 }
0x1472   :  { %5406 = vmatpush3.bf16.msra.mxu1 %v6074_v16 }
0x1473   :  { %5681 = vtanh.f32 %v1977_v47 }
0x1474   :  { %v1994_v44 = vpop.permute.xlu0 %1993 }
0x1478   :  { %v1588_v63 = vpop.permute.xlu0 %1587 }
0x1479   :  { %v1590_v58 = vmul.f32 %v1588_v63, %v6279_v26 }
0x147b   :  { %1592 = vrot.lane.b32.xlu0 %v1590_v58, %s5921_s24 }
0x147d   :  { %v5682_v40 = vpop.eup %5681 }
0x147e   :  { %1980 = vrot.lane.b32.xlu1 %v5682_v40, %s5919_s6 }
0x14ed   :  { %v1593_v17 = vpop.permute.xlu0 %1592 }
0x14ee   :  { %v6520_v43 = vadd.f32 %v1593_v17, %v6468_v34 }
0x14f0   :  { %v1981_v9 = vpop.permute.xlu1 %1980  ;;  %v1829_v13 = vrot.slane %v6520_v43, 4 }
0x14f1   :  { %v1983_v2 = vmul.f32 %v5680_v59, %v1981_v9  ;;  %v1984_v59 = vsub.f32 %v1977_v47, %v1965_v21 }
0x14f3   :  { %v1996_v45 = vsub.f32 %v1983_v2, %v1994_v44  ;;  %v1986_v11 = vrot.slane %v1984_v59, 2 }
0x14f5   :  { %v1998_v49 = vrot.slane %v1996_v45, 2 }
0x14f7   :  { %1999 = vrot.lane.b32.xlu1 %v1998_v49, %s5921_s24 }
0x1540   :  { %v1813_v51 = vpop.f32.mrb[12].mxu1 }
0x1541   :  { %v1818_v4 = vrot.slane %v1813_v51, 4  ;;  %v5070_v39 = vpop.f32.mrb[13].mxu1 }
0x1543   :  { %v1820_v16 = vadd.f32 %v1818_v4, %v6135_v38  ;;  %v1860_v4 = vrot.slane %v6486_v22, 4 }
0x1545   :  { %5683 = vtanh.f32 %v1820_v16  ;;  %v4709_v42 = vmul.f32 -1.442695, %v1820_v16 }
0x1547   :  { %5685 = vpow2.f32 %v4709_v42 }
0x154f   :  { %v5684_v6 = vpop.eup %5683 }
0x1550   :  { %1833 = vrot.lane.b32.xlu1 %v5684_v6, %s5919_s6 }
0x1551   :  { %v5686_v57 = vpop.eup %5685 }
0x1552   :  { %v1824_v19 = vadd.f32 1.0, %v5686_v57 }
0x1554   :  { %5687 = vrcp.f32 %v1824_v19 }
0x155e   :  { %v5688_v46 = vpop.eup %5687 }
0x155f   :  { %v1831_v18 = vmul.f32 %v5688_v46, %v1829_v13 }
0x1569   :  { %v2000_v7 = vpop.permute.xlu1 %1999 }
0x156a   :  { %v2002_v8 = vmul.f32 %v2000_v7, %v6203_v15 }
0x156c   :  { %v6511_v14 = vadd.f32 %v2002_v8, %v6454_v29 }
0x156e   :  { %5102 = vmatmul.mubr.msk.f32.vlgmr.msra.gmra.mrb[18].mxu0 %vm198_vm4, %v6511_v14 }
0x156f   :  { %5112 = vmatprep.mubr.msk.f32.mxu0 %vm5917_vm0, %v5916_v1 }
0x15c2   :  { %v1834_v54 = vpop.permute.xlu1 %1833 }
0x15c3   :  { %v1836_v30 = vmul.f32 %v5688_v46, %v1834_v54 }
0x15c5   :  { %1838 = vrot.lane.b32.xlu1 %v1836_v30, %s5921_s24 }
0x15c9   :  { %1987 = vrot.lane.b32.xlu1 %v1986_v11, %s5923_s1 }
0x1637   :  { %v1839_v31 = vpop.permute.xlu1 %1838 }
0x1638   :  { %v1841_v44 = vadd.f32 %v1839_v31, %v1831_v18 }
0x163a   :  { %5689 = vtanh.f32 %v1841_v44  ;;  %v1848_v18 = vsub.f32 %v1841_v44, %v1829_v13 }
0x163b   :  { %v1988_v40 = vpop.permute.xlu1 %1987 }
0x163c   :  { %v1990_v9 = vmul.f32 %v1988_v40, %v6203_v15  ;;  %v1850_v31 = vrot.slane %v1848_v18, 4  ;;  %v2264_v18 = vld [vmem:[%s7185_s7 + $0x78] sm:$0xff] }
0x163e   :  { %v1991_v34 = vadd.f32 %v1990_v9, %v6480_v37 }
0x1641   :  { %v2199_v63 = vpop.f32.mrb[18].mxu0 }
0x1642   :  { %v2203_v58 = vadd.f32 %v2199_v63, %v6132_v33  ;;  %v5103_v21 = vpop.f32.mrb[19].mxu0 }
0x1644   :  { %v5690_v47 = vpop.eup %5689  ;;  %5691 = vtanh.f32 %v2203_v58  ;;  %v4715_v45 = vmul.f32 -1.442695, %v2203_v58 }
0x1645   :  { %1844 = vrot.lane.b32.xlu0 %v5690_v47, %s5919_s6 }
0x1646   :  { %5693 = vpow2.f32 %v4715_v45 }
0x164e   :  { %v5692_v2 = vpop.eup %5691 }
0x164f   :  { %2217 = vrot.lane.b32.xlu0 %v5692_v2, %s5919_s6  ;;  %v2250_v2 = vld [vmem:[%s7185_s7 + $0x8] sm:$0xff] }
0x1650   :  { %v5694_v49 = vpop.eup %5693 }
0x1651   :  { %v2207_v51 = vadd.f32 1.0, %v5694_v49  ;;  %v2249_v49 = vld [vmem:[%s7185_s7] sm:$0xff] }
0x1653   :  { %2212 = vrot.lane.b32.xlu0 %v1991_v34, %s5921_s24  ;;  %5695 = vrcp.f32 %v2207_v51  ;;  %v2252_v34 = vld [vmem:[%s7185_s7 + $0x18] sm:$0xff] }
0x1654   :  { %v5413_v45 = vpack.c.bf16 %v2252_v34, %v2250_v2 }
0x1656   :  { %5414 = vmatprep.subr.bf16.mxu1 %v5413_v45 }
0x165d   :  { %v5696_v7 = vpop.eup %5695 }
0x16b7   :  { %v1845_v33 = vpop.permute.xlu0 %1844 }
0x16b8   :  { %v1847_v39 = vmul.f32 %v5688_v46, %v1845_v33  ;;  %v2254_v33 = vld [vmem:[%s7185_s7 + $0x28] sm:$0xff] }
0x16ba   :  { %v1862_v16 = vsub.f32 %v1847_v39, %v1860_v4  ;;  %v2256_v4 = vld [vmem:[%s7185_s7 + $0x38] sm:$0xff]  ;;  %v2253_v39 = vld [vmem:[%s7185_s7 + $0x20] sm:$0xff] }
0x16bc   :  { %v1864_v6 = vrot.slane %v1862_v16, 4  ;;  %v5417_v16 = vpack.c.bf16 %v2256_v4, %v2254_v33 }
0x16be   :  { %1865 = vrot.lane.b32.xlu1 %v1864_v6, %s5921_s24  ;;  %v2255_v6 = vld [vmem:[%s7185_s7 + $0x30] sm:$0xff] }
0x16c1   :  { %v2218_v8 = vpop.permute.xlu0 %2217 }
0x16c2   :  { %v2220_v42 = vmul.f32 %v5696_v7, %v2218_v8  ;;  %v2258_v8 = vld [vmem:[%s7185_s7 + $0x48] sm:$0xff] }
0x16c4   :  { %2222 = vrot.lane.b32.xlu1 %v2220_v42, %s5921_s24  ;;  %v2260_v42 = vld [vmem:[%s7185_s7 + $0x58] sm:$0xff] }
0x16c5   :  { %v2213_v19 = vpop.permute.xlu0 %2212 }
0x16c6   :  { %v2215_v54 = vmul.f32 %v5696_v7, %v2213_v19  ;;  %v2259_v19 = vld [vmem:[%s7185_s7 + $0x50] sm:$0xff] }
0x1730   :  { %v1866_v37 = vpop.permute.xlu1 %1865 }
0x1731   :  { %v1868_v57 = vmul.f32 %v1866_v37, %v6218_v50  ;;  %v5421_v37 = vpack.c.bf16 %v2260_v42, %v2258_v8 }
0x1733   :  { %1870 = vrot.lane.b32.xlu0 %v1868_v57, %s5923_s1  ;;  %v2257_v57 = vld [vmem:[%s7185_s7 + $0x40] sm:$0xff] }
0x1736   :  { %v2223_v59 = vpop.permute.xlu1 %2222 }
0x1737   :  { %v2225_v30 = vadd.f32 %v2223_v59, %v2215_v54  ;;  %v5423_v54 = vpack.c.bf16 %v2259_v19, %v2257_v57  ;;  %v2361_v59 = vld [vmem:[#allocation3] sm:$0xff]  ;;  %v6637_v57 = vld [vmem:[%s7188_s10] sm:$0x3] }
0x1739   :  { %5697 = vtanh.f32 %v2225_v30  ;;  %v2362_v30 = vld [vmem:[#allocation3 + $0x8] sm:$0xff] }
0x1743   :  { %v5698_v46 = vpop.eup %5697 }
0x1744   :  { %2228 = vrot.lane.b32.xlu0 %v5698_v46, %s5919_s6  ;;  %v6596_v46 = vpack.c.bf16 %v2362_v30, %v2361_v59 }
0x1746   :  { %5431 = vmatpush3.bf16.msra.mxu0 %v6596_v46 }
0x1747   :  { %5432 = vmatprep.subr.bf16.mxu0 %v5915_v0 }
0x17a5   :  { %v1871_v11 = vpop.permute.xlu0 %1870 }
0x17a6   :  { %v6536_v17 = vadd.f32 %v1871_v11, %v6486_v22  ;;  %v2262_v11 = vld [vmem:[%s7185_s7 + $0x68] sm:$0xff] }
0x17a8   :  { %1875 = vrot.lane.b32.xlu1 %v6536_v17, %s5921_s24 }
0x17ac   :  { %2232 = vrot.lane.b32.xlu1 %v6511_v14, %s5923_s1 }
0x17b0   :  { %1477 = vrot.lane.b32.xlu1 %v6400_v36, %s5921_s24 }
0x17b4   :  { %2005 = vrot.lane.b32.xlu1 %v6511_v14, %s5921_s24 }
0x17b6   :  { %v2229_v63 = vpop.permute.xlu0 %2228 }
0x17b7   :  { %v2231_v22 = vmul.f32 %v5696_v7, %v2229_v63  ;;  %v5419_v7 = vpack.c.bf16 %v2255_v6, %v2253_v39  ;;  %v5425_v63 = vpack.c.bf16 %v2264_v18, %v2262_v11 }
0x17b8   :  { %1851 = vrot.lane.b32.xlu1 %v1850_v31, %s5923_s1  ;;  %v2261_v31 = vld [vmem:[%s7185_s7 + $0x60] sm:$0xff] }
0x181a   :  { %v6547_v58 = vpop.permute.xlu1 %1875 }
0x181b   :  { %5091 = vmatmul.mubr.msk.f32.vlgmr.msra.gmra.mrb[14].mxu1 %vm198_vm4, %v6547_v58 }
0x181c   :  { %2348 = vmatprep.mubr.f32.mxu1 %v5916_v1 }
0x181e   :  { %v2233_v21 = vpop.permute.xlu1 %2232 }
0x181f   :  { %v2235_v47 = vsub.f32 %v2231_v22, %v2233_v21  ;;  %v2263_v22 = vld [vmem:[%s7185_s7 + $0x70] sm:$0xff]  ;;  %v2363_v21 = vld [vmem:[#allocation3 + $0x10] sm:$0xff] }
0x1821   :  { %v2236_v36 = vmul.f32 %v2235_v47, %v6154_v10  ;;  %v2364_v47 = vld [vmem:[#allocation3 + $0x18] sm:$0xff] }
0x1822   :  { %v1478_v13 = vpop.permute.xlu1 %1477 }
0x1823   :  { %1480 = vst.msk [vmem:[#allocation2 + $0x6] sm:$0x3] %vm432_vm5, %v1478_v13  ;;  %2238 = vrot.lane.b32.xlu0 %v2236_v36, %s5921_s24  ;;  %v5427_v36 = vpack.c.bf16 %v2263_v22, %v2261_v31  ;;  %v6611_v13 = vpack.c.bf16 %v2364_v47, %v2363_v21 }
0x1825   :  { %5434 = vmatpush3.bf16.msra.mxu0 %v6611_v13 }
0x1826   :  { %v2006_v44 = vpop.permute.xlu1 %2005  ;;  %5435 = vmatprep.subr.bf16.mxu0 %v5915_v0 }
0x1827   :  { %2008 = vst.msk [vmem:[#allocation2 + $0x2] sm:$0x3] %vm432_vm5, %v2006_v44  ;;  %1741 = vrot.lane.b32.xlu0 %v6454_v29, %s5921_s24  ;;  %v2251_v29 = vld [vmem:[%s7185_s7 + $0x10] sm:$0xff] }
0x1828   :  { %v5415_v51 = vpack.c.bf16 %v2251_v29, %v2249_v49  ;;  %5113 = vmatmul.mubr.f32.vlgmr.msra.gmra.mrb[20].mxu0 %v5916_v1 }
0x1829   :  { %5123 = vmatprep.mubr.msk.f32.mxu0 %vm5917_vm0, %v5916_v1 }
0x182a   :  { %v1852_v40 = vpop.permute.xlu1 %1851  ;;  %5416 = vmatpush1.bf16.msra.mxu1 %v5415_v51 }
0x182b   :  { %v1854_v9 = vmul.f32 %v1852_v40, %v6218_v50  ;;  %5418 = vmatprep.subr.bf16.mxu1 %v5417_v16 }
0x182d   :  { %1856 = vrot.lane.b32.xlu1 %v1854_v9, %s5921_s24 }
0x182e   :  { %5420 = vmatpush1.bf16.msra.mxu1 %v5419_v7 }
0x182f   :  { %5422 = vmatprep.subr.bf16.mxu1 %v5421_v37 }
0x1832   :  { %5424 = vmatpush1.bf16.msra.mxu1 %v5423_v54  ;;  %v6641_v54 = vrot.slane %v6637_v57, %v6121_v25 }
0x1833   :  { %5426 = vmatprep.subr.bf16.mxu1 %v5425_v63 }
0x1836   :  { %5428 = vmatpush1.bf16.msra.mxu1 %v5427_v36 }
0x1837   :  { %5441 = vmatprep.subr.bf16.mxu1 %v5915_v0 }
0x1895   :  { %v2239_v44 = vpop.permute.xlu0 %2238 }
0x1896   :  { %v2241_v40 = vadd.f32 %v2239_v44, %v6511_v14 }
0x1898   :  { %2243 = vrot.lane.b32.xlu0 %v2241_v40, %s5921_s24 }
0x1899   :  { %v1742_v9 = vpop.permute.xlu0 %1741 }
0x189a   :  { %1744 = vst.msk [vmem:[#allocation2 + $0x4] sm:$0x3] %vm432_vm5, %v1742_v9  ;;  %v2112_v9 = vrot.slane %v6536_v17, 2 }
0x189f   :  { %v1857_v42 = vpop.permute.xlu1 %1856 }
0x18a0   :  { %v1859_v37 = vadd.f32 %v1857_v42, %v6520_v43  ;;  %v2367_v42 = vld [vmem:[#allocation6 + $0x10] sm:$0xff] }
0x18a2   :  { %v2093_v19 = vrot.slane %v1859_v37, 2  ;;  %v2368_v37 = vld [vmem:[#allocation6 + $0x18] sm:$0xff] }
0x18ee   :  { %v2077_v2 = vpop.f32.mrb[14].mxu1 }
0x18ef   :  { %v2082_v34 = vrot.slane %v2077_v2, 2  ;;  %v5092_v45 = vpop.f32.mrb[15].mxu1 }
0x18f1   :  { %v2084_v49 = vadd.f32 %v2082_v34, %v6135_v38 }
0x18f3   :  { %5699 = vtanh.f32 %v2084_v49  ;;  %v4713_v38 = vmul.f32 -1.442695, %v2084_v49 }
0x18f5   :  { %5701 = vpow2.f32 %v4713_v38 }
0x18fb   :  { %v2455_v39 = vpop.f32.mrb[20].mxu0 }
0x18fc   :  { %v5114_v16 = vpop.f32.mrb[21].mxu0 }
0x18fd   :  { %v5700_v29 = vpop.eup %5699 }
0x18fe   :  { %2097 = vrot.lane.b32.xlu0 %v5700_v29, %s5919_s6 }
0x18ff   :  { %v5702_v14 = vpop.eup %5701 }
0x1900   :  { %v2088_v4 = vadd.f32 1.0, %v5702_v14 }
0x1902   :  { %5703 = vrcp.f32 %v2088_v4 }
0x190a   :  { %v2244_v51 = vpop.permute.xlu0 %2243 }
0x190b   :  { %2246 = vst.msk [vmem:[#allocation2] sm:$0x3] %vm432_vm5, %v2244_v51 }
0x190c   :  { %v5704_v6 = vpop.eup %5703 }
0x190d   :  { %v2095_v59 = vmul.f32 %v5704_v6, %v2093_v19 }
0x1912   :  { %v2247_v33 = vld [vmem:[#allocation2] sm:$0xff] }
0x1913   :  { %4716 = vmatmul.mubr.msk.f32.vlgmr.msra.gmra.mrb[16].mxu1 %vm2277_vm6, %v2247_v33 }
0x1914   :  { %5443 = vmatpush3.bf16.msra.mxu1 %v6596_v46  ;;  %2354 = vmatprep.mubr.f32.mxu1 %v5916_v1 }
0x1915   :  { %5444 = vmatprep.subr.bf16.mxu1 %v5915_v0 }
0x1918   :  { %5446 = vmatpush3.bf16.msra.mxu1 %v6611_v13 }
0x1919   :  { %5453 = vmatprep.subr.bf16.mxu1 %v5915_v0 }
0x1970   :  { %v2098_v7 = vpop.permute.xlu0 %2097 }
0x1971   :  { %v2100_v8 = vmul.f32 %v5704_v6, %v2098_v7  ;;  %v2366_v7 = vld [vmem:[#allocation6 + $0x8] sm:$0xff] }
0x1973   :  { %2102 = vrot.lane.b32.xlu0 %v2100_v8, %s5921_s24 }
0x19e5   :  { %v2103_v30 = vpop.permute.xlu0 %2102 }
0x19e6   :  { %v2105_v11 = vadd.f32 %v2103_v30, %v2095_v59  ;;  %v2350_v18 = vpop.f32.mrb[16].mxu1 }
0x19e7   :  { %v6644_v31 = vadd.f32 %v2350_v18, %v6641_v54  ;;  %v6646_v63 = vpop.f32.mrb[17].mxu1 }
0x19e8   :  { %5705 = vtanh.f32 %v2105_v11 }
0x19e9   :  { %v2459_v43 = vadd.f32 %v2455_v39, %v6644_v31 }
0x19eb   :  { %5707 = vtanh.f32 %v2459_v43  ;;  %v4718_v47 = vmul.f32 -1.442695, %v2459_v43 }
0x19ed   :  { %5709 = vpow2.f32 %v4718_v47 }
0x19f2   :  { %v5706_v22 = vpop.eup %5705 }
0x19f3   :  { %2108 = vrot.lane.b32.xlu1 %v5706_v22, %s5919_s6 }
0x19f5   :  { %v5708_v21 = vpop.eup %5707 }
0x19f6   :  { %2469 = vrot.lane.b32.xlu0 %v5708_v21, %s5919_s6 }
0x19f7   :  { %v5710_v36 = vpop.eup %5709 }
0x19f8   :  { %v2463_v44 = vadd.f32 1.0, %v5710_v36 }
0x19fa   :  { %5711 = vrcp.f32 %v2463_v44 }
0x1a04   :  { %v5712_v34 = vpop.eup %5711 }
0x1a05   :  { %v2467_v33 = vmul.f32 0.0, %v5712_v34 }
0x1a65   :  { %v2109_v40 = vpop.permute.xlu1 %2108 }
0x1a66   :  { %v2111_v2 = vmul.f32 %v5704_v6, %v2109_v40  ;;  %v2365_v6 = vld [vmem:[#allocation6] sm:$0xff] }
0x1a67   :  { %v6668_v8 = vpack.c.bf16 %v2366_v7, %v2365_v6 }
0x1a68   :  { %v2114_v45 = vsub.f32 %v2111_v2, %v2112_v9  ;;  %v2470_v49 = vpop.permute.xlu0 %2469 }
0x1a69   :  { %v2472_v29 = vmul.f32 %v5712_v34, %v2470_v49  ;;  %5437 = vmatpush3.bf16.msra.mxu0 %v6668_v8 }
0x1a6a   :  { %v2116_v51 = vrot.slane %v2114_v45, 6  ;;  %5438 = vmatprep.subr.bf16.mxu0 %v5915_v0 }
0x1a6b   :  { %2474 = vrot.lane.b32.xlu1 %v2472_v29, %s5921_s24 }
0x1a6c   :  { %2117 = vrot.lane.b32.xlu0 %v2116_v51, %s5921_s24 }
0x1add   :  { %v2475_v38 = vpop.permute.xlu1 %2474 }
0x1ade   :  { %v6654_v14 = vadd.f32 %v2475_v38, %v2467_v33  ;;  %v2118_v4 = vpop.permute.xlu0 %2117 }
0x1adf   :  { %v2120_v39 = vmul.f32 %v2118_v4, %v6171_v23  ;;  %v6723_v4 = vrot.slane %v6637_v57, %v102_v27 }
0x1ae0   :  { %5713 = vtanh.f32 %v6654_v14  ;;  %v6718_v38 = vmul.f32 %v6654_v14, %v6154_v10 }
0x1ae1   :  { %2122 = vrot.lane.b32.xlu1 %v2120_v39, %s5923_s1 }
0x1ae2   :  { %v2700_v39 = vrot.slane %v6718_v38, 6 }
0x1ae5   :  { %429 = vrot.lane.b32.xlu1 %v6174_v28, %s5921_s24  ;;  %v6671_v28 = vpack.c.bf16 %v2368_v37, %v2367_v42 }
0x1ae7   :  { %5440 = vmatpush3.bf16.msra.mxu0 %v6671_v28 }
0x1ae8   :  { %5447 = vmatprep.subr.bf16.mxu0 %v5915_v0 }
0x1ae9   :  { %974 = vrot.lane.b32.xlu1 %v6283_v32, %s5921_s24 }
0x1aea   :  { %v5714_v16 = vpop.eup %5713  ;;  %5124 = vmatmul.mubr.f32.vlgmr.msra.gmra.mrb[22].mxu0 %v5916_v1 }
0x1aeb   :  { %2480 = vrot.lane.b32.xlu0 %v5714_v16, %s5919_s6  ;;  %5449 = vmatpush3.bf16.msra.mxu0 %v6668_v8 }
0x1aec   :  { %5145 = vmatprep.mubr.msk.f32.mxu0 %vm5917_vm0, %v5916_v1  ;;  %5450 = vmatprep.subr.bf16.mxu0 %v5915_v0 }
0x1aef   :  { %702 = vrot.lane.b32.xlu0 %v6238_v60, %s5921_s24  ;;  %5452 = vmatpush3.bf16.msra.mxu0 %v6671_v28 }
0x1af0   :  { %5459 = vmatprep.subr.bf16.mxu0 %v5915_v0 }
0x1af3   :  { %1239 = vrot.lane.b32.xlu0 %v6346_v62, %s5921_s24 }
0x1b53   :  { %v2123_v60 = vpop.permute.xlu1 %2122 }
0x1b54   :  { %v2125_v32 = vadd.f32 %v2123_v60, %v6536_v17 }
0x1b56   :  { %2127 = vrot.lane.b32.xlu1 %v2125_v32, %s5921_s24 }
0x1b57   :  { %v430_v62 = vpop.permute.xlu1 %429 }
0x1b58   :  { %433 = vst.msk [vmem:[#allocation2 + $0xe] sm:$0x3] %vm432_vm5, %v430_v62 }
0x1b5b   :  { %v975_v19 = vpop.permute.xlu1 %974 }
0x1b5c   :  { %977 = vst.msk [vmem:[#allocation2 + $0xa] sm:$0x3] %vm432_vm5, %v975_v19 }
0x1b5d   :  { %1614 = vst.msk [vmem:[#allocation2 + $0xa] sm:$0x3] %vm310_vm3, %v6494_v56  ;;  %v2481_v59 = vpop.permute.xlu0 %2480 }
0x1b5e   :  { %v2483_v30 = vmul.f32 %v5712_v34, %v2481_v59 }
0x1b60   :  { %v6690_v17 = vmul.f32 %v2483_v30, %v6154_v10 }
0x1b61   :  { %v703_v11 = vpop.permute.xlu0 %702 }
0x1b62   :  { %705 = vst.msk [vmem:[#allocation2 + $0xc] sm:$0x3] %vm432_vm5, %v703_v11  ;;  %2614 = vrot.lane.b32.xlu0 %v6690_v17, %s5921_s24  ;;  %v2731_v19 = vrot.slane %v6690_v17, 6 }
0x1b63   :  { %1878 = vst.msk [vmem:[#allocation2 + $0xc] sm:$0x3] %vm310_vm3, %v6547_v58 }
0x1b65   :  { %v1240_v18 = vpop.permute.xlu0 %1239 }
0x1b66   :  { %1242 = vst.msk [vmem:[#allocation2 + $0x8] sm:$0x3] %vm432_vm5, %v1240_v18 }
0x1b67   :  { %1350 = vst.msk [vmem:[#allocation2 + $0x8] sm:$0x3] %vm310_vm3, %v6434_v20 }
0x1bbd   :  { %v2561_v20 = vpop.f32.mrb[22].mxu0 }
0x1bbe   :  { %v5125_v58 = vpop.f32.mrb[23].mxu0  ;;  %v2566_v6 = vrot.slane %v2561_v20, 2 }
0x1bc8   :  { %v2128_v56 = vpop.permute.xlu1 %2127 }
0x1bc9   :  { %2130 = vst.msk [vmem:[#allocation2 + $0xe] sm:$0x3] %vm310_vm3, %v2128_v56 }
0x1bd0   :  { %v2248_v43 = vld [vmem:[#allocation2 + $0x8] sm:$0xff] }
0x1bd1   :  { %4717 = vmatmul.mubr.msk.f32.gmra.mrb[18].mxu1 %vm2277_vm6, %v2248_v43 }
0x1bd2   :  { %5134 = vmatprep.mubr.msk.f32.mxu1 %vm5917_vm0, %v5916_v1 }
0x1bd4   :  { %v2615_v22 = vpop.permute.xlu0 %2614 }
0x1bd5   :  { %5135 = vmatmul.mubr.msk.f32.vlgmr.msra.gmra.mrb[20].mxu1 %vm198_vm4, %v2615_v22 }
0x1bd6   :  { %5455 = vmatpush3.bf16.msra.mxu1 %v6596_v46  ;;  %5156 = vmatprep.mubr.msk.f32.mxu1 %vm5917_vm0, %v5916_v1 }
0x1bd7   :  { %5456 = vmatprep.subr.bf16.mxu1 %v5915_v0 }
0x1bda   :  { %5458 = vmatpush3.bf16.msra.mxu1 %v6611_v13 }
0x1bdb   :  { %5465 = vmatprep.subr.bf16.mxu1 %v5915_v0 }
0x1ca4   :  { %v6711_v21 = vpop.f32.mrb[18].mxu1 }
0x1ca5   :  { %v2358_v47 = vpop.f32.mrb[19].mxu1 }
0x1ca6   :  { %v6727_v16 = vadd.f32 %v2358_v47, %v6723_v4 }
0x1ca8   :  { %v2684_v36 = vpop.f32.mrb[20].mxu1  ;;  %v2568_v60 = vadd.f32 %v2566_v6, %v6727_v16 }
0x1ca9   :  { %v2689_v44 = vrot.slane %v2684_v36, 6  ;;  %v5136_v40 = vpop.f32.mrb[21].mxu1 }
0x1caa   :  { %v4719_v27 = vmul.f32 -1.442695, %v2568_v60 }
0x1cab   :  { %v2691_v9 = vadd.f32 %v2689_v44, %v6644_v31 }
0x1cad   :  { %5715 = vtanh.f32 %v2691_v9  ;;  %v4721_v34 = vmul.f32 -1.442695, %v2691_v9 }
0x1caf   :  { %5717 = vpow2.f32 %v4721_v34 }
0x1cb7   :  { %v5716_v2 = vpop.eup %5715 }
0x1cb8   :  { %2704 = vrot.lane.b32.xlu1 %v5716_v2, %s5919_s6 }
0x1cb9   :  { %v5718_v45 = vpop.eup %5717 }
0x1cba   :  { %v2695_v49 = vadd.f32 1.0, %v5718_v45 }
0x1cbc   :  { %5719 = vrcp.f32 %v2695_v49 }
0x1cc6   :  { %v5720_v29 = vpop.eup %5719 }
0x1cc7   :  { %v2702_v7 = vmul.f32 %v5720_v29, %v2700_v39 }
0x1d2a   :  { %v2705_v51 = vpop.permute.xlu1 %2704 }
0x1d2b   :  { %v2707_v33 = vmul.f32 %v5720_v29, %v2705_v51 }
0x1d2d   :  { %2709 = vrot.lane.b32.xlu0 %v2707_v33, %s5921_s24 }
0x1d9f   :  { %v2710_v42 = vpop.permute.xlu0 %2709 }
0x1da0   :  { %v2712_v37 = vadd.f32 %v2710_v42, %v2702_v7 }
0x1da2   :  { %5721 = vtanh.f32 %v2712_v37  ;;  %v2719_v44 = vsub.f32 %v2712_v37, %v2700_v39 }
0x1da3   :  { %5723 = vtanh.f32 %v2568_v60 }
0x1da4   :  { %5725 = vpow2.f32 %v4719_v27  ;;  %v2721_v9 = vrot.slane %v2719_v44, 2 }
0x1dac   :  { %v5722_v14 = vpop.eup %5721 }
0x1dad   :  { %2715 = vrot.lane.b32.xlu1 %v5722_v14, %s5919_s6  ;;  %v5724_v24 = vpop.eup %5723 }
0x1dae   :  { %v5726_v57 = vpop.eup %5725 }
0x1daf   :  { %v2572_v32 = vadd.f32 1.0, %v5726_v57 }
0x1db1   :  { %2578 = vrot.lane.b32.xlu1 %v5724_v24, %s5919_s6  ;;  %5727 = vrcp.f32 %v2572_v32 }
0x1dbb   :  { %v5728_v11 = vpop.eup %5727 }
0x1dbc   :  { %v2576_v22 = vmul.f32 0.0, %v5728_v11 }
0x1e1f   :  { %v2716_v62 = vpop.permute.xlu1 %2715 }
0x1e20   :  { %v2718_v59 = vmul.f32 %v5720_v29, %v2716_v62 }
0x1e22   :  { %v2733_v30 = vsub.f32 %v2718_v59, %v2731_v19 }
0x1e23   :  { %v2579_v18 = vpop.permute.xlu1 %2578 }
0x1e24   :  { %v2735_v56 = vrot.slane %v2733_v30, 2  ;;  %v2581_v43 = vmul.f32 %v5728_v11, %v2579_v18 }
0x1e26   :  { %2736 = vrot.lane.b32.xlu0 %v2735_v56, %s5921_s24  ;;  %2583 = vrot.lane.b32.xlu1 %v2581_v43, %s5921_s24 }
0x1e98   :  { %v2737_v20 = vpop.permute.xlu0 %2736  ;;  %v2584_v58 = vpop.permute.xlu1 %2583 }
0x1e99   :  { %v2739_v47 = vmul.f32 %v2737_v20, %v6203_v15  ;;  %v2586_v36 = vadd.f32 %v2584_v58, %v2576_v22 }
0x1e9b   :  { %5729 = vtanh.f32 %v2586_v36  ;;  %2741 = vrot.lane.b32.xlu0 %v2739_v47, %s5923_s1  ;;  %v2594_v39 = vrot.slane %v2586_v36, 6 }
0x1ea5   :  { %v5730_v40 = vpop.eup %5729 }
0x1ea6   :  { %2589 = vrot.lane.b32.xlu1 %v5730_v40, %s5919_s6 }
0x1eaa   :  { %2722 = vrot.lane.b32.xlu1 %v2721_v9, %s5923_s1 }
0x1f0d   :  { %v2742_v2 = vpop.permute.xlu0 %2741 }
0x1f0e   :  { %v6740_v34 = vadd.f32 %v2742_v2, %v6690_v17 }
0x1f10   :  { %2884 = vrot.lane.b32.xlu0 %v6740_v34, %s5921_s24 }
0x1f18   :  { %v2590_v45 = vpop.permute.xlu1 %2589 }
0x1f19   :  { %v2592_v49 = vmul.f32 %v5728_v11, %v2590_v45 }
0x1f1b   :  { %v2601_v29 = vrot.slane %v2592_v49, 6 }
0x1f1c   :  { %v2723_v51 = vpop.permute.xlu1 %2722 }
0x1f1d   :  { %v2725_v33 = vmul.f32 %v2723_v51, %v6203_v15  ;;  %2602 = vrot.lane.b32.xlu0 %v2601_v29, %s5921_s24 }
0x1f1f   :  { %2727 = vrot.lane.b32.xlu1 %v2725_v33, %s5921_s24 }
0x1f23   :  { %2595 = vrot.lane.b32.xlu1 %v2594_v39, %s5923_s1 }
0x1f82   :  { %v2885_v6 = vpop.permute.xlu0 %2884 }
0x1f83   :  { %5157 = vmatmul.mubr.msk.f32.vlgmr.msra.gmra.mrb[22].mxu1 %vm198_vm4, %v2885_v6 }
0x1f84   :  { %5467 = vmatpush3.bf16.msra.mxu1 %v6596_v46  ;;  %5178 = vmatprep.mubr.msk.f32.mxu1 %vm5917_vm0, %v5916_v1 }
0x1f85   :  { %5468 = vmatprep.subr.bf16.mxu1 %v5915_v0 }
0x1f88   :  { %5470 = vmatpush3.bf16.msra.mxu1 %v6611_v13 }
0x1f89   :  { %5477 = vmatprep.subr.bf16.mxu1 %v5915_v0 }
0x1f8f   :  { %v2603_v7 = vpop.permute.xlu0 %2602 }
0x1f90   :  { %v6756_v42 = vmul.f32 %v2603_v7, %v6171_v23 }
0x1f91   :  { %v2728_v18 = vpop.permute.xlu1 %2727 }
0x1f92   :  { %5146 = vmatmul.mubr.msk.f32.vlgmr.msra.gmra.mrb[24].mxu0 %vm198_vm4, %v6756_v42  ;;  %v6777_v40 = vadd.f32 %v2728_v18, %v6718_v38 }
0x1f93   :  { %5461 = vmatpush3.bf16.msra.mxu0 %v6668_v8  ;;  %5167 = vmatprep.mubr.msk.f32.mxu0 %vm5917_vm0, %v5916_v1 }
0x1f94   :  { %5462 = vmatprep.subr.bf16.mxu0 %v5915_v0  ;;  %v2970_v9 = vrot.slane %v6777_v40, 4 }
0x1f95   :  { %v2596_v20 = vpop.permute.xlu1 %2595 }
0x1f96   :  { %v6771_v58 = vmul.f32 %v2596_v20, %v6171_v23 }
0x1f97   :  { %5464 = vmatpush3.bf16.msra.mxu0 %v6671_v28 }
0x1f98   :  { %5471 = vmatprep.subr.bf16.mxu0 %v5915_v0  ;;  %v2836_v36 = vrot.slane %v6771_v58, 4 }
0x2056   :  { %v2954_v37 = vpop.f32.mrb[22].mxu1 }
0x2057   :  { %v2959_v60 = vrot.slane %v2954_v37, 4  ;;  %v5158_v14 = vpop.f32.mrb[23].mxu1 }
0x2059   :  { %v2961_v24 = vadd.f32 %v2959_v60, %v6644_v31  ;;  %v3001_v60 = vrot.slane %v6740_v34, 4 }
0x205b   :  { %5731 = vtanh.f32 %v2961_v24  ;;  %v4725_v62 = vmul.f32 -1.442695, %v2961_v24 }
0x205d   :  { %5733 = vpow2.f32 %v4725_v62 }
0x2065   :  { %v5732_v27 = vpop.eup %5731  ;;  %v2820_v57 = vpop.f32.mrb[24].mxu0 }
0x2066   :  { %v5147_v32 = vpop.f32.mrb[25].mxu0  ;;  %2974 = vrot.lane.b32.xlu0 %v5732_v27, %s5919_s6  ;;  %v2825_v30 = vrot.slane %v2820_v57, 4 }
0x2067   :  { %v5734_v19 = vpop.eup %5733 }
0x2068   :  { %v2965_v59 = vadd.f32 1.0, %v5734_v19  ;;  %v2827_v11 = vadd.f32 %v2825_v30, %v6727_v16  ;;  %v2865_v19 = vrot.slane %v6756_v42, 4 }
0x206a   :  { %5735 = vrcp.f32 %v2965_v59  ;;  %v4723_v44 = vmul.f32 -1.442695, %v2827_v11 }
0x206b   :  { %5737 = vtanh.f32 %v2827_v11 }
0x206c   :  { %5739 = vpow2.f32 %v4723_v44 }
0x2074   :  { %v5736_v56 = vpop.eup %5735 }
0x2075   :  { %v5738_v47 = vpop.eup %5737  ;;  %v2972_v45 = vmul.f32 %v5736_v56, %v2970_v9 }
0x2076   :  { %v5740_v2 = vpop.eup %5739 }
0x2077   :  { %v2831_v29 = vadd.f32 1.0, %v5740_v2 }
0x20d8   :  { %v2975_v43 = vpop.permute.xlu0 %2974 }
0x20d9   :  { %v2977_v22 = vmul.f32 %v5736_v56, %v2975_v43 }
0x20db   :  { %2979 = vrot.lane.b32.xlu0 %v2977_v22, %s5921_s24 }
0x20df   :  { %2842 = vrot.lane.b32.xlu0 %v5738_v47, %s5919_s6 }
0x20e3   :  { %2837 = vrot.lane.b32.xlu0 %v2836_v36, %s5921_s24 }
0x214d   :  { %v2980_v49 = vpop.permute.xlu0 %2979 }
0x214e   :  { %v2982_v51 = vadd.f32 %v2980_v49, %v2972_v45 }
0x2150   :  { %5741 = vtanh.f32 %v2982_v51  ;;  %v2989_v36 = vsub.f32 %v2982_v51, %v2970_v9 }
0x2151   :  { %5743 = vrcp.f32 %v2831_v29  ;;  %v2843_v39 = vpop.permute.xlu0 %2842 }
0x2152   :  { %v2991_v2 = vrot.slane %v2989_v36, 4 }
0x2155   :  { %v2838_v37 = vpop.permute.xlu0 %2837 }
0x215a   :  { %v5742_v33 = vpop.eup %5741 }
0x215b   :  { %2985 = vrot.lane.b32.xlu1 %v5742_v33, %s5919_s6  ;;  %v5744_v6 = vpop.eup %5743 }
0x215c   :  { %v2845_v7 = vmul.f32 %v5744_v6, %v2843_v39  ;;  %v2840_v24 = vmul.f32 %v5744_v6, %v2838_v37 }
0x215f   :  { %2847 = vrot.lane.b32.xlu1 %v2845_v7, %s5921_s24 }
0x21cd   :  { %v2986_v38 = vpop.permute.xlu1 %2985 }
0x21ce   :  { %v2988_v14 = vmul.f32 %v5736_v56, %v2986_v38 }
0x21d0   :  { %v3003_v27 = vsub.f32 %v2988_v14, %v3001_v60 }
0x21d1   :  { %v2848_v57 = vpop.permute.xlu1 %2847 }
0x21d2   :  { %v3005_v32 = vrot.slane %v3003_v27, 4  ;;  %v2850_v62 = vadd.f32 %v2848_v57, %v2840_v24 }
0x21d4   :  { %5745 = vtanh.f32 %v2850_v62  ;;  %3006 = vrot.lane.b32.xlu0 %v3005_v32, %s5921_s24  ;;  %v2857_v20 = vsub.f32 %v2850_v62, %v2838_v37 }
0x21d6   :  { %v2859_v44 = vrot.slane %v2857_v20, 4 }
0x21d8   :  { %2866 = vrot.lane.b32.xlu0 %v2865_v19, %s5923_s1 }
0x21de   :  { %v5746_v59 = vpop.eup %5745 }
0x21df   :  { %2853 = vrot.lane.b32.xlu1 %v5746_v59, %s5919_s6 }
0x2246   :  { %v3007_v30 = vpop.permute.xlu0 %3006 }
0x2247   :  { %v3009_v11 = vmul.f32 %v3007_v30, %v6274_v12 }
0x2249   :  { %3011 = vrot.lane.b32.xlu1 %v3009_v11, %s5923_s1 }
0x224a   :  { %v2867_v43 = vpop.permute.xlu0 %2866 }
0x2251   :  { %v2854_v18 = vpop.permute.xlu1 %2853 }
0x2252   :  { %v2856_v56 = vmul.f32 %v5744_v6, %v2854_v18 }
0x2254   :  { %v2869_v22 = vsub.f32 %v2856_v56, %v2867_v43 }
0x2256   :  { %v2871_v47 = vrot.slane %v2869_v22, 4 }
0x2258   :  { %2872 = vrot.lane.b32.xlu0 %v2871_v47, %s5921_s24 }
0x225c   :  { %2860 = vrot.lane.b32.xlu0 %v2859_v44, %s5923_s1 }
0x2260   :  { %2992 = vrot.lane.b32.xlu0 %v2991_v2, %s5923_s1 }
0x22bb   :  { %v3012_v45 = vpop.permute.xlu1 %3011 }
0x22bc   :  { %v6793_v49 = vadd.f32 %v3012_v45, %v6740_v34 }
0x22be   :  { %3154 = vrot.lane.b32.xlu1 %v6793_v49, %s5921_s24 }
0x22ca   :  { %v2873_v29 = vpop.permute.xlu0 %2872 }
0x22cb   :  { %v2875_v33 = vmul.f32 %v2873_v29, %v6218_v50 }
0x22cd   :  { %v6799_v39 = vadd.f32 %v2875_v33, %v6756_v42 }
0x22ce   :  { %v2861_v9 = vpop.permute.xlu0 %2860 }
0x22cf   :  { %v2863_v51 = vmul.f32 %v2861_v9, %v6218_v50  ;;  %5168 = vmatmul.mubr.msk.f32.vlgmr.msra.gmra.mrb[26].mxu0 %vm198_vm4, %v6799_v39  ;;  %v3135_v29 = vrot.slane %v6799_v39, 6 }
0x22d0   :  { %5473 = vmatpush3.bf16.msra.mxu0 %v6668_v8  ;;  %5189 = vmatprep.mubr.msk.f32.mxu0 %vm5917_vm0, %v5916_v1 }
0x22d1   :  { %v6808_v6 = vadd.f32 %v2863_v51, %v6771_v58  ;;  %5474 = vmatprep.subr.bf16.mxu0 %v5915_v0 }
0x22d2   :  { %v2993_v37 = vpop.permute.xlu0 %2992 }
0x22d3   :  { %v3106_v7 = vrot.slane %v6808_v6, 6  ;;  %v2995_v38 = vmul.f32 %v2993_v37, %v6274_v12 }
0x22d4   :  { %5476 = vmatpush3.bf16.msra.mxu0 %v6671_v28 }
0x22d5   :  { %3107 = vrot.lane.b32.xlu0 %v3106_v7, %s5921_s24  ;;  %5483 = vmatprep.subr.bf16.mxu0 %v5915_v0 }
0x22d9   :  { %2997 = vrot.lane.b32.xlu0 %v2995_v38, %s5921_s24 }
0x2330   :  { %v3155_v60 = vpop.permute.xlu1 %3154 }
0x2331   :  { %5179 = vmatmul.mubr.msk.f32.vlgmr.msra.gmra.mrb[24].mxu1 %vm198_vm4, %v3155_v60 }
0x2332   :  { %5479 = vmatpush3.bf16.msra.mxu1 %v6596_v46  ;;  %5200 = vmatprep.mubr.msk.f32.mxu1 %vm5917_vm0, %v5916_v1 }
0x2333   :  { %5480 = vmatprep.subr.bf16.mxu1 %v5915_v0 }
0x2336   :  { %5482 = vmatpush3.bf16.msra.mxu1 %v6611_v13 }
0x2337   :  { %5489 = vmatprep.subr.bf16.mxu1 %v5915_v0 }
0x2347   :  { %v3108_v33 = vpop.permute.xlu0 %3107 }
0x234b   :  { %v2998_v38 = vpop.permute.xlu0 %2997 }
0x234c   :  { %v6834_v60 = vadd.f32 %v2998_v38, %v6777_v40  ;;  %v3271_v40 = vrot.slane %v6793_v49, 2 }
0x23a2   :  { %v3090_v58 = vpop.f32.mrb[26].mxu0 }
0x23a3   :  { %v3095_v14 = vrot.slane %v3090_v58, 6  ;;  %v5169_v24 = vpop.f32.mrb[27].mxu0  ;;  %v3240_v58 = vrot.slane %v6834_v60, 2 }
0x23a5   :  { %v3097_v27 = vadd.f32 %v3095_v14, %v6727_v16 }
0x23a7   :  { %5747 = vtanh.f32 %v3097_v27  ;;  %v4727_v32 = vmul.f32 -1.442695, %v3097_v27 }
0x23a9   :  { %5749 = vpow2.f32 %v4727_v32 }
0x23b1   :  { %v5748_v57 = vpop.eup %5747 }
0x23b2   :  { %3112 = vrot.lane.b32.xlu1 %v5748_v57, %s5919_s6 }
0x23b3   :  { %v5750_v11 = vpop.eup %5749 }
0x23b4   :  { %v3101_v56 = vadd.f32 1.0, %v5750_v11 }
0x2404   :  { %v3224_v62 = vpop.f32.mrb[24].mxu1 }
0x2405   :  { %v3229_v19 = vrot.slane %v3224_v62, 2  ;;  %v5180_v59 = vpop.f32.mrb[25].mxu1 }
0x2407   :  { %v3231_v30 = vadd.f32 %v3229_v19, %v6644_v31 }
0x2409   :  { %5751 = vtanh.f32 %v3231_v30  ;;  %v4729_v47 = vmul.f32 -1.442695, %v3231_v30 }
0x240a   :  { %5753 = vrcp.f32 %v3101_v56 }
0x240b   :  { %5755 = vpow2.f32 %v4729_v47 }
0x2413   :  { %v5752_v18 = vpop.eup %5751 }
0x2414   :  { %3244 = vrot.lane.b32.xlu1 %v5752_v18, %s5919_s6  ;;  %v5754_v43 = vpop.eup %5753 }
0x2415   :  { %v5756_v36 = vpop.eup %5755  ;;  %v3110_v9 = vmul.f32 %v5754_v43, %v3108_v33 }
0x2416   :  { %v3235_v44 = vadd.f32 1.0, %v5756_v36 }
0x2418   :  { %5757 = vrcp.f32 %v3235_v44 }
0x2422   :  { %v5758_v2 = vpop.eup %5757 }
0x2423   :  { %v3242_v14 = vmul.f32 %v5758_v2, %v3240_v58 }
0x2424   :  { %v3113_v22 = vpop.permute.xlu1 %3112 }
0x2425   :  { %v3115_v20 = vmul.f32 %v5754_v43, %v3113_v22 }
0x2427   :  { %3117 = vrot.lane.b32.xlu1 %v3115_v20, %s5921_s24 }
0x2486   :  { %v3245_v31 = vpop.permute.xlu1 %3244 }
0x2487   :  { %v3247_v45 = vmul.f32 %v5758_v2, %v3245_v31 }
0x2489   :  { %3249 = vrot.lane.b32.xlu1 %v3247_v45, %s5921_s24 }
0x248d   :  { %3136 = vrot.lane.b32.xlu1 %v3135_v29, %s5923_s1 }
0x2499   :  { %v3118_v51 = vpop.permute.xlu1 %3117 }
0x249a   :  { %v3120_v7 = vadd.f32 %v3118_v51, %v3110_v9 }
0x249c   :  { %5759 = vtanh.f32 %v3120_v7  ;;  %v3127_v44 = vsub.f32 %v3120_v7, %v3108_v33 }
0x249e   :  { %v3129_v31 = vrot.slane %v3127_v44, 2 }
0x24a6   :  { %v5760_v37 = vpop.eup %5759 }
0x24a7   :  { %3123 = vrot.lane.b32.xlu0 %v5760_v37, %s5919_s6 }
0x24fb   :  { %v3250_v24 = vpop.permute.xlu1 %3249 }
0x24fc   :  { %v3252_v27 = vadd.f32 %v3250_v24, %v3242_v14 }
0x24fe   :  { %5761 = vtanh.f32 %v3252_v27  ;;  %v3259_v38 = vsub.f32 %v3252_v27, %v3240_v58 }
0x24ff   :  { %v3137_v19 = vpop.permute.xlu1 %3136 }
0x2500   :  { %v3261_v24 = vrot.slane %v3259_v38, 6 }
0x2508   :  { %v5762_v57 = vpop.eup %5761 }
0x2509   :  { %3255 = vrot.lane.b32.xlu0 %v5762_v57, %s5919_s6 }
0x2519   :  { %v3124_v32 = vpop.permute.xlu0 %3123 }
0x251a   :  { %v3126_v62 = vmul.f32 %v5754_v43, %v3124_v32 }
0x251c   :  { %v3139_v59 = vsub.f32 %v3126_v62, %v3137_v19 }
0x251e   :  { %v3141_v30 = vrot.slane %v3139_v59, 2 }
0x2520   :  { %3142 = vrot.lane.b32.xlu1 %v3141_v30, %s5921_s24 }
0x257b   :  { %v3256_v11 = vpop.permute.xlu0 %3255 }
0x257c   :  { %v3258_v18 = vmul.f32 %v5758_v2, %v3256_v11 }
0x257e   :  { %v3273_v56 = vsub.f32 %v3258_v18, %v3271_v40 }
0x2580   :  { %v3275_v22 = vrot.slane %v3273_v56, 6  ;;  %v6883_v56 = vadd.f32 %v6711_v21, %v6641_v54 }
0x2582   :  { %3276 = vrot.lane.b32.xlu0 %v3275_v22, %s5921_s24 }
0x2592   :  { %v3143_v20 = vpop.permute.xlu1 %3142 }
0x2593   :  { %v3145_v47 = vmul.f32 %v3143_v20, %v6279_v26 }
0x2595   :  { %v6843_v36 = vadd.f32 %v3145_v47, %v6799_v39 }
0x2597   :  { %5190 = vmatmul.mubr.msk.f32.vlgmr.msra.gmra.mrb[28].mxu0 %vm198_vm4, %v6843_v36 }
0x2598   :  { %5485 = vmatpush3.bf16.msra.mxu0 %v6668_v8  ;;  %5211 = vmatprep.mubr.msk.f32.mxu0 %vm5917_vm0, %v5916_v1 }
0x2599   :  { %5486 = vmatprep.subr.bf16.mxu0 %v5915_v0 }
0x259c   :  { %5488 = vmatpush3.bf16.msra.mxu0 %v6671_v28 }
0x259d   :  { %5495 = vmatprep.subr.bf16.mxu0 %v5915_v0 }
0x25f4   :  { %v3277_v43 = vpop.permute.xlu0 %3276 }
0x25f5   :  { %v3279_v2 = vmul.f32 %v3277_v43, %v6358_v3 }
0x25f7   :  { %3281 = vrot.lane.b32.xlu1 %v3279_v2, %s5923_s1 }
0x25fb   :  { %3130 = vrot.lane.b32.xlu1 %v3129_v31, %s5923_s1 }
0x2669   :  { %v3282_v45 = vpop.permute.xlu1 %3281 }
0x266a   :  { %v6857_v29 = vadd.f32 %v3282_v45, %v6793_v49  ;;  %v3360_v9 = vpop.f32.mrb[28].mxu0 }
0x266b   :  { %v3364_v51 = vadd.f32 %v3360_v9, %v6727_v16  ;;  %v5191_v37 = vpop.f32.mrb[29].mxu0 }
0x266c   :  { %3417 = vrot.lane.b32.xlu0 %v6857_v29, %s5921_s24 }
0x266d   :  { %5763 = vtanh.f32 %v3364_v51  ;;  %v3131_v33 = vpop.permute.xlu1 %3130  ;;  %v4731_v16 = vmul.f32 -1.442695, %v3364_v51 }
0x266e   :  { %v3133_v7 = vmul.f32 %v3131_v33, %v6279_v26 }
0x266f   :  { %5765 = vpow2.f32 %v4731_v16 }
0x2670   :  { %v6864_v14 = vadd.f32 %v3133_v7, %v6808_v6 }
0x2672   :  { %3373 = vrot.lane.b32.xlu1 %v6864_v14, %s5921_s24 }
0x2676   :  { %3262 = vrot.lane.b32.xlu1 %v3261_v24, %s5923_s1 }
0x2677   :  { %v5764_v57 = vpop.eup %5763 }
0x2678   :  { %3378 = vrot.lane.b32.xlu0 %v5764_v57, %s5919_s6 }
0x2679   :  { %v5766_v32 = vpop.eup %5765 }
0x267a   :  { %v3368_v62 = vadd.f32 1.0, %v5766_v32 }
0x267c   :  { %5767 = vrcp.f32 %v3368_v62 }
0x2686   :  { %v5768_v6 = vpop.eup %5767 }
0x26de   :  { %v3418_v19 = vpop.permute.xlu0 %3417 }
0x26df   :  { %5201 = vmatmul.mubr.msk.f32.vlgmr.msra.gmra.mrb[26].mxu1 %vm198_vm4, %v3418_v19 }
0x26e0   :  { %5491 = vmatpush3.bf16.msra.mxu1 %v6596_v46  ;;  %5222 = vmatprep.mubr.msk.f32.mxu1 %vm5917_vm0, %v5916_v1 }
0x26e1   :  { %5492 = vmatprep.subr.bf16.mxu1 %v5915_v0 }
0x26e4   :  { %5494 = vmatpush3.bf16.msra.mxu1 %v6611_v13  ;;  %v3374_v59 = vpop.permute.xlu1 %3373 }
0x26e5   :  { %5501 = vmatprep.subr.bf16.mxu1 %v5915_v0  ;;  %v3376_v30 = vmul.f32 %v5768_v6, %v3374_v59 }
0x26e8   :  { %v3263_v44 = vpop.permute.xlu1 %3262 }
0x26e9   :  { %v3265_v2 = vmul.f32 %v3263_v44, %v6358_v3 }
0x26ea   :  { %v3379_v58 = vpop.permute.xlu0 %3378 }
0x26eb   :  { %v3381_v27 = vmul.f32 %v5768_v6, %v3379_v58 }
0x26ed   :  { %3383 = vrot.lane.b32.xlu0 %v3381_v27, %s5921_s24 }
0x275f   :  { %v3384_v11 = vpop.permute.xlu0 %3383 }
0x2760   :  { %v3386_v40 = vadd.f32 %v3384_v11, %v3376_v30 }
0x2762   :  { %5769 = vtanh.f32 %v3386_v40  ;;  %v3393_v27 = vsub.f32 %v3386_v40, %v3374_v59 }
0x2764   :  { %v3394_v11 = vmul.f32 %v3393_v27, %v6336_v55 }
0x276c   :  { %v5770_v18 = vpop.eup %5769 }
0x276d   :  { %3389 = vrot.lane.b32.xlu0 %v5770_v18, %s5919_s6 }
0x2771   :  { %3400 = vrot.lane.b32.xlu0 %v6843_v36, %s5923_s1 }
0x27b2   :  { %v3487_v22 = vpop.f32.mrb[26].mxu1 }
0x27b3   :  { %v3491_v20 = vadd.f32 %v3487_v22, %v6883_v56  ;;  %v5202_v47 = vpop.f32.mrb[27].mxu1 }
0x27b5   :  { %5771 = vtanh.f32 %v3491_v20  ;;  %v4733_v21 = vmul.f32 -1.442695, %v3491_v20 }
0x27b7   :  { %5773 = vpow2.f32 %v4733_v21 }
0x27bf   :  { %v5772_v43 = vpop.eup %5771 }
0x27c0   :  { %3501 = vrot.lane.b32.xlu1 %v5772_v43, %s5919_s6 }
0x27c1   :  { %v5774_v37 = vpop.eup %5773 }
0x27c2   :  { %v3495_v33 = vadd.f32 1.0, %v5774_v37 }
0x27c4   :  { %3267 = vrot.lane.b32.xlu1 %v3265_v2, %s5921_s24  ;;  %5775 = vrcp.f32 %v3495_v33  ;;  %v6927_v2 = vadd.f32 %v6646_v63, %v6723_v4 }
0x27ce   :  { %v5776_v7 = vpop.eup %5775 }
0x27df   :  { %v3390_v31 = vpop.permute.xlu0 %3389 }
0x27e0   :  { %v3392_v45 = vmul.f32 %v5768_v6, %v3390_v31 }
0x27e3   :  { %v3401_v9 = vpop.permute.xlu0 %3400 }
0x27e4   :  { %v3403_v51 = vsub.f32 %v3392_v45, %v3401_v9 }
0x27e6   :  { %v3404_v54 = vmul.f32 %v3403_v51, %v6336_v55 }
0x27e8   :  { %3406 = vrot.lane.b32.xlu1 %v3404_v54, %s5921_s24 }
0x2832   :  { %v3502_v38 = vpop.permute.xlu1 %3501 }
0x2833   :  { %v3504_v24 = vmul.f32 %v5776_v7, %v3502_v38 }
0x2835   :  { %3506 = vrot.lane.b32.xlu0 %v3504_v24, %s5921_s24 }
0x2836   :  { %v3268_v57 = vpop.permute.xlu1 %3267 }
0x2837   :  { %v6904_v62 = vadd.f32 %v3268_v57, %v6834_v60 }
0x2839   :  { %v3499_v19 = vmul.f32 %v5776_v7, %v6904_v62 }
0x285a   :  { %v3407_v16 = vpop.permute.xlu1 %3406 }
0x285b   :  { %v6893_v32 = vadd.f32 %v3407_v16, %v6843_v36 }
0x285d   :  { %5212 = vmatmul.mubr.msk.f32.vlgmr.msra.gmra.mrb[30].mxu0 %vm198_vm4, %v6893_v32 }
0x285e   :  { %5497 = vmatpush3.bf16.msra.mxu0 %v6668_v8  ;;  %5233 = vmatprep.mubr.msk.f32.mxu0 %vm5917_vm0, %v5916_v1 }
0x285f   :  { %5498 = vmatprep.subr.bf16.mxu0 %v5915_v0 }
0x2862   :  { %5500 = vmatpush3.bf16.msra.mxu0 %v6671_v28 }
0x2863   :  { %5507 = vmatprep.subr.bf16.mxu0 %v5915_v0 }
0x28a7   :  { %v3507_v6 = vpop.permute.xlu0 %3506 }
0x28a8   :  { %v6907_v58 = vadd.f32 %v3507_v6, %v3499_v19  ;;  %v3638_v19 = vrot.slane %v6893_v32, 2 }
0x28aa   :  { %5777 = vtanh.f32 %v6907_v58 }
0x28b4   :  { %v5778_v30 = vpop.eup %5777 }
0x28b5   :  { %3512 = vrot.lane.b32.xlu0 %v5778_v30, %s5919_s6 }
0x28b9   :  { %3396 = vrot.lane.b32.xlu0 %v3394_v11, %s5923_s1 }
0x2927   :  { %v3513_v18 = vpop.permute.xlu0 %3512 }
0x2928   :  { %v3515_v22 = vmul.f32 %v5776_v7, %v3513_v18 }
0x292a   :  { %v3519_v60 = vsub.f32 %v3515_v22, %v6857_v29 }
0x292b   :  { %v3397_v20 = vpop.permute.xlu0 %3396 }
0x292c   :  { %v3520_v47 = vmul.f32 %v3519_v60, %v6336_v55  ;;  %v6916_v43 = vadd.f32 %v3397_v20, %v6864_v14 }
0x292e   :  { %v6919_v44 = vadd.f32 %v3520_v47, %v6857_v29  ;;  %v3609_v59 = vrot.slane %v6916_v43, 2 }
0x2930   :  { %v3593_v40 = vpop.f32.mrb[30].mxu0  ;;  %3653 = vrot.lane.b32.xlu1 %v6919_v44, %s5921_s24  ;;  %3610 = vrot.lane.b32.xlu0 %v3609_v59, %s5921_s24 }
0x2931   :  { %v3598_v31 = vrot.slane %v3593_v40, 2  ;;  %v5213_v45 = vpop.f32.mrb[31].mxu0 }
0x2933   :  { %v3600_v14 = vadd.f32 %v3598_v31, %v6927_v2 }
0x2935   :  { %5779 = vtanh.f32 %v3600_v14  ;;  %v4735_v51 = vmul.f32 -1.442695, %v3600_v14 }
0x2937   :  { %5781 = vpow2.f32 %v4735_v51 }
0x293f   :  { %v5780_v9 = vpop.eup %5779 }
0x2940   :  { %3615 = vrot.lane.b32.xlu1 %v5780_v9, %s5919_s6 }
0x2941   :  { %v5782_v54 = vpop.eup %5781 }
0x2942   :  { %v3604_v37 = vadd.f32 1.0, %v5782_v54 }
0x2944   :  { %5783 = vrcp.f32 %v3604_v37 }
0x294e   :  { %v5784_v63 = vpop.eup %5783 }
0x29a2   :  { %v3654_v21 = vpop.permute.xlu1 %3653  ;;  %v3611_v7 = vpop.permute.xlu0 %3610 }
0x29a3   :  { %5223 = vmatmul.mubr.msk.f32.vlgmr.msra.gmra.mrb[28].mxu1 %vm198_vm4, %v3654_v21  ;;  %v3613_v38 = vmul.f32 %v5784_v63, %v3611_v7 }
0x29a4   :  { %5503 = vmatpush3.bf16.msra.mxu1 %v6596_v46  ;;  %5244 = vmatprep.mubr.msk.f32.mxu1 %vm5917_vm0, %v5916_v1 }
0x29a5   :  { %5504 = vmatprep.subr.bf16.mxu1 %v5915_v0 }
0x29a8   :  { %5506 = vmatpush3.bf16.msra.mxu1 %v6611_v13 }
0x29a9   :  { %5513 = vmatprep.subr.bf16.mxu1 %v5915_v0 }
0x29b2   :  { %v3616_v4 = vpop.permute.xlu1 %3615 }
0x29b3   :  { %v3618_v33 = vmul.f32 %v5784_v63, %v3616_v4 }
0x29b5   :  { %3620 = vrot.lane.b32.xlu1 %v3618_v33, %s5921_s24 }
0x2a27   :  { %v3621_v24 = vpop.permute.xlu1 %3620 }
0x2a28   :  { %v3623_v57 = vadd.f32 %v3621_v24, %v3613_v38 }
0x2a2a   :  { %5785 = vtanh.f32 %v3623_v57 }
0x2a34   :  { %v5786_v16 = vpop.eup %5785 }
0x2a35   :  { %3626 = vrot.lane.b32.xlu0 %v5786_v16, %s5919_s6 }
0x2a39   :  { %3639 = vrot.lane.b32.xlu0 %v3638_v19, %s5923_s1 }
0x2a76   :  { %v3723_v6 = vpop.f32.mrb[28].mxu1 }
0x2a77   :  { %v3728_v27 = vrot.slane %v3723_v6, 6  ;;  %v5224_v30 = vpop.f32.mrb[29].mxu1 }
0x2a78   :  { %v3770_v30 = vrot.slane %v6919_v44, 6 }
0x2a79   :  { %v3730_v11 = vadd.f32 %v3728_v27, %v6883_v56 }
0x2a7b   :  { %5787 = vtanh.f32 %v3730_v11  ;;  %v4737_v40 = vmul.f32 -1.442695, %v3730_v11 }
0x2a7d   :  { %5789 = vpow2.f32 %v4737_v40 }
0x2a85   :  { %v5788_v18 = vpop.eup %5787 }
0x2a86   :  { %3743 = vrot.lane.b32.xlu1 %v5788_v18, %s5919_s6 }
0x2a87   :  { %v5790_v31 = vpop.eup %5789 }
0x2a88   :  { %v3734_v45 = vadd.f32 1.0, %v5790_v31 }
0x2a8a   :  { %5791 = vrcp.f32 %v3734_v45 }
0x2a94   :  { %v5792_v14 = vpop.eup %5791 }
0x2aa7   :  { %v3627_v22 = vpop.permute.xlu0 %3626 }
0x2aa8   :  { %v3629_v60 = vmul.f32 %v5784_v63, %v3627_v22  ;;  %v3516_v63 = vsub.f32 %v6907_v58, %v6904_v62 }
0x2aaa   :  { %v3517_v4 = vmul.f32 %v3516_v63, %v6336_v55 }
0x2aab   :  { %v3640_v20 = vpop.permute.xlu0 %3639 }
0x2aac   :  { %v3642_v47 = vsub.f32 %v3629_v60, %v3640_v20  ;;  %v6962_v33 = vadd.f32 %v3517_v4, %v6904_v62  ;;  %v3630_v60 = vsub.f32 %v3623_v57, %v3611_v7 }
0x2aae   :  { %v3644_v59 = vrot.slane %v3642_v47, 6  ;;  %v3739_v38 = vrot.slane %v6962_v33, 6  ;;  %v3632_v47 = vrot.slane %v3630_v60, 6 }
0x2ab0   :  { %3645 = vrot.lane.b32.xlu0 %v3644_v59, %s5921_s24  ;;  %v3741_v24 = vmul.f32 %v5792_v14, %v3739_v38 }
0x2af8   :  { %v3744_v9 = vpop.permute.xlu1 %3743 }
0x2af9   :  { %v3746_v51 = vmul.f32 %v5792_v14, %v3744_v9 }
0x2afb   :  { %3748 = vrot.lane.b32.xlu1 %v3746_v51, %s5921_s24 }
0x2b22   :  { %v3646_v54 = vpop.permute.xlu0 %3645 }
0x2b23   :  { %v3648_v21 = vmul.f32 %v3646_v54, %v6358_v3 }
0x2b25   :  { %v6948_v37 = vadd.f32 %v3648_v21, %v6893_v32 }
0x2b27   :  { %5234 = vmatmul.mubr.msk.f32.vlgmr.msra.gmra.mrb[32].mxu0 %vm198_vm4, %v6948_v37 }
0x2b28   :  { %5509 = vmatpush3.bf16.msra.mxu0 %v6668_v8  ;;  %5255 = vmatprep.mubr.msk.f32.mxu0 %vm5917_vm0, %v5916_v1 }
0x2b29   :  { %5510 = vmatprep.subr.bf16.mxu0 %v5915_v0 }
0x2b2c   :  { %5512 = vmatpush3.bf16.msra.mxu0 %v6671_v28 }
0x2b2d   :  { %5519 = vmatprep.subr.bf16.mxu0 %v5915_v0 }
0x2b6d   :  { %v3749_v16 = vpop.permute.xlu1 %3748 }
0x2b6e   :  { %v3751_v19 = vadd.f32 %v3749_v16, %v3741_v24 }
0x2b70   :  { %5793 = vtanh.f32 %v3751_v19  ;;  %v3758_v16 = vsub.f32 %v3751_v19, %v3739_v38 }
0x2b7a   :  { %v5794_v6 = vpop.eup %5793 }
0x2b7b   :  { %3754 = vrot.lane.b32.xlu1 %v5794_v6, %s5919_s6  ;;  %v3900_v6 = vrot.slane %v6948_v37, 4 }
0x2bed   :  { %v3755_v27 = vpop.permute.xlu1 %3754 }
0x2bee   :  { %v3757_v11 = vmul.f32 %v5792_v14, %v3755_v27 }
0x2bf0   :  { %v3772_v18 = vsub.f32 %v3757_v11, %v3770_v30 }
0x2bf2   :  { %v3774_v58 = vrot.slane %v3772_v18, 2 }
0x2bf4   :  { %3775 = vrot.lane.b32.xlu0 %v3774_v58, %s5921_s24 }
0x2bfa   :  { %v3855_v55 = vpop.f32.mrb[32].mxu0 }
0x2bfb   :  { %v5235_v62 = vpop.f32.mrb[33].mxu0  ;;  %v3860_v59 = vrot.slane %v3855_v55, 4 }
0x2bfd   :  { %v3862_v40 = vadd.f32 %v3860_v59, %v6927_v2 }
0x2bff   :  { %5795 = vtanh.f32 %v3862_v40  ;;  %v4739_v54 = vmul.f32 -1.442695, %v3862_v40 }
0x2c01   :  { %5797 = vpow2.f32 %v4739_v54 }
0x2c09   :  { %v5796_v57 = vpop.eup %5795 }
0x2c0b   :  { %v5798_v21 = vpop.eup %5797 }
0x2c0c   :  { %v3866_v63 = vadd.f32 1.0, %v5798_v21 }
0x2c0e   :  { %5799 = vrcp.f32 %v3866_v63 }
0x2c66   :  { %v3776_v22 = vpop.permute.xlu0 %3775 }
0x2c67   :  { %v3778_v20 = vmul.f32 %v3776_v22, %v6279_v26 }
0x2c69   :  { %3780 = vrot.lane.b32.xlu1 %v3778_v20, %s5923_s1 }
0x2c6d   :  { %3633 = vrot.lane.b32.xlu1 %v3632_v47, %s5923_s1 }
0x2cdb   :  { %v3781_v31 = vpop.permute.xlu1 %3780 }
0x2cdc   :  { %v6973_v45 = vadd.f32 %v3781_v31, %v6919_v44 }
0x2cde   :  { %3915 = vrot.lane.b32.xlu0 %v6973_v45, %s5921_s24 }
0x2cdf   :  { %v3634_v14 = vpop.permute.xlu1 %3633 }
0x2ce0   :  { %v3636_v7 = vmul.f32 %v3634_v14, %v6358_v3  ;;  %v5800_v3 = vpop.eup %5799 }
0x2ce2   :  { %v6979_v9 = vadd.f32 %v3636_v7, %v6916_v43  ;;  %3877 = vrot.lane.b32.xlu0 %v5796_v57, %s5919_s6 }
0x2ce4   :  { %v3871_v51 = vrot.slane %v6979_v9, 4 }
0x2ce6   :  { %3872 = vrot.lane.b32.xlu1 %v3871_v51, %s5921_s24 }
0x2d50   :  { %v3916_v4 = vpop.permute.xlu0 %3915 }
0x2d51   :  { %5245 = vmatmul.mubr.msk.f32.vlgmr.msra.gmra.mrb[30].mxu1 %vm198_vm4, %v3916_v4 }
0x2d52   :  { %5515 = vmatpush3.bf16.msra.mxu1 %v6596_v46  ;;  %5266 = vmatprep.mubr.msk.f32.mxu1 %vm5917_vm0, %v5916_v1  ;;  %v3760_v46 = vrot.slane %v3758_v16, 2 }
0x2d53   :  { %5516 = vmatprep.subr.bf16.mxu1 %v5915_v0 }
0x2d54   :  { %v3878_v43 = vpop.permute.xlu0 %3877 }
0x2d55   :  { %v3880_v24 = vmul.f32 %v5800_v3, %v3878_v43 }
0x2d56   :  { %5518 = vmatpush3.bf16.msra.mxu1 %v6611_v13 }
0x2d57   :  { %3882 = vrot.lane.b32.xlu0 %v3880_v24, %s5921_s24  ;;  %5525 = vmatprep.subr.bf16.mxu1 %v5915_v0 }
0x2d58   :  { %v3873_v27 = vpop.permute.xlu1 %3872 }
0x2d59   :  { %v3875_v30 = vmul.f32 %v5800_v3, %v3873_v27 }
0x2d5b   :  { %3901 = vrot.lane.b32.xlu0 %v3900_v6, %s5923_s1 }
0x2d5f   :  { %3761 = vrot.lane.b32.xlu0 %v3760_v46, %s5923_s1 }
0x2dc9   :  { %v3883_v11 = vpop.permute.xlu0 %3882 }
0x2dca   :  { %v3885_v18 = vadd.f32 %v3883_v11, %v3875_v30 }
0x2dcc   :  { %5801 = vtanh.f32 %v3885_v18  ;;  %v3892_v46 = vsub.f32 %v3885_v18, %v3873_v27 }
0x2dcd   :  { %v3902_v58 = vpop.permute.xlu0 %3901 }
0x2dce   :  { %v3894_v11 = vrot.slane %v3892_v46, 4 }
0x2dd1   :  { %v3762_v55 = vpop.permute.xlu0 %3761 }
0x2dd2   :  { %v3764_v13 = vmul.f32 %v3762_v55, %v6279_v26 }
0x2dd4   :  { %3766 = vrot.lane.b32.xlu0 %v3764_v13, %s5921_s24 }
0x2dd6   :  { %v5802_v62 = vpop.eup %5801 }
0x2dd7   :  { %3888 = vrot.lane.b32.xlu1 %v5802_v62, %s5919_s6  ;;  %v4032_v62 = vrot.slane %v6973_v45, 4 }
0x2e24   :  { %v3985_v38 = vpop.f32.mrb[30].mxu1 }
0x2e25   :  { %v5246_v19 = vpop.f32.mrb[31].mxu1  ;;  %v3990_v22 = vrot.slane %v3985_v38, 4 }
0x2e27   :  { %v3992_v60 = vadd.f32 %v3990_v22, %v6883_v56 }
0x2e29   :  { %5803 = vtanh.f32 %v3992_v60  ;;  %v4741_v26 = vmul.f32 -1.442695, %v3992_v60 }
0x2e2b   :  { %5805 = vpow2.f32 %v4741_v26 }
0x2e33   :  { %v5804_v31 = vpop.eup %5803 }
0x2e35   :  { %v5806_v14 = vpop.eup %5805 }
0x2e36   :  { %v3996_v7 = vadd.f32 1.0, %v5806_v14 }
0x2e38   :  { %5807 = vrcp.f32 %v3996_v7 }
0x2e42   :  { %v5808_v21 = vpop.eup %5807 }
0x2e49   :  { %v3889_v20 = vpop.permute.xlu1 %3888 }
0x2e4a   :  { %v3891_v47 = vmul.f32 %v5800_v3, %v3889_v20  ;;  %v3767_v3 = vpop.permute.xlu0 %3766 }
0x2e4b   :  { %v7015_v43 = vadd.f32 %v3767_v3, %v6962_v33 }
0x2e4c   :  { %v3904_v59 = vsub.f32 %v3891_v47, %v3902_v58 }
0x2e4d   :  { %v4001_v24 = vrot.slane %v7015_v43, 4 }
0x2e4e   :  { %v3906_v40 = vrot.slane %v3904_v59, 4 }
0x2e4f   :  { %v4003_v16 = vmul.f32 %v5808_v21, %v4001_v24 }
0x2e50   :  { %3907 = vrot.lane.b32.xlu1 %v3906_v40, %s5921_s24 }
0x2e54   :  { %4005 = vrot.lane.b32.xlu1 %v5804_v31, %s5919_s6 }
0x2ec2   :  { %v3908_v57 = vpop.permute.xlu1 %3907 }
0x2ec3   :  { %v3910_v51 = vmul.f32 %v3908_v57, %v6274_v12 }
0x2ec5   :  { %v7003_v54 = vadd.f32 %v3910_v51, %v6948_v37 }
0x2ec6   :  { %v4006_v63 = vpop.permute.xlu1 %4005 }
0x2ec7   :  { %v4008_v4 = vmul.f32 %v5808_v21, %v4006_v63  ;;  %5256 = vmatmul.mubr.msk.f32.vlgmr.msra.gmra.mrb[34].mxu0 %vm198_vm4, %v7003_v54 }
0x2ec8   :  { %5521 = vmatpush3.bf16.msra.mxu0 %v6668_v8  ;;  %5277 = vmatprep.mubr.msk.f32.mxu0 %vm5917_vm0, %v5916_v1 }
0x2ec9   :  { %4010 = vrot.lane.b32.xlu1 %v4008_v4, %s5921_s24  ;;  %5522 = vmatprep.subr.bf16.mxu0 %v5915_v0 }
0x2ecc   :  { %5524 = vmatpush3.bf16.msra.mxu0 %v6671_v28 }
0x2ecd   :  { %5531 = vmatprep.subr.bf16.mxu0 %v5915_v0 }
0x2f3b   :  { %v4011_v6 = vpop.permute.xlu1 %4010 }
0x2f3c   :  { %v4013_v8 = vadd.f32 %v4011_v6, %v4003_v16  ;;  %v4162_v6 = vrot.slane %v7003_v54, 6 }
0x2f3e   :  { %5809 = vtanh.f32 %v4013_v8  ;;  %v4020_v3 = vsub.f32 %v4013_v8, %v4001_v24 }
0x2f40   :  { %v4022_v46 = vrot.slane %v4020_v3, 4 }
0x2f48   :  { %v5810_v30 = vpop.eup %5809 }
0x2f49   :  { %4016 = vrot.lane.b32.xlu0 %v5810_v30, %s5919_s6 }
0x2f4d   :  { %3895 = vrot.lane.b32.xlu0 %v3894_v11, %s5923_s1 }
0x2f9a   :  { %v4117_v28 = vpop.f32.mrb[34].mxu0 }
0x2f9b   :  { %v5257_v58 = vpop.f32.mrb[35].mxu0  ;;  %v4122_v55 = vrot.slane %v4117_v28, 6 }
0x2f9d   :  { %v4124_v13 = vadd.f32 %v4122_v55, %v6927_v2 }
0x2f9f   :  { %5811 = vtanh.f32 %v4124_v13  ;;  %v4743_v59 = vmul.f32 -1.442695, %v4124_v13 }
0x2fa1   :  { %5813 = vpow2.f32 %v4743_v59 }
0x2fa9   :  { %v5812_v20 = vpop.eup %5811 }
0x2fab   :  { %v5814_v40 = vpop.eup %5813 }
0x2fac   :  { %v4128_v31 = vadd.f32 1.0, %v5814_v40 }
0x2fae   :  { %5815 = vrcp.f32 %v4128_v31 }
0x2fb8   :  { %v5816_v14 = vpop.eup %5815 }
0x2fbb   :  { %v4017_v33 = vpop.permute.xlu0 %4016 }
0x2fbc   :  { %v4019_v38 = vmul.f32 %v5808_v21, %v4017_v33 }
0x2fbe   :  { %v4034_v19 = vsub.f32 %v4019_v38, %v4032_v62 }
0x2fbf   :  { %v3896_v22 = vpop.permute.xlu0 %3895 }
0x2fc0   :  { %v4036_v60 = vrot.slane %v4034_v19, 4  ;;  %v3898_v27 = vmul.f32 %v3896_v22, %v6274_v12 }
0x2fc2   :  { %4037 = vrot.lane.b32.xlu1 %v4036_v60, %s5921_s24  ;;  %v7025_v18 = vadd.f32 %v3898_v27, %v6979_v9 }
0x2fc4   :  { %v4133_v47 = vrot.slane %v7025_v18, 6 }
0x2fc6   :  { %4139 = vrot.lane.b32.xlu1 %v5812_v20, %s5919_s6  ;;  %v2369_v20 = vld [vmem:[%s7180_s2] sm:$0x1] }
0x2fca   :  { %4134 = vrot.lane.b32.xlu1 %v4133_v47, %s5921_s24  ;;  %v2371_v47 = vsel %vm2370_vm7, %v2369_v20, -inf }
0x3034   :  { %v4038_v26 = vpop.permute.xlu1 %4037 }
0x3035   :  { %v4040_v12 = vmul.f32 %v4038_v26, %v6218_v50 }
0x3037   :  { %4042 = vrot.lane.b32.xlu0 %v4040_v12, %s5923_s1 }
0x3038   :  { %v4140_v9 = vpop.permute.xlu1 %4139 }
0x3039   :  { %v4142_v7 = vmul.f32 %v5816_v14, %v4140_v9 }
0x303b   :  { %4144 = vrot.lane.b32.xlu0 %v4142_v7, %s5921_s24 }
0x303c   :  { %v4135_v57 = vpop.permute.xlu1 %4134 }
0x303d   :  { %v4137_v63 = vmul.f32 %v5816_v14, %v4135_v57 }
0x30a9   :  { %v4043_v51 = vpop.permute.xlu0 %4042 }
0x30aa   :  { %v7034_v21 = vadd.f32 %v4043_v51, %v6973_v45 }
0x30ac   :  { %4177 = vrot.lane.b32.xlu1 %v7034_v21, %s5921_s24 }
0x30ad   :  { %v4145_v4 = vpop.permute.xlu0 %4144 }
0x30ae   :  { %v4147_v16 = vadd.f32 %v4145_v4, %v4137_v63 }
0x30b0   :  { %5817 = vtanh.f32 %v4147_v16  ;;  %4163 = vrot.lane.b32.xlu1 %v4162_v6, %s5923_s1 }
0x30b4   :  { %4023 = vrot.lane.b32.xlu1 %v4022_v46, %s5923_s1 }
0x30ba   :  { %v5818_v30 = vpop.eup %5817 }
0x30bb   :  { %4150 = vrot.lane.b32.xlu0 %v5818_v30, %s5919_s6 }
0x311e   :  { %v4178_v11 = vpop.permute.xlu1 %4177 }
0x311f   :  { %5267 = vmatmul.mubr.msk.f32.vlgmr.msra.gmra.mrb[32].mxu1 %vm198_vm4, %v4178_v11 }
0x3120   :  { %5288 = vmatprep.mubr.msk.f32.mxu1 %vm5917_vm0, %v5916_v1 }
0x3122   :  { %v4164_v28 = vpop.permute.xlu1 %4163 }
0x3126   :  { %v4024_v24 = vpop.permute.xlu1 %4023 }
0x3127   :  { %v4026_v8 = vmul.f32 %v4024_v24, %v6218_v50 }
0x3129   :  { %4028 = vrot.lane.b32.xlu1 %v4026_v8, %s5921_s24 }
0x312d   :  { %v4151_v58 = vpop.permute.xlu0 %4150 }
0x312e   :  { %v4153_v55 = vmul.f32 %v5816_v14, %v4151_v58 }
0x3130   :  { %v4166_v13 = vsub.f32 %v4153_v55, %v4164_v28 }
0x3132   :  { %v4168_v33 = vrot.slane %v4166_v13, 2 }
0x3134   :  { %4169 = vrot.lane.b32.xlu0 %v4168_v33, %s5921_s24 }
0x314d   :  { %2372 = vmax.xlane.f32.xlu1 %v2371_v47 }
0x319b   :  { %v4029_v6 = vpop.permute.xlu1 %4028 }
0x319c   :  { %v4031_v46 = vadd.f32 %v4029_v6, %v7015_v43 }
0x319e   :  { %v4263_v30 = vrot.slane %v4031_v46, 2 }
0x31a6   :  { %v4170_v62 = vpop.permute.xlu0 %4169 }
0x31a7   :  { %v4172_v38 = vmul.f32 %v4170_v62, %v6203_v15 }
0x31a9   :  { %v7050_v19 = vadd.f32 %v4172_v38, %v7003_v54 }
0x31ab   :  { %5278 = vmatmul.mubr.msk.f32.vlgmr.msra.gmra.mrb[36].mxu0 %vm198_vm4, %v7050_v19 }
0x31ac   :  { %5299 = vmatprep.mubr.msk.f32.mxu0 %vm5917_vm0, %v5916_v1 }
0x31da   :  { %v2373_v58 = vpop.xlane.xlu1 %2372 }
0x31db   :  { %v2374_v55 = vsub.f32 %v2369_v20, %v2373_v58 }
0x31dd   :  { %v2375_v13 = vmul.f32 1.442695, %v2374_v55 }
0x31f2   :  { %v4247_v50 = vpop.f32.mrb[32].mxu1 }
0x31f3   :  { %v4252_v22 = vrot.slane %v4247_v50, 2  ;;  %v5268_v60 = vpop.f32.mrb[33].mxu1 }
0x31f5   :  { %v4254_v27 = vadd.f32 %v4252_v22, %v6883_v56  ;;  %v4154_v56 = vsub.f32 %v4147_v16, %v4135_v57 }
0x31f7   :  { %5819 = vtanh.f32 %v4254_v27  ;;  %v4745_v40 = vmul.f32 -1.442695, %v4254_v27  ;;  %v4156_v7 = vrot.slane %v4154_v56, 2  ;;  %v4282_v27 = vrot.slane %v7034_v21, 2 }
0x31f9   :  { %5821 = vpow2.f32 %v4745_v40 }
0x3201   :  { %v5820_v59 = vpop.eup %5819 }
0x3202   :  { %4267 = vrot.lane.b32.xlu0 %v5820_v59, %s5919_s6 }
0x3203   :  { %v5822_v31 = vpop.eup %5821 }
0x3204   :  { %v4258_v26 = vadd.f32 1.0, %v5822_v31 }
0x3206   :  { %5823 = vrcp.f32 %v4258_v26 }
0x3210   :  { %v5824_v12 = vpop.eup %5823 }
0x3211   :  { %v4265_v11 = vmul.f32 %v5824_v12, %v4263_v30 }
0x3274   :  { %v4268_v14 = vpop.permute.xlu0 %4267 }
0x3275   :  { %v4270_v9 = vmul.f32 %v5824_v12, %v4268_v14 }
0x3277   :  { %4272 = vrot.lane.b32.xlu0 %v4270_v9, %s5921_s24 }
0x327b   :  { %4157 = vrot.lane.b32.xlu0 %v4156_v7, %s5923_s1 }
0x327e   :  { %v4367_v51 = vpop.f32.mrb[36].mxu0 }
0x327f   :  { %v4371_v63 = vadd.f32 %v4367_v51, %v6927_v2  ;;  %v5279_v4 = vpop.f32.mrb[37].mxu0 }
0x3281   :  { %5825 = vtanh.f32 %v4371_v63  ;;  %v4747_v43 = vmul.f32 -1.442695, %v4371_v63 }
0x328b   :  { %v5826_v3 = vpop.eup %5825 }
0x328c   :  { %4385 = vrot.lane.b32.xlu0 %v5826_v3, %s5919_s6 }
0x32e9   :  { %v4273_v57 = vpop.permute.xlu0 %4272 }
0x32ea   :  { %v4275_v16 = vadd.f32 %v4273_v57, %v4265_v11 }
0x32ec   :  { %5827 = vtanh.f32 %v4275_v16 }
0x32ed   :  { %v4158_v28 = vpop.permute.xlu0 %4157  ;;  %5829 = vpow2.f32 %v2375_v13 }
0x32ee   :  { %v4160_v24 = vmul.f32 %v4158_v28, %v6203_v15  ;;  %5831 = vpow2.f32 %v4747_v43 }
0x32f0   :  { %v4161_v8 = vadd.f32 %v4160_v24, %v7025_v18 }
0x32f2   :  { %4380 = vrot.lane.b32.xlu1 %v4161_v8, %s5921_s24  ;;  %v4413_v8 = vld [vmem:[%s7189_s11 + $0x8] sm:$0xff] }
0x32f6   :  { %v5828_v2 = vpop.eup %5827 }
0x32f7   :  { %4278 = vrot.lane.b32.xlu0 %v5828_v2, %s5919_s6  ;;  %v5830_v33 = vpop.eup %5829 }
0x32f8   :  { %v2377_v62 = vsel %vm2370_vm7, %v5830_v33, 0.0  ;;  %v5832_v38 = vpop.eup %5831 }
0x32f9   :  { %v4375_v50 = vadd.f32 1.0, %v5832_v38  ;;  %v4415_v38 = vld [vmem:[%s7189_s11 + $0x18] sm:$0xff] }
0x32fb   :  { %5833 = vrcp.f32 %v4375_v50 }
0x32fe   :  { %v4386_v15 = vpop.permute.xlu0 %4385 }
0x3305   :  { %v7072_v18 = vpop.eup %5833 }
0x3306   :  { %v4388_v22 = vmul.f32 %v7072_v18, %v4386_v15 }
0x3316   :  { %2378 = vadd.xlane.f32.xlu0 %v2377_v62 }
0x332c   :  { %4390 = vrot.lane.b32.xlu0 %v4388_v22, %s5921_s24 }
0x3364   :  { %v4381_v9 = vpop.permute.xlu1 %4380 }
0x3365   :  { %v4383_v7 = vmul.f32 %v7072_v18, %v4381_v9 }
0x3369   :  { %v4279_v60 = vpop.permute.xlu0 %4278 }
0x336a   :  { %v4281_v20 = vmul.f32 %v5824_v12, %v4279_v60 }
0x336c   :  { %v4284_v47 = vsub.f32 %v4281_v20, %v4282_v27 }
0x336e   :  { %v4286_v59 = vrot.slane %v4284_v47, 6 }
0x3370   :  { %4287 = vrot.lane.b32.xlu1 %v4286_v59, %s5921_s24 }
0x33a3   :  { %v2379_v40 = vpop.xlane.xlu0 %2378 }
0x33a4   :  { %5835 = vrcp.f32 %v2379_v40 }
0x33a7   :  { %v4391_v12 = vpop.permute.xlu0 %4390 }
0x33a8   :  { %v4393_v51 = vadd.f32 %v4391_v12, %v4383_v7 }
0x33aa   :  { %5837 = vtanh.f32 %v4393_v51 }
0x33ae   :  { %v5836_v31 = vpop.eup %5835 }
0x33af   :  { %v2381_v26 = vmul.f32 %v5836_v31, %v5830_v33 }
0x33b1   :  { %v2386_v14 = vrot.slane %v2381_v26, %v6121_v25 }
0x33b3   :  { %v2388_v56 = vmul.f32 %v6148_v61, %v2386_v14 }
0x33b4   :  { %v5838_v25 = vpop.eup %5837 }
0x33b5   :  { %3286 = vperm.xlu0 %5570, %v2388_v56   ;;  %2490 = vperm.xlu1 %5571, %v2388_v56  }
0x33b9   :  { %5575 = vset.pattern.permute.xlu0 %v5926_v52  ;;  %5572 = vset.pattern.permute.xlu1 %v5922_v35  ;;  %v4417_v35 = vld [vmem:[%s7189_s11 + $0x28] sm:$0xff] }
0x33ba   :  { %3148 = vperm.xlu0 %5575, %v2388_v56   ;;  %2746 = vperm.xlu1 %5572, %v2388_v56  }
0x33be   :  { %5577 = vset.pattern.permute.xlu0 %v5920_v48  ;;  %5573 = vset.pattern.permute.xlu1 %v5925_v41  ;;  %v4416_v48 = vld [vmem:[%s7189_s11 + $0x20] sm:$0xff] }
0x33bf   :  { %2608 = vperm.xlu0 %5577, %v2388_v56   ;;  %3016 = vperm.xlu1 %5573, %v2388_v56   ;;  %v5526_v41 = vpack.c.bf16 %v4417_v35, %v4416_v48 }
0x33c1   :  { %5527 = vmatpush3.bf16.msra.mxu1 %v5526_v41 }
0x33c2   :  { %5528 = vmatprep.subr.bf16.mxu1 %v5915_v0 }
0x33c3   :  { %5574 = vset.pattern.permute.xlu1 %v5927_v53  ;;  %5578 = vset.pattern.permute.xlu0 %v5927_v53 }
0x33c4   :  { %3411 = vperm.xlu1 %5574, %v2388_v56  }
0x33c8   :  { %5576 = vset.pattern.permute.xlu1 %v5924_v5 }
0x33c9   :  { %2878 = vperm.xlu1 %5576, %v2388_v56  }
0x33cd   :  { %4396 = vrot.lane.b32.xlu1 %v5838_v25, %s5919_s6 }
0x33d1   :  { %4400 = vrot.lane.b32.xlu1 %v7050_v19, %s5923_s1 }
0x33e2   :  { %v4288_v52 = vpop.permute.xlu1 %4287 }
0x33e3   :  { %v4290_v5 = vmul.f32 %v4288_v52, %v6171_v23  ;;  %v4412_v23 = vld [vmem:[%s7189_s11] sm:$0xff]  ;;  %v4578_v52 = vld [vmem:[%s7191_s13 + $0x8] sm:$0xff] }
0x33e5   :  { %4292 = vrot.lane.b32.xlu1 %v4290_v5, %s5923_s1 }
0x3434   :  { %v2491_v53 = vpop.permute.xlu1 %2490  ;;  %v3287_v4 = vpop.permute.xlu0 %3286 }
0x3435   :  { %v2493_v11 = vmul.f32 %v2491_v53, %v6690_v17  ;;  %v4418_v17 = vld [vmem:[%s7189_s11 + $0x30] sm:$0xff]  ;;  %v3289_v62 = vmul.f32 %v3287_v4, %v6857_v29  ;;  %v3650_v60 = vmul.f32 %v6948_v37, %v3287_v4 }
0x3439   :  { %v2747_v63 = vpop.permute.xlu1 %2746  ;;  %v3149_v6 = vpop.permute.xlu0 %3148 }
0x343a   :  { %v2749_v30 = vmul.f32 %v2747_v63, %v6740_v34  ;;  %v5532_v34 = vpack.c.bf16 %v4413_v8, %v4412_v23  ;;  %v3151_v43 = vmul.f32 %v3149_v6, %v6843_v36  ;;  %v3784_v9 = vmul.f32 %v6973_v45, %v3149_v6  ;;  %v4750_v6 = vld [vmem:[%s7190_s12] ss:$0 sm:$0xff] }
0x343c   :  { %v2750_v28 = vadd.f32 %v2749_v30, %v2493_v11  ;;  %5533 = vmatpush3.bf16.msra.mxu0 %v5532_v34 }
0x343d   :  { %5534 = vmatprep.subr.bf16.mxu0 %v5915_v0 }
0x343e   :  { %v3017_v3 = vpop.permute.xlu1 %3016  ;;  %v2609_v16 = vpop.permute.xlu0 %2608 }
0x343f   :  { %v3019_v57 = vmul.f32 %v3017_v3, %v6793_v49  ;;  %v2611_v2 = vmul.f32 %v2609_v16, %v6756_v42  ;;  %v4419_v49 = vld [vmem:[%s7189_s11 + $0x38] sm:$0xff]  ;;  %v3912_v59 = vmul.f32 %v7003_v54, %v3017_v3 }
0x3440   :  { %v5529_v13 = vpack.c.bf16 %v4419_v49, %v4418_v17 }
0x3441   :  { %v3020_v55 = vadd.f32 %v3019_v57, %v2750_v28  ;;  %v4751_v57 = vld [vmem:[%s7192_s14] ss:$0 sm:$0xff] }
0x3442   :  { %5530 = vmatpush3.bf16.msra.mxu1 %v5529_v13 }
0x3443   :  { %v3412_v46 = vpop.permute.xlu1 %3411  ;;  %5537 = vmatprep.subr.bf16.mxu1 %v5915_v0  ;;  %v3290_v22 = vadd.f32 %v3289_v62, %v3020_v55 }
0x3444   :  { %v3414_v50 = vmul.f32 %v3412_v46, %v6893_v32  ;;  %v3522_v29 = vmul.f32 %v6919_v44, %v3412_v46  ;;  %v4174_v32 = vmul.f32 %v7050_v19, %v2747_v63 }
0x3446   :  { %v3523_v26 = vadd.f32 %v3522_v29, %v3290_v22 }
0x3448   :  { %v2879_v24 = vpop.permute.xlu1 %2878  ;;  %v3785_v37 = vadd.f32 %v3784_v9, %v3523_v26 }
0x3449   :  { %v2881_v58 = vmul.f32 %v2879_v24, %v6799_v39  ;;  %v4414_v39 = vld [vmem:[%s7189_s11 + $0x10] sm:$0xff] }
0x344a   :  { %v5535_v36 = vpack.c.bf16 %v4415_v38, %v4414_v39 }
0x344b   :  { %v2882_v33 = vadd.f32 %v2881_v58, %v2611_v2 }
0x344c   :  { %v4397_v42 = vpop.permute.xlu1 %4396  ;;  %5536 = vmatpush3.bf16.msra.mxu0 %v5535_v36 }
0x344d   :  { %v3152_v15 = vadd.f32 %v3151_v43, %v2882_v33  ;;  %v4399_v20 = vmul.f32 %v7072_v18, %v4397_v42  ;;  %v4046_v18 = vmul.f32 %v7034_v21, %v2879_v24 }
0x344f   :  { %v3415_v27 = vadd.f32 %v3414_v50, %v3152_v15  ;;  %v4047_v54 = vadd.f32 %v4046_v18, %v3785_v37 }
0x3450   :  { %v4401_v47 = vpop.permute.xlu1 %4400 }
0x3451   :  { %v3651_v40 = vadd.f32 %v3650_v60, %v3415_v27  ;;  %v4403_v31 = vsub.f32 %v4399_v20, %v4401_v47 }
0x3453   :  { %v4404_v14 = vmul.f32 %v4403_v31, %v6154_v10  ;;  %v3913_v56 = vadd.f32 %v3912_v59, %v3651_v40 }
0x3455   :  { %4406 = vrot.lane.b32.xlu0 %v4404_v14, %s5921_s24  ;;  %v4175_v44 = vadd.f32 %v4174_v32, %v3913_v56 }
0x3457   :  { %v4293_v12 = vpop.permute.xlu1 %4292 }
0x3458   :  { %v4295_v7 = vadd.f32 %v4293_v12, %v7034_v21  ;;  %v4577_v21 = vld [vmem:[%s7191_s13] sm:$0xff] }
0x3459   :  { %v5538_v5 = vpack.c.bf16 %v4578_v52, %v4577_v21 }
0x345a   :  { %v4296_v51 = vmul.f32 %v4295_v7, %v2609_v16  ;;  %v4662_v16 = vsub.f32 1.0, %v6148_v61 }
0x345c   :  { %v4297_v25 = vadd.f32 %v4296_v51, %v4047_v54  ;;  %v4663_v2 = vmul.f32 -1e+30, %v4662_v16 }
0x345e   :  { %4494 = vrot.lane.b32.xlu1 %v4297_v25, %s5921_s24 }
0x34c7   :  { %v4407_v48 = vpop.permute.xlu0 %4406 }
0x34c8   :  { %v4409_v10 = vadd.f32 %v4407_v48, %v7050_v19  ;;  %v4579_v19 = vld [vmem:[%s7191_s13 + $0x10] sm:$0xff] }
0x34ca   :  { %v4410_v35 = vmul.f32 %v4409_v10, %v2491_v53 }
0x34cc   :  { %v4411_v41 = vadd.f32 %v4410_v35, %v4175_v44 }
0x34ce   :  { %5289 = vmatmul.mubr.msk.f32.vlgmr.msra.gmra.mrb[34].mxu1 %vm198_vm4, %v4411_v41 }
0x34cf   :  { %5310 = vmatprep.mubr.msk.f32.mxu1 %vm5917_vm0, %v5916_v1  ;;  %5539 = vmatpush3.bf16.msra.mxu1 %v5538_v5  ;;  %v4580_v1 = vld [vmem:[%s7191_s13 + $0x18] sm:$0xff]  ;;  %s5929_s13 = smov [#allocation8]  }
0x34d0   :  { %v4495_v45 = vpop.permute.xlu1 %4494  ;;  %5540 = vmatprep.subr.bf16.mxu1 %v5915_v0  ;;  %v5541_v53 = vpack.c.bf16 %v4580_v1, %v4579_v19  ;;  %s4673_s20 = sshll.u32 %s5929_s13, 4  ;;  %s4674_s20 = int_to_ptr.vmem [resolvable:$true] %s4673_s20 }
0x34d1   :  { %5300 = vmatmul.mubr.msk.f32.vlgmr.msra.gmra.mrb[38].mxu0 %vm198_vm4, %v4495_v45  ;;  %s5883_s12 = scalar_lea.vmem %s4674_s20, 32  ;;  %p5888_p3 = scmp.lt.s32.totalorder %s4674_s20, %s4674_s20 }
0x34d2   :  { %p5884_p2 = scmp.ne.s32.totalorder %s4674_s20, %s5883_s12  ;;  %p5889_p4 = scmp.lt.s32.totalorder %s5883_s12, %s5883_s12 }
0x34d3   :  { %5542 = vmatpush3.bf16.msra.mxu1 %v5541_v53 }
0x34d4   :  { %p5890_p5 = por %p5889_p4, %p5888_p3 }
0x34d6   :  { %p5891_p6 = pnand %p5890_p5, %p5884_p2 }
0x35a1   :  { %v4489_v63 = vpop.f32.mrb[34].mxu1 }
0x35a2   :  { %v5290_v4 = vpop.f32.mrb[35].mxu1 }
0x35a4   :  { %v4564_v3 = vpop.f32.mrb[38].mxu0 }
0x35a5   :  { %v4565_v46 = vadd.f32 %v4564_v3, %v4489_v63  ;;  %v5301_v30 = vpop.f32.mrb[39].mxu0 }
0x35a7   :  { %v4575_v0 = vadd.f32 %v4750_v6, %v4565_v46 }
0x35a9   :  { %v4576_v11 = vmax.f32 %v4575_v0, 0.0 }
0x35ab   :  { %5311 = vmatmul.mubr.msk.f32.vlgmr.msra.gmra.mrb[36].mxu1 %vm198_vm4, %v4576_v11 }
0x367e   :  { %v4657_v28 = vpop.f32.mrb[36].mxu1 }
0x367f   :  { %v4658_v24 = vadd.f32 %v4751_v57, %v4657_v28  ;;  %v5312_v23 = vpop.f32.mrb[37].mxu1 }
0x3681   :  { %v4661_v8 = vmul.f32 %v6148_v61, %v4658_v24 }
0x3683   :  { %v4664_v58 = vadd.f32 %v4663_v2, %v4661_v8 }
0x3685   :  { %4666 = vst.msk [vmem:[#allocation8] sm:$0x3] %vm4665_vm8, %v4664_v58 }
0x3686   :  { %5894 = shalt.err (!%p5891_p6)
}
0x3687   :  { %s5895_s0 = scalar_lea.hbm %s7193_s15, 32 }
0x3688   :  { %p5896_p7 = scmp.ne.s32.totalorder %s7193_s15, %s5895_s0  ;;  %p5899_p8 = scmp.lt.u32.totalorder %s5895_s0, %s7193_s15 }
0x368a   :  { %p5901_p9 = pnand %p5899_p8, %p5896_p7 }
0x368c   :  { %5904 = shalt.err (!%p5901_p9)
}
0x368d   :  { %4676 = dma.vmem_to_hbm [thread:$0]  %s4674_s20, 32, %s7193_s15, [#allocation5]  }
0x368e   :  { %5909 = dma.done.wait [#allocation5], 32  }
0x368f   :  { %5910 = vsyncadd [#allocation5], 4294967264 }
0x3690   :  { %4680 = vsyncpa [#allocation4], 1 }
0x3691   :  { %4681 = vsyncpa [#allocation7], 1 }
0x3692   :  { %4682 = vsyncpa [#allocation5], 1 }

</bundles_post_ra>
